<compile_context>
chip_gen: v7x
topology: tpu7x:2x2x1
jax: 0.10.0
libtpu: 0.0.40
codegen_flags: <defaults>
</compile_context>

<pallas_src>
import jax
import jax.numpy as jnp
from jax.experimental import pallas as pl
from jax.experimental.pallas import tpu as pltpu

KSIZE = 5      # every conv / deconv in the module is 5x5, stride 1, padding 0
CPAD = 128     # lane-padded channel width for all intermediate activations

_CPARAMS = pltpu.CompilerParams(
    dimension_semantics=("parallel",),
    vmem_limit_bytes=32 * 1024 * 1024,   # modest request; fits v7x's 64 MiB/TC
)


# ----------------------------------------------------------------------------
# Pallas kernels
# ----------------------------------------------------------------------------
def _make_conv_kernel(iw):
    """Fused 5x5 VALID conv for one sample. `iw` is the input image width."""
    K = KSIZE

    def kernel(x_ref, w_ref, b_ref, o_ref, acc_ref):
        # x_ref : (1, H*W, Cin)  f32   -- whole image, VMEM resident
        # w_ref : (K*K, Cin, Cpad) bf16 -- one (Cin, Cpad) matrix per tap
        # b_ref : (1, Cpad)       f32
        # o_ref : (1, Ho, Wo, Cpad) f32
        # acc_ref: (Lh, Cpad) f32 scratch, Lh = (Ho-1)*W + Wo
        _, ho, wo, _ = o_ref.shape
        lh = acc_ref.shape[0]

        # 25 shifted matmuls: tap (kh,kw) contributes x[flat + kh*W + kw] @ w_t
        # for every output pixel at once (f32 accumulation in VMEM scratch).
        for t in range(K * K):
            kh, kw = divmod(t, K)
            lhs = x_ref[0, pl.ds(kh * iw + kw, lh), :].astype(jnp.bfloat16)
            z = jnp.dot(lhs, w_ref[t], preferred_element_type=jnp.float32)
            if t == 0:
                acc_ref[...] = z
            else:
                acc_ref[...] += z

        b = b_ref[...]                       # (1, Cpad)

        def row(i, carry):
            # valid output row i lives at flat rows [i*W, i*W + Wo) of acc
            o_ref[0, i] = acc_ref[pl.ds(i * iw, wo), :] + b
            return carry

        jax.lax.fori_loop(0, ho, row, 0)

    return kernel


def _maxpool_kernel(x_ref, v_ref, i_ref):
    # x_ref: (1, Ho, 2, Wo, 2*C); v_ref/i_ref: (1, Ho, Wo, C)
    c = v_ref.shape[3]
    best = x_ref[0, :, 0, :, 0:c]
    bidx = jnp.zeros(best.shape, jnp.int32)
    for j in range(1, 4):
        r, cc = divmod(j, 2)
        v = x_ref[0, :, r, :, cc * c:(cc + 1) * c]
        take = v > best          # strict '>' keeps the first max (PyTorch tie-break)
        best = jnp.where(take, v, best)
        bidx = jnp.where(take, j, bidx)
    v_ref[0] = best
    i_ref[0] = bidx


def _unpool_kernel(v_ref, i_ref, o_ref):
    # v_ref/i_ref: (1, Ho, Wo, C); o_ref: (1, Ho, 2, Wo, 2*C)
    c = v_ref.shape[3]
    v = v_ref[0]
    idx = i_ref[0]
    zero = jnp.zeros_like(v)
    for j in range(4):
        r, cc = divmod(j, 2)
        o_ref[0, :, r, :, cc * c:(cc + 1) * c] = jnp.where(idx == j, v, zero)


# ----------------------------------------------------------------------------
# Pallas wrappers
# ----------------------------------------------------------------------------
def conv2d_pallas(x, w_t, b2):
    """x: (N,H,W,Cin) f32, w_t: (K*K,Cin,Cpad) bf16, b2: (1,Cpad) f32 -> (N,Ho,Wo,Cpad)."""
    n, h, iw, cin = x.shape
    kk, cin_w, cpad = w_t.shape
    assert cin_w == cin and kk == KSIZE * KSIZE
    ho, wo = h - KSIZE + 1, iw - KSIZE + 1
    lh = (ho - 1) * iw + wo
    x2 = x.reshape(n, h * iw, cin)              # free row-major reshape
    return pl.pallas_call(
        _make_conv_kernel(iw),
        out_shape=jax.ShapeDtypeStruct((n, ho, wo, cpad), jnp.float32),
        grid_spec=pltpu.PrefetchScalarGridSpec(
            num_scalar_prefetch=0,
            grid=(n,),
            in_specs=[
                pl.BlockSpec((1, h * iw, cin), lambda i: (i, 0, 0)),
                pl.BlockSpec((kk, cin, cpad), lambda i: (0, 0, 0)),   # resident
                pl.BlockSpec((1, cpad), lambda i: (0, 0)),
            ],
            out_specs=pl.BlockSpec((1, ho, wo, cpad), lambda i: (i, 0, 0, 0)),
            scratch_shapes=[pltpu.VMEM((lh, cpad), jnp.float32)],
        ),
        compiler_params=_CPARAMS,
    )(x2, w_t, b2)


def deconv2d_pallas(x, w_t, b2):
    # stride=1/pad=0 transposed conv == full-padding conv with flipped taps
    p = KSIZE - 1
    xp = jnp.pad(x, ((0, 0), (p, p), (p, p), (0, 0)))
    return conv2d_pallas(xp, w_t, b2)


def maxpool2x2(x):
    """nn.MaxPool2d(2, return_indices=True) on NHWC (H, W even)."""
    n, h, w, c = x.shape
    ho, wo = h // 2, w // 2
    x6 = x.reshape(n, ho, 2, wo, 2 * c)         # free row-major reshape
    return pl.pallas_call(
        _maxpool_kernel,
        out_shape=(jax.ShapeDtypeStruct((n, ho, wo, c), jnp.float32),
                   jax.ShapeDtypeStruct((n, ho, wo, c), jnp.int32)),
        grid_spec=pltpu.PrefetchScalarGridSpec(
            num_scalar_prefetch=0,
            grid=(n,),
            in_specs=[pl.BlockSpec((1, ho, 2, wo, 2 * c),
                                   lambda i: (i, 0, 0, 0, 0))],
            out_specs=(pl.BlockSpec((1, ho, wo, c), lambda i: (i, 0, 0, 0)),
                       pl.BlockSpec((1, ho, wo, c), lambda i: (i, 0, 0, 0))),
        ),
        compiler_params=_CPARAMS,
    )(x6)


def maxunpool2x2(vals, idx):
    """nn.MaxUnpool2d(2) on NHWC input, using the local window indices above."""
    n, ho, wo, c = vals.shape
    y6 = pl.pallas_call(
        _unpool_kernel,
        out_shape=jax.ShapeDtypeStruct((n, ho, 2, wo, 2 * c), jnp.float32),
        grid_spec=pltpu.PrefetchScalarGridSpec(
            num_scalar_prefetch=0,
            grid=(n,),
            in_specs=[pl.BlockSpec((1, ho, wo, c), lambda i: (i, 0, 0, 0)),
                      pl.BlockSpec((1, ho, wo, c), lambda i: (i, 0, 0, 0))],
            out_specs=pl.BlockSpec((1, ho, 2, wo, 2 * c),
                                   lambda i: (i, 0, 0, 0, 0)),
        ),
        compiler_params=_CPARAMS,
    )(vals, idx)
    return y6.reshape(n, 2 * ho, 2 * wo, c)     # free row-major reshape


# ----------------------------------------------------------------------------
# Weight preparation (PyTorch layouts -> per-tap, lane-padded, bf16)
# ----------------------------------------------------------------------------
def _prep_conv_w(w, cin_pad, cout_pad):
    # PyTorch Conv2d weight (Cout, Cin, K, K)
    cout, cin, k, _ = w.shape
    wt = jnp.transpose(w, (2, 3, 1, 0)).reshape(k * k, cin, cout)
    wt = jnp.pad(wt, ((0, 0), (0, cin_pad - cin), (0, cout_pad - cout)))
    return wt.astype(jnp.bfloat16)


def _prep_deconv_w(w, cin_pad, cout_pad):
    # PyTorch ConvTranspose2d weight (Cin, Cout, K, K) -> flipped taps
    cin, cout, k, _ = w.shape
    wt = jnp.transpose(jnp.flip(w, (2, 3)), (2, 3, 0, 1)).reshape(k * k, cin, cout)
    wt = jnp.pad(wt, ((0, 0), (0, cin_pad - cin), (0, cout_pad - cout)))
    return wt.astype(jnp.bfloat16)


def _prep_bias(b, cout_pad):
    return jnp.pad(b, (0, cout_pad - b.shape[0])).astype(jnp.float32).reshape(1, cout_pad)


# ----------------------------------------------------------------------------
# Plain-JAX references (for correctness checks only)
# ----------------------------------------------------------------------------
def conv2d_ref(x, w, b):
    y = jax.lax.conv_general_dilated(
        x, jnp.transpose(w, (2, 3, 1, 0)), (1, 1), "VALID",
        dimension_numbers=("NHWC", "HWIO", "NHWC"))
    return y + b


def deconv_ref(x, w, b):
    # transposed conv == VJP of the corresponding VALID forward conv
    cin, cout, k, _ = w.shape
    n, h, wd, _ = x.shape
    w_hwio = jnp.transpose(w, (2, 3, 1, 0))          # (K,K,Cout,Cin)
    u0 = jnp.zeros((n, h + k - 1, wd + k - 1, cout), jnp.float32)
    fwd = lambda u: jax.lax.conv_general_dilated(
        u, w_hwio, (1, 1), "VALID", dimension_numbers=("NHWC", "HWIO", "NHWC"))
    y = jax.vjp(fwd, u0)[1](x)[0]
    return y + b


def maxpool_ref(x):
    n, h, w, c = x.shape
    ho, wo = h // 2, w // 2
    xr = (x.reshape(n, ho, 2, wo, 2, c).transpose(0, 2, 4, 1, 3, 5)
           .reshape(n, 4, ho, wo, c))
    return jnp.max(xr, axis=1), jnp.argmax(xr, axis=1).astype(jnp.int32)


def maxunpool_ref(vals, idx):
    n, ho, wo, c = vals.shape
    slots = jnp.arange(4, dtype=jnp.int32).reshape(1, 4, 1, 1, 1)
    y = jnp.where(idx[:, None] == slots, vals[:, None], 0.0)
    return (y.reshape(n, 2, 2, ho, wo, c).transpose(0, 3, 1, 4, 2, 5)
             .reshape(n, 2 * ho, 2 * wo, c))


# ----------------------------------------------------------------------------
# The Autoencoders forward pass
# ----------------------------------------------------------------------------
def forward(params, x_nchw):
    x = jnp.transpose(x_nchw, (0, 2, 3, 1)).astype(jnp.float32)   # NCHW -> NHWC

    x = conv2d_pallas(x, _prep_conv_w(params["conv1_w"], 3, CPAD),
                      _prep_bias(params["conv1_b"], CPAD))
    x, ind1 = maxpool2x2(x)
    x = conv2d_pallas(x, _prep_conv_w(params["conv2_w"], CPAD, CPAD),
                      _prep_bias(params["conv2_b"], CPAD))
    x, ind2 = maxpool2x2(x)
    x = conv2d_pallas(x, _prep_conv_w(params["conv3_w"], CPAD, CPAD),
                      _prep_bias(params["conv3_b"], CPAD))
    x = deconv2d_pallas(x, _prep_deconv_w(params["deconv1_w"], CPAD, CPAD),
                        _prep_bias(params["deconv1_b"], CPAD))
    x = maxunpool2x2(x, ind2)
    x = deconv2d_pallas(x, _prep_deconv_w(params["deconv2_w"], CPAD, CPAD),
                        _prep_bias(params["deconv2_b"], CPAD))
    x = maxunpool2x2(x, ind1)
    x = deconv2d_pallas(x, _prep_deconv_w(params["deconv3_w"], CPAD, CPAD),
                        _prep_bias(params["deconv3_b"], CPAD))
    x = x[..., :3]                              # drop lane-padding channels
    return jnp.transpose(x, (0, 3, 1, 2))       # NHWC -> NCHW


def init_params(key):
    # Deterministic synthetic params; shapes match the PyTorch module exactly.
    def uinit(k, shape, fan_in):
        bound = 1.0 / (fan_in ** 0.5)
        return jax.random.uniform(k, shape, jnp.float32, -bound, bound)

    ks = jax.random.split(key, 12)
    K = KSIZE
    return {
        # Conv2d weights: (Cout, Cin, K, K)
        "conv1_w": uinit(ks[0], (64, 3, K, K), 3 * K * K),
        "conv1_b": uinit(ks[1], (64,), 3 * K * K),
        "conv2_w": uinit(ks[2], (64, 64, K, K), 64 * K * K),
        "conv2_b": uinit(ks[3], (64,), 64 * K * K),
        "conv3_w": uinit(ks[4], (128, 64, K, K), 64 * K * K),
        "conv3_b": uinit(ks[5], (128,), 64 * K * K),
        # ConvTranspose2d weights: (Cin, Cout, K, K)
        "deconv1_w": uinit(ks[6], (128, 64, K, K), 64 * K * K),
        "deconv1_b": uinit(ks[7], (64,), 64 * K * K),
        "deconv2_w": uinit(ks[8], (64, 64, K, K), 64 * K * K),
        "deconv2_b": uinit(ks[9], (64,), 64 * K * K),
        "deconv3_w": uinit(ks[10], (64, 3, K, K), 3 * K * K),
        "deconv3_b": uinit(ks[11], (3,), 3 * K * K),
    }


if __name__ == "__main__":
    key = jax.random.PRNGKey(0)
    pkey, xkey, k1, k2, k3 = jax.random.split(key, 5)
    params = init_params(pkey)

    # ---- per-kernel sanity checks vs plain-JAX references ----
    # fused conv kernel, Cin=3 -> Cout=64 (lane-padded to 128 internally)
    xc = jax.random.normal(k1, (2, 16, 16, 3), jnp.float32)
    yc = conv2d_pallas(xc, _prep_conv_w(params["conv1_w"], 3, CPAD),
                       _prep_bias(params["conv1_b"], CPAD))
    yc_ref = conv2d_ref(xc, params["conv1_w"], params["conv1_b"])
    assert jnp.allclose(yc[..., :64], yc_ref, rtol=2e-2, atol=2e-2)
    assert bool(jnp.all(yc[..., 64:] == 0.0))   # padded channels stay exactly 0

    # fused conv kernel with lane-padded input channels (Cin 64 -> 128)
    xr = jax.random.normal(k2, (2, 12, 12, 64), jnp.float32)
    xrp = jnp.pad(xr, ((0, 0), (0, 0), (0, 0), (0, CPAD - 64)))
    y2 = conv2d_pallas(xrp, _prep_conv_w(params["conv2_w"], CPAD, CPAD),
                       _prep_bias(params["conv2_b"], CPAD))
    y2_ref = conv2d_ref(xr, params["conv2_w"], params["conv2_b"])
    assert jnp.allclose(y2[..., :64], y2_ref, rtol=2e-2, atol=2e-2)

    # transposed conv (Cin=128 -> Cout=64) vs conv-VJP reference
    xd = jax.random.normal(k3, (2, 6, 7, 128), jnp.float32)
    yd = deconv2d_pallas(xd, _prep_deconv_w(params["deconv1_w"], CPAD, CPAD),
                         _prep_bias(params["deconv1_b"], CPAD))
    yd_ref = deconv_ref(xd, params["deconv1_w"], params["deconv1_b"])
    assert jnp.allclose(yd[..., :64], yd_ref, rtol=2e-2, atol=2e-2)

    # maxpool / maxunpool (pure f32 compares -> exact match)
    xp = jax.random.normal(k1, (2, 8, 12, 128), jnp.float32)
    pv, pi = maxpool2x2(xp)
    rv, ri = maxpool_ref(xp)
    assert jnp.array_equal(pv, rv) and jnp.array_equal(pi, ri)
    assert jnp.array_equal(maxunpool2x2(pv, pi), maxunpool_ref(rv, ri))

    # ---- full forward pass (32x32 is the smallest clean spatial size:
    #      32 ->28 ->14 ->10 ->5 ->1, decoder mirrors back to 32) ----
    x = jax.random.normal(xkey, (2, 3, 32, 32), jnp.float32)
    out = jax.block_until_ready(jax.jit(forward)(params, x))
    assert out.shape == (2, 3, 32, 32), out.shape
    assert bool(jnp.all(jnp.isfinite(out)))
    print("KERNEL_OK")
</pallas_src>

<mosaic_0001>
module attributes {stable_mosaic.version = 11 : i64} {
  func.func @kernel(%arg0: i32, %arg1: memref<1x256x3xf32, #tpu.memory_space<vmem>>, %arg2: memref<25x3x128xbf16, #tpu.memory_space<vmem>>, %arg3: memref<1x128xf32, #tpu.memory_space<vmem>>, %arg4: memref<1x12x12x128xf32, #tpu.memory_space<vmem>>, %arg5: memref<188x128xf32, #tpu.memory_space<vmem>>) attributes {dimension_semantics = [#tpu.dimension_semantics<parallel>], iteration_bounds = array<i64: 2>, scalar_prefetch = 0 : i64, scratch_operands = 1 : i64, tpu.core_type = #tpu.core_type<tc>, window_params = [{transform_indices = @transform_0, window_bounds = array<i64: 1, 256, 3>}, {pipeline_mode = #tpu.pipeline_mode<synchronous>, transform_indices = @transform_1, window_bounds = array<i64: 25, 3, 128>}, {pipeline_mode = #tpu.pipeline_mode<synchronous>, transform_indices = @transform_2, window_bounds = array<i64: 1, 128>}, {transform_indices = @transform_3, window_bounds = array<i64: 1, 12, 12, 128>}]} {
    %c0 = arith.constant 0 : index
    %c0_0 = arith.constant 0 : index
    %c0_1 = arith.constant 0 : index
    %0 = vector.load %arg1[%c0, %c0_0, %c0_1] : memref<1x256x3xf32, #tpu.memory_space<vmem>>, vector<1x188x3xf32>
    %1 = vector.shape_cast %0 : vector<1x188x3xf32> to vector<188x3xf32>
    %2 = arith.truncf %1 : vector<188x3xf32> to vector<188x3xbf16>
    %c0_2 = arith.constant 0 : index
    %c0_3 = arith.constant 0 : index
    %c0_4 = arith.constant 0 : index
    %3 = vector.load %arg2[%c0_2, %c0_3, %c0_4] : memref<25x3x128xbf16, #tpu.memory_space<vmem>>, vector<1x3x128xbf16>
    %4 = vector.shape_cast %3 : vector<1x3x128xbf16> to vector<3x128xbf16>
    %cst = arith.constant dense<0.000000e+00> : vector<188x128xf32>
    %5 = tpu.matmul %2, %4, %cst {dimension_numbers = #tpu.dot_dimension_numbers<[1], [0], [0], [1], [0, 0, 1, 1], [], []>} : vector<188x3xbf16>, vector<3x128xbf16>, vector<188x128xf32> -> vector<188x128xf32>
    %c0_5 = arith.constant 0 : index
    %c0_6 = arith.constant 0 : index
    %6 = vector.load %arg5[%c0_5, %c0_6] : memref<188x128xf32, #tpu.memory_space<vmem>>, vector<188x128xf32>
    tpu.vector_store %arg5[%c0_5, %c0_6], %5 {strides = array<i32>} : memref<188x128xf32, #tpu.memory_space<vmem>>, vector<188x128xf32>,
    %c0_7 = arith.constant 0 : index
    %c1 = arith.constant 1 : index
    %c0_8 = arith.constant 0 : index
    %7 = vector.load %arg1[%c0_7, %c1, %c0_8] : memref<1x256x3xf32, #tpu.memory_space<vmem>>, vector<1x188x3xf32>
    %8 = vector.shape_cast %7 : vector<1x188x3xf32> to vector<188x3xf32>
    %9 = arith.truncf %8 : vector<188x3xf32> to vector<188x3xbf16>
    %c1_9 = arith.constant 1 : index
    %c0_10 = arith.constant 0 : index
    %c0_11 = arith.constant 0 : index
    %10 = vector.load %arg2[%c1_9, %c0_10, %c0_11] : memref<25x3x128xbf16, #tpu.memory_space<vmem>>, vector<1x3x128xbf16>
    %11 = vector.shape_cast %10 : vector<1x3x128xbf16> to vector<3x128xbf16>
    %cst_12 = arith.constant dense<0.000000e+00> : vector<188x128xf32>
    %12 = tpu.matmul %9, %11, %cst_12 {dimension_numbers = #tpu.dot_dimension_numbers<[1], [0], [0], [1], [0, 0, 1, 1], [], []>} : vector<188x3xbf16>, vector<3x128xbf16>, vector<188x128xf32> -> vector<188x128xf32>
    %c0_13 = arith.constant 0 : index
    %c0_14 = arith.constant 0 : index
    %13 = vector.load %arg5[%c0_13, %c0_14] : memref<188x128xf32, #tpu.memory_space<vmem>>, vector<188x128xf32>
    %14 = arith.addf %13, %12 : vector<188x128xf32>
    %c0_15 = arith.constant 0 : index
    %c0_16 = arith.constant 0 : index
    %15 = vector.load %arg5[%c0_15, %c0_16] : memref<188x128xf32, #tpu.memory_space<vmem>>, vector<188x128xf32>
    tpu.vector_store %arg5[%c0_15, %c0_16], %14 {strides = array<i32>} : memref<188x128xf32, #tpu.memory_space<vmem>>, vector<188x128xf32>,
    %c0_17 = arith.constant 0 : index
    %c2 = arith.constant 2 : index
    %c0_18 = arith.constant 0 : index
    %16 = vector.load %arg1[%c0_17, %c2, %c0_18] : memref<1x256x3xf32, #tpu.memory_space<vmem>>, vector<1x188x3xf32>
    %17 = vector.shape_cast %16 : vector<1x188x3xf32> to vector<188x3xf32>
    %18 = arith.truncf %17 : vector<188x3xf32> to vector<188x3xbf16>
    %c2_19 = arith.constant 2 : index
    %c0_20 = arith.constant 0 : index
    %c0_21 = arith.constant 0 : index
    %19 = vector.load %arg2[%c2_19, %c0_20, %c0_21] : memref<25x3x128xbf16, #tpu.memory_space<vmem>>, vector<1x3x128xbf16>
    %20 = vector.shape_cast %19 : vector<1x3x128xbf16> to vector<3x128xbf16>
    %cst_22 = arith.constant dense<0.000000e+00> : vector<188x128xf32>
    %21 = tpu.matmul %18, %20, %cst_22 {dimension_numbers = #tpu.dot_dimension_numbers<[1], [0], [0], [1], [0, 0, 1, 1], [], []>} : vector<188x3xbf16>, vector<3x128xbf16>, vector<188x128xf32> -> vector<188x128xf32>
    %c0_23 = arith.constant 0 : index
    %c0_24 = arith.constant 0 : index
    %22 = vector.load %arg5[%c0_23, %c0_24] : memref<188x128xf32, #tpu.memory_space<vmem>>, vector<188x128xf32>
    %23 = arith.addf %22, %21 : vector<188x128xf32>
    %c0_25 = arith.constant 0 : index
    %c0_26 = arith.constant 0 : index
    %24 = vector.load %arg5[%c0_25, %c0_26] : memref<188x128xf32, #tpu.memory_space<vmem>>, vector<188x128xf32>
    tpu.vector_store %arg5[%c0_25, %c0_26], %23 {strides = array<i32>} : memref<188x128xf32, #tpu.memory_space<vmem>>, vector<188x128xf32>,
    %c0_27 = arith.constant 0 : index
    %c3 = arith.constant 3 : index
    %c0_28 = arith.constant 0 : index
    %25 = vector.load %arg1[%c0_27, %c3, %c0_28] : memref<1x256x3xf32, #tpu.memory_space<vmem>>, vector<1x188x3xf32>
    %26 = vector.shape_cast %25 : vector<1x188x3xf32> to vector<188x3xf32>
    %27 = arith.truncf %26 : vector<188x3xf32> to vector<188x3xbf16>
    %c3_29 = arith.constant 3 : index
    %c0_30 = arith.constant 0 : index
    %c0_31 = arith.constant 0 : index
    %28 = vector.load %arg2[%c3_29, %c0_30, %c0_31] : memref<25x3x128xbf16, #tpu.memory_space<vmem>>, vector<1x3x128xbf16>
    %29 = vector.shape_cast %28 : vector<1x3x128xbf16> to vector<3x128xbf16>
    %cst_32 = arith.constant dense<0.000000e+00> : vector<188x128xf32>
    %30 = tpu.matmul %27, %29, %cst_32 {dimension_numbers = #tpu.dot_dimension_numbers<[1], [0], [0], [1], [0, 0, 1, 1], [], []>} : vector<188x3xbf16>, vector<3x128xbf16>, vector<188x128xf32> -> vector<188x128xf32>
    %c0_33 = arith.constant 0 : index
    %c0_34 = arith.constant 0 : index
    %31 = vector.load %arg5[%c0_33, %c0_34] : memref<188x128xf32, #tpu.memory_space<vmem>>, vector<188x128xf32>
    %32 = arith.addf %31, %30 : vector<188x128xf32>
    %c0_35 = arith.constant 0 : index
    %c0_36 = arith.constant 0 : index
    %33 = vector.load %arg5[%c0_35, %c0_36] : memref<188x128xf32, #tpu.memory_space<vmem>>, vector<188x128xf32>
    tpu.vector_store %arg5[%c0_35, %c0_36], %32 {strides = array<i32>} : memref<188x128xf32, #tpu.memory_space<vmem>>, vector<188x128xf32>,
    %c0_37 = arith.constant 0 : index
    %c4 = arith.constant 4 : index
    %c0_38 = arith.constant 0 : index
    %34 = vector.load %arg1[%c0_37, %c4, %c0_38] : memref<1x256x3xf32, #tpu.memory_space<vmem>>, vector<1x188x3xf32>
    %35 = vector.shape_cast %34 : vector<1x188x3xf32> to vector<188x3xf32>
    %36 = arith.truncf %35 : vector<188x3xf32> to vector<188x3xbf16>
    %c4_39 = arith.constant 4 : index
    %c0_40 = arith.constant 0 : index
    %c0_41 = arith.constant 0 : index
    %37 = vector.load %arg2[%c4_39, %c0_40, %c0_41] : memref<25x3x128xbf16, #tpu.memory_space<vmem>>, vector<1x3x128xbf16>
    %38 = vector.shape_cast %37 : vector<1x3x128xbf16> to vector<3x128xbf16>
    %cst_42 = arith.constant dense<0.000000e+00> : vector<188x128xf32>
    %39 = tpu.matmul %36, %38, %cst_42 {dimension_numbers = #tpu.dot_dimension_numbers<[1], [0], [0], [1], [0, 0, 1, 1], [], []>} : vector<188x3xbf16>, vector<3x128xbf16>, vector<188x128xf32> -> vector<188x128xf32>
    %c0_43 = arith.constant 0 : index
    %c0_44 = arith.constant 0 : index
    %40 = vector.load %arg5[%c0_43, %c0_44] : memref<188x128xf32, #tpu.memory_space<vmem>>, vector<188x128xf32>
    %41 = arith.addf %40, %39 : vector<188x128xf32>
    %c0_45 = arith.constant 0 : index
    %c0_46 = arith.constant 0 : index
    %42 = vector.load %arg5[%c0_45, %c0_46] : memref<188x128xf32, #tpu.memory_space<vmem>>, vector<188x128xf32>
    tpu.vector_store %arg5[%c0_45, %c0_46], %41 {strides = array<i32>} : memref<188x128xf32, #tpu.memory_space<vmem>>, vector<188x128xf32>,
    %c0_47 = arith.constant 0 : index
    %c16 = arith.constant 16 : index
    %c0_48 = arith.constant 0 : index
    %43 = vector.load %arg1[%c0_47, %c16, %c0_48] : memref<1x256x3xf32, #tpu.memory_space<vmem>>, vector<1x188x3xf32>
    %44 = vector.shape_cast %43 : vector<1x188x3xf32> to vector<188x3xf32>
    %45 = arith.truncf %44 : vector<188x3xf32> to vector<188x3xbf16>
    %c5 = arith.constant 5 : index
    %c0_49 = arith.constant 0 : index
    %c0_50 = arith.constant 0 : index
    %46 = vector.load %arg2[%c5, %c0_49, %c0_50] : memref<25x3x128xbf16, #tpu.memory_space<vmem>>, vector<1x3x128xbf16>
    %47 = vector.shape_cast %46 : vector<1x3x128xbf16> to vector<3x128xbf16>
    %cst_51 = arith.constant dense<0.000000e+00> : vector<188x128xf32>
    %48 = tpu.matmul %45, %47, %cst_51 {dimension_numbers = #tpu.dot_dimension_numbers<[1], [0], [0], [1], [0, 0, 1, 1], [], []>} : vector<188x3xbf16>, vector<3x128xbf16>, vector<188x128xf32> -> vector<188x128xf32>
    %c0_52 = arith.constant 0 : index
    %c0_53 = arith.constant 0 : index
    %49 = vector.load %arg5[%c0_52, %c0_53] : memref<188x128xf32, #tpu.memory_space<vmem>>, vector<188x128xf32>
    %50 = arith.addf %49, %48 : vector<188x128xf32>
    %c0_54 = arith.constant 0 : index
    %c0_55 = arith.constant 0 : index
    %51 = vector.load %arg5[%c0_54, %c0_55] : memref<188x128xf32, #tpu.memory_space<vmem>>, vector<188x128xf32>
    tpu.vector_store %arg5[%c0_54, %c0_55], %50 {strides = array<i32>} : memref<188x128xf32, #tpu.memory_space<vmem>>, vector<188x128xf32>,
    %c0_56 = arith.constant 0 : index
    %c17 = arith.constant 17 : index
    %c0_57 = arith.constant 0 : index
    %52 = vector.load %arg1[%c0_56, %c17, %c0_57] : memref<1x256x3xf32, #tpu.memory_space<vmem>>, vector<1x188x3xf32>
    %53 = vector.shape_cast %52 : vector<1x188x3xf32> to vector<188x3xf32>
    %54 = arith.truncf %53 : vector<188x3xf32> to vector<188x3xbf16>
    %c6 = arith.constant 6 : index
    %c0_58 = arith.constant 0 : index
    %c0_59 = arith.constant 0 : index
    %55 = vector.load %arg2[%c6, %c0_58, %c0_59] : memref<25x3x128xbf16, #tpu.memory_space<vmem>>, vector<1x3x128xbf16>
    %56 = vector.shape_cast %55 : vector<1x3x128xbf16> to vector<3x128xbf16>
    %cst_60 = arith.constant dense<0.000000e+00> : vector<188x128xf32>
    %57 = tpu.matmul %54, %56, %cst_60 {dimension_numbers = #tpu.dot_dimension_numbers<[1], [0], [0], [1], [0, 0, 1, 1], [], []>} : vector<188x3xbf16>, vector<3x128xbf16>, vector<188x128xf32> -> vector<188x128xf32>
    %c0_61 = arith.constant 0 : index
    %c0_62 = arith.constant 0 : index
    %58 = vector.load %arg5[%c0_61, %c0_62] : memref<188x128xf32, #tpu.memory_space<vmem>>, vector<188x128xf32>
    %59 = arith.addf %58, %57 : vector<188x128xf32>
    %c0_63 = arith.constant 0 : index
    %c0_64 = arith.constant 0 : index
    %60 = vector.load %arg5[%c0_63, %c0_64] : memref<188x128xf32, #tpu.memory_space<vmem>>, vector<188x128xf32>
    tpu.vector_store %arg5[%c0_63, %c0_64], %59 {strides = array<i32>} : memref<188x128xf32, #tpu.memory_space<vmem>>, vector<188x128xf32>,
    %c0_65 = arith.constant 0 : index
    %c18 = arith.constant 18 : index
    %c0_66 = arith.constant 0 : index
    %61 = vector.load %arg1[%c0_65, %c18, %c0_66] : memref<1x256x3xf32, #tpu.memory_space<vmem>>, vector<1x188x3xf32>
    %62 = vector.shape_cast %61 : vector<1x188x3xf32> to vector<188x3xf32>
    %63 = arith.truncf %62 : vector<188x3xf32> to vector<188x3xbf16>
    %c7 = arith.constant 7 : index
    %c0_67 = arith.constant 0 : index
    %c0_68 = arith.constant 0 : index
    %64 = vector.load %arg2[%c7, %c0_67, %c0_68] : memref<25x3x128xbf16, #tpu.memory_space<vmem>>, vector<1x3x128xbf16>
    %65 = vector.shape_cast %64 : vector<1x3x128xbf16> to vector<3x128xbf16>
    %cst_69 = arith.constant dense<0.000000e+00> : vector<188x128xf32>
    %66 = tpu.matmul %63, %65, %cst_69 {dimension_numbers = #tpu.dot_dimension_numbers<[1], [0], [0], [1], [0, 0, 1, 1], [], []>} : vector<188x3xbf16>, vector<3x128xbf16>, vector<188x128xf32> -> vector<188x128xf32>
    %c0_70 = arith.constant 0 : index
    %c0_71 = arith.constant 0 : index
    %67 = vector.load %arg5[%c0_70, %c0_71] : memref<188x128xf32, #tpu.memory_space<vmem>>, vector<188x128xf32>
    %68 = arith.addf %67, %66 : vector<188x128xf32>
    %c0_72 = arith.constant 0 : index
    %c0_73 = arith.constant 0 : index
    %69 = vector.load %arg5[%c0_72, %c0_73] : memref<188x128xf32, #tpu.memory_space<vmem>>, vector<188x128xf32>
    tpu.vector_store %arg5[%c0_72, %c0_73], %68 {strides = array<i32>} : memref<188x128xf32, #tpu.memory_space<vmem>>, vector<188x128xf32>,
    %c0_74 = arith.constant 0 : index
    %c19 = arith.constant 19 : index
    %c0_75 = arith.constant 0 : index
    %70 = vector.load %arg1[%c0_74, %c19, %c0_75] : memref<1x256x3xf32, #tpu.memory_space<vmem>>, vector<1x188x3xf32>
    %71 = vector.shape_cast %70 : vector<1x188x3xf32> to vector<188x3xf32>
    %72 = arith.truncf %71 : vector<188x3xf32> to vector<188x3xbf16>
    %c8 = arith.constant 8 : index
    %c0_76 = arith.constant 0 : index
    %c0_77 = arith.constant 0 : index
    %73 = vector.load %arg2[%c8, %c0_76, %c0_77] : memref<25x3x128xbf16, #tpu.memory_space<vmem>>, vector<1x3x128xbf16>
    %74 = vector.shape_cast %73 : vector<1x3x128xbf16> to vector<3x128xbf16>
    %cst_78 = arith.constant dense<0.000000e+00> : vector<188x128xf32>
    %75 = tpu.matmul %72, %74, %cst_78 {dimension_numbers = #tpu.dot_dimension_numbers<[1], [0], [0], [1], [0, 0, 1, 1], [], []>} : vector<188x3xbf16>, vector<3x128xbf16>, vector<188x128xf32> -> vector<188x128xf32>
    %c0_79 = arith.constant 0 : index
    %c0_80 = arith.constant 0 : index
    %76 = vector.load %arg5[%c0_79, %c0_80] : memref<188x128xf32, #tpu.memory_space<vmem>>, vector<188x128xf32>
    %77 = arith.addf %76, %75 : vector<188x128xf32>
    %c0_81 = arith.constant 0 : index
    %c0_82 = arith.constant 0 : index
    %78 = vector.load %arg5[%c0_81, %c0_82] : memref<188x128xf32, #tpu.memory_space<vmem>>, vector<188x128xf32>
    tpu.vector_store %arg5[%c0_81, %c0_82], %77 {strides = array<i32>} : memref<188x128xf32, #tpu.memory_space<vmem>>, vector<188x128xf32>,
    %c0_83 = arith.constant 0 : index
    %c20 = arith.constant 20 : index
    %c0_84 = arith.constant 0 : index
    %79 = vector.load %arg1[%c0_83, %c20, %c0_84] : memref<1x256x3xf32, #tpu.memory_space<vmem>>, vector<1x188x3xf32>
    %80 = vector.shape_cast %79 : vector<1x188x3xf32> to vector<188x3xf32>
    %81 = arith.truncf %80 : vector<188x3xf32> to vector<188x3xbf16>
    %c9 = arith.constant 9 : index
    %c0_85 = arith.constant 0 : index
    %c0_86 = arith.constant 0 : index
    %82 = vector.load %arg2[%c9, %c0_85, %c0_86] : memref<25x3x128xbf16, #tpu.memory_space<vmem>>, vector<1x3x128xbf16>
    %83 = vector.shape_cast %82 : vector<1x3x128xbf16> to vector<3x128xbf16>
    %cst_87 = arith.constant dense<0.000000e+00> : vector<188x128xf32>
    %84 = tpu.matmul %81, %83, %cst_87 {dimension_numbers = #tpu.dot_dimension_numbers<[1], [0], [0], [1], [0, 0, 1, 1], [], []>} : vector<188x3xbf16>, vector<3x128xbf16>, vector<188x128xf32> -> vector<188x128xf32>
    %c0_88 = arith.constant 0 : index
    %c0_89 = arith.constant 0 : index
    %85 = vector.load %arg5[%c0_88, %c0_89] : memref<188x128xf32, #tpu.memory_space<vmem>>, vector<188x128xf32>
    %86 = arith.addf %85, %84 : vector<188x128xf32>
    %c0_90 = arith.constant 0 : index
    %c0_91 = arith.constant 0 : index
    %87 = vector.load %arg5[%c0_90, %c0_91] : memref<188x128xf32, #tpu.memory_space<vmem>>, vector<188x128xf32>
    tpu.vector_store %arg5[%c0_90, %c0_91], %86 {strides = array<i32>} : memref<188x128xf32, #tpu.memory_space<vmem>>, vector<188x128xf32>,
    %c0_92 = arith.constant 0 : index
    %c32 = arith.constant 32 : index
    %c0_93 = arith.constant 0 : index
    %88 = vector.load %arg1[%c0_92, %c32, %c0_93] : memref<1x256x3xf32, #tpu.memory_space<vmem>>, vector<1x188x3xf32>
    %89 = vector.shape_cast %88 : vector<1x188x3xf32> to vector<188x3xf32>
    %90 = arith.truncf %89 : vector<188x3xf32> to vector<188x3xbf16>
    %c10 = arith.constant 10 : index
    %c0_94 = arith.constant 0 : index
    %c0_95 = arith.constant 0 : index
    %91 = vector.load %arg2[%c10, %c0_94, %c0_95] : memref<25x3x128xbf16, #tpu.memory_space<vmem>>, vector<1x3x128xbf16>
    %92 = vector.shape_cast %91 : vector<1x3x128xbf16> to vector<3x128xbf16>
    %cst_96 = arith.constant dense<0.000000e+00> : vector<188x128xf32>
    %93 = tpu.matmul %90, %92, %cst_96 {dimension_numbers = #tpu.dot_dimension_numbers<[1], [0], [0], [1], [0, 0, 1, 1], [], []>} : vector<188x3xbf16>, vector<3x128xbf16>, vector<188x128xf32> -> vector<188x128xf32>
    %c0_97 = arith.constant 0 : index
    %c0_98 = arith.constant 0 : index
    %94 = vector.load %arg5[%c0_97, %c0_98] : memref<188x128xf32, #tpu.memory_space<vmem>>, vector<188x128xf32>
    %95 = arith.addf %94, %93 : vector<188x128xf32>
    %c0_99 = arith.constant 0 : index
    %c0_100 = arith.constant 0 : index
    %96 = vector.load %arg5[%c0_99, %c0_100] : memref<188x128xf32, #tpu.memory_space<vmem>>, vector<188x128xf32>
    tpu.vector_store %arg5[%c0_99, %c0_100], %95 {strides = array<i32>} : memref<188x128xf32, #tpu.memory_space<vmem>>, vector<188x128xf32>,
    %c0_101 = arith.constant 0 : index
    %c33 = arith.constant 33 : index
    %c0_102 = arith.constant 0 : index
    %97 = vector.load %arg1[%c0_101, %c33, %c0_102] : memref<1x256x3xf32, #tpu.memory_space<vmem>>, vector<1x188x3xf32>
    %98 = vector.shape_cast %97 : vector<1x188x3xf32> to vector<188x3xf32>
    %99 = arith.truncf %98 : vector<188x3xf32> to vector<188x3xbf16>
    %c11 = arith.constant 11 : index
    %c0_103 = arith.constant 0 : index
    %c0_104 = arith.constant 0 : index
    %100 = vector.load %arg2[%c11, %c0_103, %c0_104] : memref<25x3x128xbf16, #tpu.memory_space<vmem>>, vector<1x3x128xbf16>
    %101 = vector.shape_cast %100 : vector<1x3x128xbf16> to vector<3x128xbf16>
    %cst_105 = arith.constant dense<0.000000e+00> : vector<188x128xf32>
    %102 = tpu.matmul %99, %101, %cst_105 {dimension_numbers = #tpu.dot_dimension_numbers<[1], [0], [0], [1], [0, 0, 1, 1], [], []>} : vector<188x3xbf16>, vector<3x128xbf16>, vector<188x128xf32> -> vector<188x128xf32>
    %c0_106 = arith.constant 0 : index
    %c0_107 = arith.constant 0 : index
    %103 = vector.load %arg5[%c0_106, %c0_107] : memref<188x128xf32, #tpu.memory_space<vmem>>, vector<188x128xf32>
    %104 = arith.addf %103, %102 : vector<188x128xf32>
    %c0_108 = arith.constant 0 : index
    %c0_109 = arith.constant 0 : index
    %105 = vector.load %arg5[%c0_108, %c0_109] : memref<188x128xf32, #tpu.memory_space<vmem>>, vector<188x128xf32>
    tpu.vector_store %arg5[%c0_108, %c0_109], %104 {strides = array<i32>} : memref<188x128xf32, #tpu.memory_space<vmem>>, vector<188x128xf32>,
    %c0_110 = arith.constant 0 : index
    %c34 = arith.constant 34 : index
    %c0_111 = arith.constant 0 : index
    %106 = vector.load %arg1[%c0_110, %c34, %c0_111] : memref<1x256x3xf32, #tpu.memory_space<vmem>>, vector<1x188x3xf32>
    %107 = vector.shape_cast %106 : vector<1x188x3xf32> to vector<188x3xf32>
    %108 = arith.truncf %107 : vector<188x3xf32> to vector<188x3xbf16>
    %c12 = arith.constant 12 : index
    %c0_112 = arith.constant 0 : index
    %c0_113 = arith.constant 0 : index
    %109 = vector.load %arg2[%c12, %c0_112, %c0_113] : memref<25x3x128xbf16, #tpu.memory_space<vmem>>, vector<1x3x128xbf16>
    %110 = vector.shape_cast %109 : vector<1x3x128xbf16> to vector<3x128xbf16>
    %cst_114 = arith.constant dense<0.000000e+00> : vector<188x128xf32>
    %111 = tpu.matmul %108, %110, %cst_114 {dimension_numbers = #tpu.dot_dimension_numbers<[1], [0], [0], [1], [0, 0, 1, 1], [], []>} : vector<188x3xbf16>, vector<3x128xbf16>, vector<188x128xf32> -> vector<188x128xf32>
    %c0_115 = arith.constant 0 : index
    %c0_116 = arith.constant 0 : index
    %112 = vector.load %arg5[%c0_115, %c0_116] : memref<188x128xf32, #tpu.memory_space<vmem>>, vector<188x128xf32>
    %113 = arith.addf %112, %111 : vector<188x128xf32>
    %c0_117 = arith.constant 0 : index
    %c0_118 = arith.constant 0 : index
    %114 = vector.load %arg5[%c0_117, %c0_118] : memref<188x128xf32, #tpu.memory_space<vmem>>, vector<188x128xf32>
    tpu.vector_store %arg5[%c0_117, %c0_118], %113 {strides = array<i32>} : memref<188x128xf32, #tpu.memory_space<vmem>>, vector<188x128xf32>,
    %c0_119 = arith.constant 0 : index
    %c35 = arith.constant 35 : index
    %c0_120 = arith.constant 0 : index
    %115 = vector.load %arg1[%c0_119, %c35, %c0_120] : memref<1x256x3xf32, #tpu.memory_space<vmem>>, vector<1x188x3xf32>
    %116 = vector.shape_cast %115 : vector<1x188x3xf32> to vector<188x3xf32>
    %117 = arith.truncf %116 : vector<188x3xf32> to vector<188x3xbf16>
    %c13 = arith.constant 13 : index
    %c0_121 = arith.constant 0 : index
    %c0_122 = arith.constant 0 : index
    %118 = vector.load %arg2[%c13, %c0_121, %c0_122] : memref<25x3x128xbf16, #tpu.memory_space<vmem>>, vector<1x3x128xbf16>
    %119 = vector.shape_cast %118 : vector<1x3x128xbf16> to vector<3x128xbf16>
    %cst_123 = arith.constant dense<0.000000e+00> : vector<188x128xf32>
    %120 = tpu.matmul %117, %119, %cst_123 {dimension_numbers = #tpu.dot_dimension_numbers<[1], [0], [0], [1], [0, 0, 1, 1], [], []>} : vector<188x3xbf16>, vector<3x128xbf16>, vector<188x128xf32> -> vector<188x128xf32>
    %c0_124 = arith.constant 0 : index
    %c0_125 = arith.constant 0 : index
    %121 = vector.load %arg5[%c0_124, %c0_125] : memref<188x128xf32, #tpu.memory_space<vmem>>, vector<188x128xf32>
    %122 = arith.addf %121, %120 : vector<188x128xf32>
    %c0_126 = arith.constant 0 : index
    %c0_127 = arith.constant 0 : index
    %123 = vector.load %arg5[%c0_126, %c0_127] : memref<188x128xf32, #tpu.memory_space<vmem>>, vector<188x128xf32>
    tpu.vector_store %arg5[%c0_126, %c0_127], %122 {strides = array<i32>} : memref<188x128xf32, #tpu.memory_space<vmem>>, vector<188x128xf32>,
    %c0_128 = arith.constant 0 : index
    %c36 = arith.constant 36 : index
    %c0_129 = arith.constant 0 : index
    %124 = vector.load %arg1[%c0_128, %c36, %c0_129] : memref<1x256x3xf32, #tpu.memory_space<vmem>>, vector<1x188x3xf32>
    %125 = vector.shape_cast %124 : vector<1x188x3xf32> to vector<188x3xf32>
    %126 = arith.truncf %125 : vector<188x3xf32> to vector<188x3xbf16>
    %c14 = arith.constant 14 : index
    %c0_130 = arith.constant 0 : index
    %c0_131 = arith.constant 0 : index
    %127 = vector.load %arg2[%c14, %c0_130, %c0_131] : memref<25x3x128xbf16, #tpu.memory_space<vmem>>, vector<1x3x128xbf16>
    %128 = vector.shape_cast %127 : vector<1x3x128xbf16> to vector<3x128xbf16>
    %cst_132 = arith.constant dense<0.000000e+00> : vector<188x128xf32>
    %129 = tpu.matmul %126, %128, %cst_132 {dimension_numbers = #tpu.dot_dimension_numbers<[1], [0], [0], [1], [0, 0, 1, 1], [], []>} : vector<188x3xbf16>, vector<3x128xbf16>, vector<188x128xf32> -> vector<188x128xf32>
    %c0_133 = arith.constant 0 : index
    %c0_134 = arith.constant 0 : index
    %130 = vector.load %arg5[%c0_133, %c0_134] : memref<188x128xf32, #tpu.memory_space<vmem>>, vector<188x128xf32>
    %131 = arith.addf %130, %129 : vector<188x128xf32>
    %c0_135 = arith.constant 0 : index
    %c0_136 = arith.constant 0 : index
    %132 = vector.load %arg5[%c0_135, %c0_136] : memref<188x128xf32, #tpu.memory_space<vmem>>, vector<188x128xf32>
    tpu.vector_store %arg5[%c0_135, %c0_136], %131 {strides = array<i32>} : memref<188x128xf32, #tpu.memory_space<vmem>>, vector<188x128xf32>,
    %c0_137 = arith.constant 0 : index
    %c48 = arith.constant 48 : index
    %c0_138 = arith.constant 0 : index
    %133 = vector.load %arg1[%c0_137, %c48, %c0_138] : memref<1x256x3xf32, #tpu.memory_space<vmem>>, vector<1x188x3xf32>
    %134 = vector.shape_cast %133 : vector<1x188x3xf32> to vector<188x3xf32>
    %135 = arith.truncf %134 : vector<188x3xf32> to vector<188x3xbf16>
    %c15 = arith.constant 15 : index
    %c0_139 = arith.constant 0 : index
    %c0_140 = arith.constant 0 : index
    %136 = vector.load %arg2[%c15, %c0_139, %c0_140] : memref<25x3x128xbf16, #tpu.memory_space<vmem>>, vector<1x3x128xbf16>
    %137 = vector.shape_cast %136 : vector<1x3x128xbf16> to vector<3x128xbf16>
    %cst_141 = arith.constant dense<0.000000e+00> : vector<188x128xf32>
    %138 = tpu.matmul %135, %137, %cst_141 {dimension_numbers = #tpu.dot_dimension_numbers<[1], [0], [0], [1], [0, 0, 1, 1], [], []>} : vector<188x3xbf16>, vector<3x128xbf16>, vector<188x128xf32> -> vector<188x128xf32>
    %c0_142 = arith.constant 0 : index
    %c0_143 = arith.constant 0 : index
    %139 = vector.load %arg5[%c0_142, %c0_143] : memref<188x128xf32, #tpu.memory_space<vmem>>, vector<188x128xf32>
    %140 = arith.addf %139, %138 : vector<188x128xf32>
    %c0_144 = arith.constant 0 : index
    %c0_145 = arith.constant 0 : index
    %141 = vector.load %arg5[%c0_144, %c0_145] : memref<188x128xf32, #tpu.memory_space<vmem>>, vector<188x128xf32>
    tpu.vector_store %arg5[%c0_144, %c0_145], %140 {strides = array<i32>} : memref<188x128xf32, #tpu.memory_space<vmem>>, vector<188x128xf32>,
    %c0_146 = arith.constant 0 : index
    %c49 = arith.constant 49 : index
    %c0_147 = arith.constant 0 : index
    %142 = vector.load %arg1[%c0_146, %c49, %c0_147] : memref<1x256x3xf32, #tpu.memory_space<vmem>>, vector<1x188x3xf32>
    %143 = vector.shape_cast %142 : vector<1x188x3xf32> to vector<188x3xf32>
    %144 = arith.truncf %143 : vector<188x3xf32> to vector<188x3xbf16>
    %c16_148 = arith.constant 16 : index
    %c0_149 = arith.constant 0 : index
    %c0_150 = arith.constant 0 : index
    %145 = vector.load %arg2[%c16_148, %c0_149, %c0_150] : memref<25x3x128xbf16, #tpu.memory_space<vmem>>, vector<1x3x128xbf16>
    %146 = vector.shape_cast %145 : vector<1x3x128xbf16> to vector<3x128xbf16>
    %cst_151 = arith.constant dense<0.000000e+00> : vector<188x128xf32>
    %147 = tpu.matmul %144, %146, %cst_151 {dimension_numbers = #tpu.dot_dimension_numbers<[1], [0], [0], [1], [0, 0, 1, 1], [], []>} : vector<188x3xbf16>, vector<3x128xbf16>, vector<188x128xf32> -> vector<188x128xf32>
    %c0_152 = arith.constant 0 : index
    %c0_153 = arith.constant 0 : index
    %148 = vector.load %arg5[%c0_152, %c0_153] : memref<188x128xf32, #tpu.memory_space<vmem>>, vector<188x128xf32>
    %149 = arith.addf %148, %147 : vector<188x128xf32>
    %c0_154 = arith.constant 0 : index
    %c0_155 = arith.constant 0 : index
    %150 = vector.load %arg5[%c0_154, %c0_155] : memref<188x128xf32, #tpu.memory_space<vmem>>, vector<188x128xf32>
    tpu.vector_store %arg5[%c0_154, %c0_155], %149 {strides = array<i32>} : memref<188x128xf32, #tpu.memory_space<vmem>>, vector<188x128xf32>,
    %c0_156 = arith.constant 0 : index
    %c50 = arith.constant 50 : index
    %c0_157 = arith.constant 0 : index
    %151 = vector.load %arg1[%c0_156, %c50, %c0_157] : memref<1x256x3xf32, #tpu.memory_space<vmem>>, vector<1x188x3xf32>
    %152 = vector.shape_cast %151 : vector<1x188x3xf32> to vector<188x3xf32>
    %153 = arith.truncf %152 : vector<188x3xf32> to vector<188x3xbf16>
    %c17_158 = arith.constant 17 : index
    %c0_159 = arith.constant 0 : index
    %c0_160 = arith.constant 0 : index
    %154 = vector.load %arg2[%c17_158, %c0_159, %c0_160] : memref<25x3x128xbf16, #tpu.memory_space<vmem>>, vector<1x3x128xbf16>
    %155 = vector.shape_cast %154 : vector<1x3x128xbf16> to vector<3x128xbf16>
    %cst_161 = arith.constant dense<0.000000e+00> : vector<188x128xf32>
    %156 = tpu.matmul %153, %155, %cst_161 {dimension_numbers = #tpu.dot_dimension_numbers<[1], [0], [0], [1], [0, 0, 1, 1], [], []>} : vector<188x3xbf16>, vector<3x128xbf16>, vector<188x128xf32> -> vector<188x128xf32>
    %c0_162 = arith.constant 0 : index
    %c0_163 = arith.constant 0 : index
    %157 = vector.load %arg5[%c0_162, %c0_163] : memref<188x128xf32, #tpu.memory_space<vmem>>, vector<188x128xf32>
    %158 = arith.addf %157, %156 : vector<188x128xf32>
    %c0_164 = arith.constant 0 : index
    %c0_165 = arith.constant 0 : index
    %159 = vector.load %arg5[%c0_164, %c0_165] : memref<188x128xf32, #tpu.memory_space<vmem>>, vector<188x128xf32>
    tpu.vector_store %arg5[%c0_164, %c0_165], %158 {strides = array<i32>} : memref<188x128xf32, #tpu.memory_space<vmem>>, vector<188x128xf32>,
    %c0_166 = arith.constant 0 : index
    %c51 = arith.constant 51 : index
    %c0_167 = arith.constant 0 : index
    %160 = vector.load %arg1[%c0_166, %c51, %c0_167] : memref<1x256x3xf32, #tpu.memory_space<vmem>>, vector<1x188x3xf32>
    %161 = vector.shape_cast %160 : vector<1x188x3xf32> to vector<188x3xf32>
    %162 = arith.truncf %161 : vector<188x3xf32> to vector<188x3xbf16>
    %c18_168 = arith.constant 18 : index
    %c0_169 = arith.constant 0 : index
    %c0_170 = arith.constant 0 : index
    %163 = vector.load %arg2[%c18_168, %c0_169, %c0_170] : memref<25x3x128xbf16, #tpu.memory_space<vmem>>, vector<1x3x128xbf16>
    %164 = vector.shape_cast %163 : vector<1x3x128xbf16> to vector<3x128xbf16>
    %cst_171 = arith.constant dense<0.000000e+00> : vector<188x128xf32>
    %165 = tpu.matmul %162, %164, %cst_171 {dimension_numbers = #tpu.dot_dimension_numbers<[1], [0], [0], [1], [0, 0, 1, 1], [], []>} : vector<188x3xbf16>, vector<3x128xbf16>, vector<188x128xf32> -> vector<188x128xf32>
    %c0_172 = arith.constant 0 : index
    %c0_173 = arith.constant 0 : index
    %166 = vector.load %arg5[%c0_172, %c0_173] : memref<188x128xf32, #tpu.memory_space<vmem>>, vector<188x128xf32>
    %167 = arith.addf %166, %165 : vector<188x128xf32>
    %c0_174 = arith.constant 0 : index
    %c0_175 = arith.constant 0 : index
    %168 = vector.load %arg5[%c0_174, %c0_175] : memref<188x128xf32, #tpu.memory_space<vmem>>, vector<188x128xf32>
    tpu.vector_store %arg5[%c0_174, %c0_175], %167 {strides = array<i32>} : memref<188x128xf32, #tpu.memory_space<vmem>>, vector<188x128xf32>,
    %c0_176 = arith.constant 0 : index
    %c52 = arith.constant 52 : index
    %c0_177 = arith.constant 0 : index
    %169 = vector.load %arg1[%c0_176, %c52, %c0_177] : memref<1x256x3xf32, #tpu.memory_space<vmem>>, vector<1x188x3xf32>
    %170 = vector.shape_cast %169 : vector<1x188x3xf32> to vector<188x3xf32>
    %171 = arith.truncf %170 : vector<188x3xf32> to vector<188x3xbf16>
    %c19_178 = arith.constant 19 : index
    %c0_179 = arith.constant 0 : index
    %c0_180 = arith.constant 0 : index
    %172 = vector.load %arg2[%c19_178, %c0_179, %c0_180] : memref<25x3x128xbf16, #tpu.memory_space<vmem>>, vector<1x3x128xbf16>
    %173 = vector.shape_cast %172 : vector<1x3x128xbf16> to vector<3x128xbf16>
    %cst_181 = arith.constant dense<0.000000e+00> : vector<188x128xf32>
    %174 = tpu.matmul %171, %173, %cst_181 {dimension_numbers = #tpu.dot_dimension_numbers<[1], [0], [0], [1], [0, 0, 1, 1], [], []>} : vector<188x3xbf16>, vector<3x128xbf16>, vector<188x128xf32> -> vector<188x128xf32>
    %c0_182 = arith.constant 0 : index
    %c0_183 = arith.constant 0 : index
    %175 = vector.load %arg5[%c0_182, %c0_183] : memref<188x128xf32, #tpu.memory_space<vmem>>, vector<188x128xf32>
    %176 = arith.addf %175, %174 : vector<188x128xf32>
    %c0_184 = arith.constant 0 : index
    %c0_185 = arith.constant 0 : index
    %177 = vector.load %arg5[%c0_184, %c0_185] : memref<188x128xf32, #tpu.memory_space<vmem>>, vector<188x128xf32>
    tpu.vector_store %arg5[%c0_184, %c0_185], %176 {strides = array<i32>} : memref<188x128xf32, #tpu.memory_space<vmem>>, vector<188x128xf32>,
    %c0_186 = arith.constant 0 : index
    %c64 = arith.constant 64 : index
    %c0_187 = arith.constant 0 : index
    %178 = vector.load %arg1[%c0_186, %c64, %c0_187] : memref<1x256x3xf32, #tpu.memory_space<vmem>>, vector<1x188x3xf32>
    %179 = vector.shape_cast %178 : vector<1x188x3xf32> to vector<188x3xf32>
    %180 = arith.truncf %179 : vector<188x3xf32> to vector<188x3xbf16>
    %c20_188 = arith.constant 20 : index
    %c0_189 = arith.constant 0 : index
    %c0_190 = arith.constant 0 : index
    %181 = vector.load %arg2[%c20_188, %c0_189, %c0_190] : memref<25x3x128xbf16, #tpu.memory_space<vmem>>, vector<1x3x128xbf16>
    %182 = vector.shape_cast %181 : vector<1x3x128xbf16> to vector<3x128xbf16>
    %cst_191 = arith.constant dense<0.000000e+00> : vector<188x128xf32>
    %183 = tpu.matmul %180, %182, %cst_191 {dimension_numbers = #tpu.dot_dimension_numbers<[1], [0], [0], [1], [0, 0, 1, 1], [], []>} : vector<188x3xbf16>, vector<3x128xbf16>, vector<188x128xf32> -> vector<188x128xf32>
    %c0_192 = arith.constant 0 : index
    %c0_193 = arith.constant 0 : index
    %184 = vector.load %arg5[%c0_192, %c0_193] : memref<188x128xf32, #tpu.memory_space<vmem>>, vector<188x128xf32>
    %185 = arith.addf %184, %183 : vector<188x128xf32>
    %c0_194 = arith.constant 0 : index
    %c0_195 = arith.constant 0 : index
    %186 = vector.load %arg5[%c0_194, %c0_195] : memref<188x128xf32, #tpu.memory_space<vmem>>, vector<188x128xf32>
    tpu.vector_store %arg5[%c0_194, %c0_195], %185 {strides = array<i32>} : memref<188x128xf32, #tpu.memory_space<vmem>>, vector<188x128xf32>,
    %c0_196 = arith.constant 0 : index
    %c65 = arith.constant 65 : index
    %c0_197 = arith.constant 0 : index
    %187 = vector.load %arg1[%c0_196, %c65, %c0_197] : memref<1x256x3xf32, #tpu.memory_space<vmem>>, vector<1x188x3xf32>
    %188 = vector.shape_cast %187 : vector<1x188x3xf32> to vector<188x3xf32>
    %189 = arith.truncf %188 : vector<188x3xf32> to vector<188x3xbf16>
    %c21 = arith.constant 21 : index
    %c0_198 = arith.constant 0 : index
    %c0_199 = arith.constant 0 : index
    %190 = vector.load %arg2[%c21, %c0_198, %c0_199] : memref<25x3x128xbf16, #tpu.memory_space<vmem>>, vector<1x3x128xbf16>
    %191 = vector.shape_cast %190 : vector<1x3x128xbf16> to vector<3x128xbf16>
    %cst_200 = arith.constant dense<0.000000e+00> : vector<188x128xf32>
    %192 = tpu.matmul %189, %191, %cst_200 {dimension_numbers = #tpu.dot_dimension_numbers<[1], [0], [0], [1], [0, 0, 1, 1], [], []>} : vector<188x3xbf16>, vector<3x128xbf16>, vector<188x128xf32> -> vector<188x128xf32>
    %c0_201 = arith.constant 0 : index
    %c0_202 = arith.constant 0 : index
    %193 = vector.load %arg5[%c0_201, %c0_202] : memref<188x128xf32, #tpu.memory_space<vmem>>, vector<188x128xf32>
    %194 = arith.addf %193, %192 : vector<188x128xf32>
    %c0_203 = arith.constant 0 : index
    %c0_204 = arith.constant 0 : index
    %195 = vector.load %arg5[%c0_203, %c0_204] : memref<188x128xf32, #tpu.memory_space<vmem>>, vector<188x128xf32>
    tpu.vector_store %arg5[%c0_203, %c0_204], %194 {strides = array<i32>} : memref<188x128xf32, #tpu.memory_space<vmem>>, vector<188x128xf32>,
    %c0_205 = arith.constant 0 : index
    %c66 = arith.constant 66 : index
    %c0_206 = arith.constant 0 : index
    %196 = vector.load %arg1[%c0_205, %c66, %c0_206] : memref<1x256x3xf32, #tpu.memory_space<vmem>>, vector<1x188x3xf32>
    %197 = vector.shape_cast %196 : vector<1x188x3xf32> to vector<188x3xf32>
    %198 = arith.truncf %197 : vector<188x3xf32> to vector<188x3xbf16>
    %c22 = arith.constant 22 : index
    %c0_207 = arith.constant 0 : index
    %c0_208 = arith.constant 0 : index
    %199 = vector.load %arg2[%c22, %c0_207, %c0_208] : memref<25x3x128xbf16, #tpu.memory_space<vmem>>, vector<1x3x128xbf16>
    %200 = vector.shape_cast %199 : vector<1x3x128xbf16> to vector<3x128xbf16>
    %cst_209 = arith.constant dense<0.000000e+00> : vector<188x128xf32>
    %201 = tpu.matmul %198, %200, %cst_209 {dimension_numbers = #tpu.dot_dimension_numbers<[1], [0], [0], [1], [0, 0, 1, 1], [], []>} : vector<188x3xbf16>, vector<3x128xbf16>, vector<188x128xf32> -> vector<188x128xf32>
    %c0_210 = arith.constant 0 : index
    %c0_211 = arith.constant 0 : index
    %202 = vector.load %arg5[%c0_210, %c0_211] : memref<188x128xf32, #tpu.memory_space<vmem>>, vector<188x128xf32>
    %203 = arith.addf %202, %201 : vector<188x128xf32>
    %c0_212 = arith.constant 0 : index
    %c0_213 = arith.constant 0 : index
    %204 = vector.load %arg5[%c0_212, %c0_213] : memref<188x128xf32, #tpu.memory_space<vmem>>, vector<188x128xf32>
    tpu.vector_store %arg5[%c0_212, %c0_213], %203 {strides = array<i32>} : memref<188x128xf32, #tpu.memory_space<vmem>>, vector<188x128xf32>,
    %c0_214 = arith.constant 0 : index
    %c67 = arith.constant 67 : index
    %c0_215 = arith.constant 0 : index
    %205 = vector.load %arg1[%c0_214, %c67, %c0_215] : memref<1x256x3xf32, #tpu.memory_space<vmem>>, vector<1x188x3xf32>
    %206 = vector.shape_cast %205 : vector<1x188x3xf32> to vector<188x3xf32>
    %207 = arith.truncf %206 : vector<188x3xf32> to vector<188x3xbf16>
    %c23 = arith.constant 23 : index
    %c0_216 = arith.constant 0 : index
    %c0_217 = arith.constant 0 : index
    %208 = vector.load %arg2[%c23, %c0_216, %c0_217] : memref<25x3x128xbf16, #tpu.memory_space<vmem>>, vector<1x3x128xbf16>
    %209 = vector.shape_cast %208 : vector<1x3x128xbf16> to vector<3x128xbf16>
    %cst_218 = arith.constant dense<0.000000e+00> : vector<188x128xf32>
    %210 = tpu.matmul %207, %209, %cst_218 {dimension_numbers = #tpu.dot_dimension_numbers<[1], [0], [0], [1], [0, 0, 1, 1], [], []>} : vector<188x3xbf16>, vector<3x128xbf16>, vector<188x128xf32> -> vector<188x128xf32>
    %c0_219 = arith.constant 0 : index
    %c0_220 = arith.constant 0 : index
    %211 = vector.load %arg5[%c0_219, %c0_220] : memref<188x128xf32, #tpu.memory_space<vmem>>, vector<188x128xf32>
    %212 = arith.addf %211, %210 : vector<188x128xf32>
    %c0_221 = arith.constant 0 : index
    %c0_222 = arith.constant 0 : index
    %213 = vector.load %arg5[%c0_221, %c0_222] : memref<188x128xf32, #tpu.memory_space<vmem>>, vector<188x128xf32>
    tpu.vector_store %arg5[%c0_221, %c0_222], %212 {strides = array<i32>} : memref<188x128xf32, #tpu.memory_space<vmem>>, vector<188x128xf32>,
    %c0_223 = arith.constant 0 : index
    %c68 = arith.constant 68 : index
    %c0_224 = arith.constant 0 : index
    %214 = vector.load %arg1[%c0_223, %c68, %c0_224] : memref<1x256x3xf32, #tpu.memory_space<vmem>>, vector<1x188x3xf32>
    %215 = vector.shape_cast %214 : vector<1x188x3xf32> to vector<188x3xf32>
    %216 = arith.truncf %215 : vector<188x3xf32> to vector<188x3xbf16>
    %c24 = arith.constant 24 : index
    %c0_225 = arith.constant 0 : index
    %c0_226 = arith.constant 0 : index
    %217 = vector.load %arg2[%c24, %c0_225, %c0_226] : memref<25x3x128xbf16, #tpu.memory_space<vmem>>, vector<1x3x128xbf16>
    %218 = vector.shape_cast %217 : vector<1x3x128xbf16> to vector<3x128xbf16>
    %cst_227 = arith.constant dense<0.000000e+00> : vector<188x128xf32>
    %219 = tpu.matmul %216, %218, %cst_227 {dimension_numbers = #tpu.dot_dimension_numbers<[1], [0], [0], [1], [0, 0, 1, 1], [], []>} : vector<188x3xbf16>, vector<3x128xbf16>, vector<188x128xf32> -> vector<188x128xf32>
    %c0_228 = arith.constant 0 : index
    %c0_229 = arith.constant 0 : index
    %220 = vector.load %arg5[%c0_228, %c0_229] : memref<188x128xf32, #tpu.memory_space<vmem>>, vector<188x128xf32>
    %221 = arith.addf %220, %219 : vector<188x128xf32>
    %c0_230 = arith.constant 0 : index
    %c0_231 = arith.constant 0 : index
    %222 = vector.load %arg5[%c0_230, %c0_231] : memref<188x128xf32, #tpu.memory_space<vmem>>, vector<188x128xf32>
    tpu.vector_store %arg5[%c0_230, %c0_231], %221 {strides = array<i32>} : memref<188x128xf32, #tpu.memory_space<vmem>>, vector<188x128xf32>,
    %c0_232 = arith.constant 0 : index
    %c0_233 = arith.constant 0 : index
    %223 = vector.load %arg3[%c0_232, %c0_233] : memref<1x128xf32, #tpu.memory_space<vmem>>, vector<1x128xf32>
    %c0_i32 = arith.constant 0 : i32
    %c12_i32 = arith.constant 12 : i32
    %224 = arith.addi %c0_i32, %c12_i32 : i32
    %c1_i32 = arith.constant 1 : i32
    scf.for %arg6 = %c0_i32 to %224 step %c1_i32  : i32 {
      %c16_i32 = arith.constant 16 : i32
      %225 = arith.muli %arg6, %c16_i32 : i32
      %226 = arith.index_cast %225 : i32 to index
      %c0_235 = arith.constant 0 : index
      %227 = vector.load %arg5[%226, %c0_235] : memref<188x128xf32, #tpu.memory_space<vmem>>, vector<12x128xf32>
      %228 = vector.broadcast %223 : vector<1x128xf32> to vector<12x128xf32>
      %229 = arith.addf %227, %228 : vector<12x128xf32>
      %c0_236 = arith.constant 0 : index
      %230 = arith.index_cast %arg6 : i32 to index
      %c0_237 = arith.constant 0 : index
      %c0_238 = arith.constant 0 : index
      %231 = vector.load %arg4[%c0_236, %230, %c0_237, %c0_238] : memref<1x12x12x128xf32, #tpu.memory_space<vmem>>, vector<1x1x12x128xf32>
      %232 = vector.shape_cast %231 : vector<1x1x12x128xf32> to vector<12x128xf32>
      %233 = vector.shape_cast %229 : vector<12x128xf32> to vector<1x1x12x128xf32>
      tpu.vector_store %arg4[%c0_236, %230, %c0_237, %c0_238], %233 {strides = array<i32>} : memref<1x12x12x128xf32, #tpu.memory_space<vmem>>, vector<1x1x12x128xf32>,
    }
    %c12_i32_234 = arith.constant 12 : i32
    return
  }
  func.func @transform_0(%arg0: i32) -> (i32, i32, i32) {
    %c0_i32 = arith.constant 0 : i32
    %c0_i32_0 = arith.constant 0 : i32
    %c0_i32_1 = arith.constant 0 : i32
    return %arg0, %c0_i32, %c0_i32_0 : i32, i32, i32
  }
  func.func @transform_1(%arg0: i32) -> (i32, i32, i32) {
    %c0_i32 = arith.constant 0 : i32
    %c0_i32_0 = arith.constant 0 : i32
    %c0_i32_1 = arith.constant 0 : i32
    %c0_i32_2 = arith.constant 0 : i32
    return %c0_i32, %c0_i32_0, %c0_i32_1 : i32, i32, i32
  }
  func.func @transform_2(%arg0: i32) -> (i32, i32) {
    %c0_i32 = arith.constant 0 : i32
    %c0_i32_0 = arith.constant 0 : i32
    %c0_i32_1 = arith.constant 0 : i32
    return %c0_i32, %c0_i32_0 : i32, i32
  }
  func.func @transform_3(%arg0: i32) -> (i32, i32, i32, i32) {
    %c0_i32 = arith.constant 0 : i32
    %c0_i32_0 = arith.constant 0 : i32
    %c0_i32_1 = arith.constant 0 : i32
    %c0_i32_2 = arith.constant 0 : i32
    return %arg0, %c0_i32, %c0_i32_0, %c0_i32_1 : i32, i32, i32, i32
  }
}

</mosaic_0001>

<bundles_post_ra>
// kernel: tpu_custom_call.1
= control target key start
LH: loop header
LB: loop body
LE: loop exit
PB: predicated region body
PF: predicated region fallthrough
CT: control target
= control target key end

     0   :  { %s9053_s12 = smov 0   ;;  %s10593_s0 = inlined_call_operand.vmem [shape: f32[2,256,3], index: 0, kind: input, shape index: {}]   ;;  %s10594_s1 = inlined_call_operand.vmem [shape: bf16[25,3,128], index: 1, kind: input, shape index: {}]   ;;  %s10595_s2 = inlined_call_operand.vmem [shape: f32[1,128], index: 2, kind: input, shape index: {}]   ;;  %s10596_s3 = inlined_call_operand.vmem [shape: f32[2,12,12,128], index: 3, kind: output, shape index: {}]  }
   0x1 LB: > { %s7164_s13 = sadd.s32 4294967295, %s9026_s12   ;;  %p7168_p0 = scmp.ge.s32.totalorder %s9026_s12, 1  ;;  %s9026_s12 = sphi %s9053_s12, %s13_s12  }
   0x2   : > { %p137_p1 = scmp.lt.s32.totalorder %s9026_s12, 3 }
   0x4   : > { %p138_p2 = pnand %p7168_p0, %p137_p1 }
   0x6   : > { %141 = sbr.rel (%p138_p2) target bundleno = 962 (0x3c2), region = 32 }
   0xd   : > { %v208_v0 = vld [vmem:[%s10594_s1] sm:$0x3]  ;;  %vm246_vm0 = vcmask 1040384   ;;  %vm247_vm1 = vcmask 1041408   ;;  %p161_p3 = scmp.lt.s32.totalorder %s7164_s13, 1  ;;  %v9032_v1 = vmov 65535  }
   0xe   : > { %v248_v2 = vsel %vm246_vm0, 4294967295, %v9032_v1  ;;  %v7327_v3 = vld [vmem:[%s10594_s1 + $0x18] sm:$0x3]  ;;  %v7184_v4 = vld [vmem:[%s10594_s1 + $0x2] sm:$0x3]  ;;  %vm209_vm2 = vcmask 23552  }
   0xf   : > { %v9070_v5 = vsel %vm247_vm1, %v248_v2, 0  ;;  %s10625_s13 = smov (!%p161_p3, %s7164_s13), 1  ;;  %v7340_v6 = vld [vmem:[%s10594_s1 + $0x1a] sm:$0x3]  ;;  %v7197_v11 = vld [vmem:[%s10594_s1 + $0x4] sm:$0x3] }
  0x10   : > { %v251_v7 = vand.u32 %v9070_v5, %v208_v0  ;;  %v9077_v8 = vand.u32 %v7327_v3, %v9070_v5  ;;  %v481_v9 = vand.u32 %v7184_v4, %v9070_v5  ;;  %v3817_v10 = vand.u32 %v7340_v6, %v9070_v5  ;;  %s7500_s22 = sshll.u32 %s10625_s13, 8  ;;  %s8998_s23 = smul.u32 192, %s10625_s13  ;;  %v7353_v12 = vld [vmem:[%s10594_s1 + $0x1c] sm:$0x3]  ;;  %v7366_v2 = vld [vmem:[%s10594_s1 + $0x1e] sm:$0x3] }
  0x11   : > { %s9085_s26 = scalar_lea.vmem %s10593_s0, %s7500_s22  ;;  %v9119_v29 = vand.u32 %v7197_v11, %v9070_v5  ;;  %v9130_v32 = vand.u32 %v7353_v12, %v9070_v5 }
  0x12   : > { %10600 = vst [vmem:[#allocation3_spill] sm:$0xff] %v9077_v8  ;;  %7826 = vmatprep.subr.bf16.mxu1 %v251_v7  ;;  %8138 = vmatprep.subr.bf16.mxu0 %v9077_v8  ;;  %s9097_s6 = scalar_lea.vmem %s10596_s3, %s8998_s23  ;;  %v172_v13 = vld [vmem:[%s9085_s26] sm:$0xff]  ;;  %v173_v14 = vld [vmem:[%s9085_s26 + $0x8] sm:$0xff]  ;;  %v174_v18 = vld [vmem:[%s9085_s26 + $0x10] sm:$0xff]  ;;  %s9028_s23 = smov 0  }
  0x13   : > { %7827 = vmatpush3.bf16.msra.mxu1 %v251_v7  ;;  %8139 = vmatpush3.bf16.msra.mxu0 %v9077_v8  ;;  %v3464_v15 = vld [vmem:[%s9085_s26 + $0x22] sm:$0xff]  ;;  %v196_v16 = vpack.c.bf16 %v173_v14, %v172_v13  ;;  %v3465_v17 = vld [vmem:[%s9085_s26 + $0x2a] sm:$0xff]  ;;  %v175_v19 = vld [vmem:[%s9085_s26 + $0x18] sm:$0xff]  ;;  %v9208_v7 = vand.u32 %v7366_v2, %v9070_v5 }
  0x14   : > { %7852 = vmatprep.subr.bf16.mxu1 %v481_v9  ;;  %8164 = vmatprep.subr.bf16.mxu0 %v3817_v10  ;;  %v9105_v20 = vpack.c.bf16 %v3465_v17, %v3464_v15  ;;  %v9107_v21 = vpack.c.bf16 %v175_v19, %v174_v18  ;;  %v3466_v22 = vld [vmem:[%s9085_s26 + $0x32] sm:$0xff]  ;;  %v3467_v23 = vld [vmem:[%s9085_s26 + $0x3a] sm:$0xff]  ;;  %v177_v26 = vld [vmem:[%s9085_s26 + $0x28] sm:$0xff] }
  0x15   : > { %v176_v24 = vld [vmem:[%s9085_s26 + $0x20] sm:$0xff]  ;;  %7828 = vmatprep.mubr.msk.bf16.mxu1 %vm209_vm2, %v196_v16  ;;  %v9113_v25 = vpack.c.bf16 %v3467_v23, %v3466_v22  ;;  %v3469_v28 = vld [vmem:[%s9085_s26 + $0x4a] sm:$0xff]  ;;  %v179_v34 = vld [vmem:[%s9085_s26 + $0x38] sm:$0xff] }
  0x16   : > { %v3468_v27 = vld [vmem:[%s9085_s26 + $0x42] sm:$0xff]  ;;  %8140 = vmatprep.mubr.msk.bf16.mxu0 %vm209_vm2, %v9105_v20  ;;  %7829 = vmatmul.mubr.msk.bf16.vlgmr.msra.gmra.mrb[0].mxu1 %vm209_vm2, %v9107_v21  ;;  %v9125_v30 = vpack.c.bf16 %v177_v26, %v176_v24  ;;  %v178_v33 = vld [vmem:[%s9085_s26 + $0x30] sm:$0xff]  ;;  %v3471_v36 = vld [vmem:[%s9085_s26 + $0x5a] sm:$0xff] }
  0x17   : > { %v9127_v31 = vpack.c.bf16 %v3469_v28, %v3468_v27  ;;  %7853 = vmatpush3.bf16.msra.mxu1 %v481_v9  ;;  %8141 = vmatmul.mubr.msk.bf16.vlgmr.msra.gmra.mrb[0].mxu0 %vm209_vm2, %v9113_v25  ;;  %v3470_v35 = vld [vmem:[%s9085_s26 + $0x52] sm:$0xff]  ;;  %v180_v37 = vld [vmem:[%s9085_s26 + $0x40] sm:$0xff]  ;;  %v181_v38 = vld [vmem:[%s9085_s26 + $0x48] sm:$0xff]  ;;  %v9147_v41 = vpack.c.bf16 %v179_v34, %v178_v33 }
  0x18   : > { %7832 = vmatprep.mubr.msk.bf16.mxu1 %vm209_vm2, %v9125_v30  ;;  %v3472_v39 = vld [vmem:[%s9085_s26 + $0x62] sm:$0xff]  ;;  %v3473_v40 = vld [vmem:[%s9085_s26 + $0x6a] sm:$0xff]  ;;  %8165 = vmatpush3.bf16.msra.mxu0 %v3817_v10  ;;  %v9150_v42 = vpack.c.bf16 %v3471_v36, %v3470_v35  ;;  %v9152_v43 = vpack.c.bf16 %v181_v38, %v180_v37  ;;  %v183_v46 = vld [vmem:[%s9085_s26 + $0x58] sm:$0xff] }
  0x19   : > { %8144 = vmatprep.mubr.msk.bf16.mxu0 %vm209_vm2, %v9127_v31  ;;  %7878 = vmatprep.subr.bf16.mxu1 %v9119_v29  ;;  %v9154_v44 = vpack.c.bf16 %v3473_v40, %v3472_v39  ;;  %v182_v45 = vld [vmem:[%s9085_s26 + $0x50] sm:$0xff]  ;;  %v3475_v48 = vld [vmem:[%s9085_s26 + $0x7a] sm:$0xff]  ;;  %v185_v50 = vld [vmem:[%s9085_s26 + $0x68] sm:$0xff] }
  0x1a   : > { %8190 = vmatprep.subr.bf16.mxu0 %v9130_v32  ;;  %v3474_v47 = vld [vmem:[%s9085_s26 + $0x72] sm:$0xff]  ;;  %v184_v49 = vld [vmem:[%s9085_s26 + $0x60] sm:$0xff]  ;;  %v9172_v53 = vpack.c.bf16 %v183_v46, %v182_v45  ;;  %v189_v62 = vld [vmem:[%s9085_s26 + $0x88] sm:$0xff] }
  0x1b   : > { %v3742_v51 = vld [vmem:[%s9085_s26 + $0x23] sm:$0xff]  ;;  %v3743_v52 = vld [vmem:[%s9085_s26 + $0x2b] sm:$0xff]  ;;  %v9174_v54 = vpack.c.bf16 %v3475_v48, %v3474_v47  ;;  %v9176_v55 = vpack.c.bf16 %v185_v50, %v184_v49  ;;  %v187_v58 = vld [vmem:[%s9085_s26 + $0x78] sm:$0xff] }
  0x1c   : > { %v9178_v56 = vpack.c.bf16 %v3743_v52, %v3742_v51  ;;  %v186_v57 = vld [vmem:[%s9085_s26 + $0x70] sm:$0xff]  ;;  %v3745_v60 = vld [vmem:[%s9085_s26 + $0x3b] sm:$0xff]  ;;  %v3746_v63 = vld [vmem:[%s9085_s26 + $0x43] sm:$0xff] }
  0x1d   : > { %v3744_v59 = vld [vmem:[%s9085_s26 + $0x33] sm:$0xff]  ;;  %v188_v61 = vld [vmem:[%s9085_s26 + $0x80] sm:$0xff]  ;;  %v3747_v0 = vld [vmem:[%s9085_s26 + $0x4b] sm:$0xff]  ;;  %v9196_v1 = vpack.c.bf16 %v187_v58, %v186_v57 }
  0x1e   : > { %7833 = vmatmul.mubr.msk.bf16.gmra.mrb[4].mxu1 %vm209_vm2, %v9147_v41  ;;  %v9201_v3 = vpack.c.bf16 %v3745_v60, %v3744_v59  ;;  %v9203_v4 = vpack.c.bf16 %v189_v62, %v188_v61  ;;  %v9205_v6 = vpack.c.bf16 %v3747_v0, %v3746_v63  ;;  %v190_v9 = vld [vmem:[%s9085_s26 + $0x90] sm:$0xff]  ;;  %v191_v10 = vld [vmem:[%s9085_s26 + $0x98] sm:$0xff]  ;;  %v192_v13 = vld [vmem:[%s9085_s26 + $0xa0] sm:$0xff] }
  0x1f   : > { %8145 = vmatmul.mubr.msk.bf16.gmra.mrb[4].mxu0 %vm209_vm2, %v9150_v42  ;;  %7836 = vmatprep.mubr.msk.bf16.mxu1 %vm209_vm2, %v9152_v43  ;;  %v3748_v11 = vld [vmem:[%s9085_s26 + $0x53] sm:$0xff]  ;;  %v3749_v12 = vld [vmem:[%s9085_s26 + $0x5b] sm:$0xff]  ;;  %v193_v14 = vld [vmem:[%s9085_s26 + $0xa8] sm:$0xff]  ;;  %v9228_v17 = vpack.c.bf16 %v191_v10, %v190_v9 }
  0x20   : > { %8148 = vmatprep.mubr.msk.bf16.mxu0 %vm209_vm2, %v9154_v44  ;;  %v3750_v15 = vld [vmem:[%s9085_s26 + $0x63] sm:$0xff]  ;;  %v3751_v16 = vld [vmem:[%s9085_s26 + $0x6b] sm:$0xff]  ;;  %v9230_v18 = vpack.c.bf16 %v3749_v12, %v3748_v11  ;;  %v9232_v19 = vpack.c.bf16 %v193_v14, %v192_v13  ;;  %v195_v24 = vld [vmem:[%s9085_s26 + $0xb8] sm:$0xf] }
  0x21   : > { %v9234_v22 = vpack.c.bf16 %v3751_v16, %v3750_v15  ;;  %v9243_v23 = vld [vmem:[%s9085_s26 + $0xb0] sm:$0xff]  ;;  %v3753_v27 = vld [vmem:[%s9085_s26 + $0x7b] sm:$0xff]  ;;  %v3754_v33 = vld [vmem:[%s9085_s26 + $0x83] sm:$0xff] }
  0x22   : > { %v3752_v26 = vld [vmem:[%s9085_s26 + $0x73] sm:$0xff]  ;;  %v406_v28 = vld [vmem:[%s9085_s26 + $0x1] sm:$0xff]  ;;  %v3755_v34 = vld [vmem:[%s9085_s26 + $0x8b] sm:$0xff]  ;;  %v207_v35 = vpack.c.bf16 %v195_v24, %v9243_v23 }
  0x23   : > { %v9255_v36 = vpack.c.bf16 %v3753_v27, %v3752_v26  ;;  %v9257_v38 = vpack.c.bf16 %v3755_v34, %v3754_v33  ;;  %v408_v39 = vld [vmem:[%s9085_s26 + $0x11] sm:$0xff]  ;;  %v409_v40 = vld [vmem:[%s9085_s26 + $0x19] sm:$0xff]  ;;  %v410_v47 = vld [vmem:[%s9085_s26 + $0x21] sm:$0xff] }
  0x24   : > { %v3756_v45 = vld [vmem:[%s9085_s26 + $0x93] sm:$0xff]  ;;  %v3757_v46 = vld [vmem:[%s9085_s26 + $0x9b] sm:$0xff]  ;;  %v411_v48 = vld [vmem:[%s9085_s26 + $0x29] sm:$0xff]  ;;  %v431_v51 = vpack.c.bf16 %v409_v40, %v408_v39 }
  0x25   : > { %v3758_v49 = vld [vmem:[%s9085_s26 + $0xa3] sm:$0xff]  ;;  %v3759_v50 = vld [vmem:[%s9085_s26 + $0xab] sm:$0xff]  ;;  %v9276_v57 = vpack.c.bf16 %v3757_v46, %v3756_v45  ;;  %v432_v58 = vpack.c.bf16 %v411_v48, %v410_v47  ;;  %v413_v62 = vld [vmem:[%s9085_s26 + $0x39] sm:$0xff] }
  0x26   : > { %7837 = vmatmul.mubr.msk.bf16.gmra.mrb[8].mxu1 %vm209_vm2, %v9172_v53  ;;  %v7210_v52 = vld [vmem:[%s10594_s1 + $0x6] sm:$0x3]  ;;  %v9278_v59 = vpack.c.bf16 %v3759_v50, %v3758_v49  ;;  %v412_v61 = vld [vmem:[%s9085_s26 + $0x31] sm:$0xff]  ;;  %v3761_v0 = vld [vmem:[%s9085_s26 + $0xbb] sm:$0xff] }
  0x27   : > { %8149 = vmatmul.mubr.msk.bf16.gmra.mrb[8].mxu0 %vm209_vm2, %v9174_v54  ;;  %7840 = vmatprep.mubr.msk.bf16.mxu1 %vm209_vm2, %v9176_v55  ;;  %v9281_v60 = vand.u32 %v7210_v52, %v9070_v5  ;;  %v9290_v63 = vld [vmem:[%s9085_s26 + $0xb3] sm:$0xff]  ;;  %v414_v2 = vld [vmem:[%s9085_s26 + $0x41] sm:$0xff]  ;;  %v415_v9 = vld [vmem:[%s9085_s26 + $0x49] sm:$0xff]  ;;  %v9301_v11 = vpack.c.bf16 %v413_v62, %v412_v61 }
  0x28   : > { %8166 = vmatprep.mubr.msk.bf16.mxu0 %vm209_vm2, %v9178_v56  ;;  %v3763_v10 = vld [vmem:[%s9085_s26 + $0xcb] sm:$0xff]  ;;  %v3775_v12 = vpack.c.bf16 %v3761_v0, %v9290_v63  ;;  %v9304_v13 = vpack.c.bf16 %v415_v9, %v414_v2  ;;  %v417_v16 = vld [vmem:[%s9085_s26 + $0x59] sm:$0xff]  ;;  %v418_v27 = vld [vmem:[%s9085_s26 + $0x61] sm:$0xff] }
  0x29   : > { %v416_v15 = vld [vmem:[%s9085_s26 + $0x51] sm:$0xff]  ;;  %v3765_v26 = vld [vmem:[%s9085_s26 + $0xdb] sm:$0xf]  ;;  %v422_v48 = vld [vmem:[%s9085_s26 + $0x81] sm:$0xff] }
  0x2a   : > { %v3764_v24 = vld [vmem:[%s9085_s26 + $0xd3] sm:$0xff]  ;;  %v9320_v34 = vpack.c.bf16 %v417_v16, %v416_v15  ;;  %v4023_v47 = vld [vmem:[%s9085_s26 + $0x3c] sm:$0xff]  ;;  %v423_v49 = vld [vmem:[%s9085_s26 + $0x89] sm:$0xff] }
  0x2b   : > { %v4021_v33 = vld [vmem:[%s9085_s26 + $0x2c] sm:$0xff]  ;;  %v421_v45 = vld [vmem:[%s9085_s26 + $0x79] sm:$0xff]  ;;  %v4024_v50 = vld [vmem:[%s9085_s26 + $0x44] sm:$0xff]  ;;  %v9348_v62 = vpack.c.bf16 %v423_v49, %v422_v48 }
  0x2c   : > { %v420_v40 = vld [vmem:[%s9085_s26 + $0x71] sm:$0xff]  ;;  %v427_v15 = vld [vmem:[%s9085_s26 + $0xa9] sm:$0xff] }
  0x2d   : > { %v4022_v46 = vld [vmem:[%s9085_s26 + $0x34] sm:$0xff]  ;;  %v9341_v52 = vpack.c.bf16 %v421_v45, %v420_v40  ;;  %v4028_v16 = vld [vmem:[%s9085_s26 + $0x64] sm:$0xff]  ;;  %v4031_v40 = vld [vmem:[%s9085_s26 + $0x7c] sm:$0xff] }
  0x2e   : > { %7841 = vmatmul.mubr.msk.bf16.gmra.mrb[12].mxu1 %vm209_vm2, %v9196_v1  ;;  %v9346_v61 = vpack.c.bf16 %v4023_v47, %v4022_v46  ;;  %v424_v9 = vld [vmem:[%s9085_s26 + $0x91] sm:$0xff]  ;;  %v684_v45 = vld [vmem:[%s9085_s26 + $0x2] sm:$0xff] }
  0x2f   : > { %8167 = vmatmul.mubr.msk.bf16.vlgmr.msra.gmra.mrb[0].mxu0 %vm209_vm2, %v9201_v3  ;;  %7844 = vmatprep.mubr.msk.bf16.mxu1 %vm209_vm2, %v9203_v4  ;;  %v685_v46 = vld [vmem:[%s9085_s26 + $0xa] sm:$0xff] }
  0x30   : > { %8170 = vmatprep.mubr.msk.bf16.mxu0 %vm209_vm2, %v9205_v6  ;;  %8191 = vmatpush3.bf16.msra.mxu0 %v9130_v32  ;;  %v407_v32 = vld [vmem:[%s9085_s26 + $0x9] sm:$0xff] }
  0x31   : > { %8216 = vmatprep.subr.bf16.mxu0 %v9208_v7  ;;  %v430_v37 = vpack.c.bf16 %v407_v32, %v406_v28  ;;  %v419_v28 = vld [vmem:[%s9085_s26 + $0x69] sm:$0xff] }
  0x32   : > { %v4020_v32 = vld [vmem:[%s9085_s26 + $0x24] sm:$0xff]  ;;  %v4033_v48 = vld [vmem:[%s9085_s26 + $0x8c] sm:$0xff] }
  0x33   : > { %v9324_v39 = vpack.c.bf16 %v4021_v33, %v4020_v32  ;;  %v429_v33 = vld [vmem:[%s9085_s26 + $0xb9] sm:$0xf]  ;;  %v4032_v47 = vld [vmem:[%s9085_s26 + $0x84] sm:$0xff] }
  0x36   : > { %7845 = vmatmul.mubr.msk.bf16.gmra.mrb[16].mxu1 %vm209_vm2, %v9228_v17 }
  0x37   : > { %8171 = vmatmul.mubr.msk.bf16.gmra.mrb[4].mxu0 %vm209_vm2, %v9230_v18  ;;  %7848 = vmatprep.mubr.msk.bf16.mxu1 %vm209_vm2, %v9232_v19 }
  0x38   : > { %8174 = vmatprep.mubr.msk.bf16.mxu0 %vm209_vm2, %v9234_v22 }
  0x3e   : > { %7849 = vmatmul.mubr.msk.bf16.gmra.mrb[20].mxu1 %vm209_vm2, %v207_v35  ;;  %v3777_v35 = vpack.c.bf16 %v3765_v26, %v3764_v24  ;;  %v4029_v24 = vld [vmem:[%s9085_s26 + $0x6c] sm:$0xff] }
  0x3f   : > { %8175 = vmatmul.mubr.msk.bf16.gmra.mrb[8].mxu0 %vm209_vm2, %v9255_v36  ;;  %7854 = vmatprep.mubr.msk.bf16.mxu1 %vm209_vm2, %v430_v37  ;;  %v9322_v37 = vpack.c.bf16 %v419_v28, %v418_v27  ;;  %v9379_v32 = vpack.c.bf16 %v4029_v24, %v4028_v16  ;;  %v7223_v24 = vld [vmem:[%s10594_s1 + $0x8] sm:$0x3] }
  0x40   : > { %8178 = vmatprep.mubr.msk.bf16.mxu0 %vm209_vm2, %v9257_v38 }
  0x46   : > { %7855 = vmatmul.mubr.msk.bf16.vlgmr.msra.gmra.mrb[0].mxu1 %vm209_vm2, %v431_v51  ;;  %v4025_v51 = vld [vmem:[%s9085_s26 + $0x4c] sm:$0xff] }
  0x47   : > { %7879 = vmatpush3.bf16.msra.mxu1 %v9119_v29  ;;  %8179 = vmatmul.mubr.msk.bf16.gmra.mrb[12].mxu0 %vm209_vm2, %v9276_v57  ;;  %v3762_v29 = vld [vmem:[%s9085_s26 + $0xc3] sm:$0xff]  ;;  %v9350_v0 = vpack.c.bf16 %v4025_v51, %v4024_v50  ;;  %v708_v51 = vpack.c.bf16 %v685_v46, %v684_v45  ;;  %v9435_v45 = vld [vmem:[%s9085_s26 + $0xb4] sm:$0xff] }
  0x48   : > { %7858 = vmatprep.mubr.msk.bf16.mxu1 %vm209_vm2, %v432_v58  ;;  %8182 = vmatprep.mubr.msk.bf16.mxu0 %vm209_vm2, %v9278_v59  ;;  %v3776_v14 = vpack.c.bf16 %v3763_v10, %v3762_v29  ;;  %v7379_v58 = vld [vmem:[%s10594_s1 + $0x20] sm:$0x3]  ;;  %v4026_v10 = vld [vmem:[%s9085_s26 + $0x54] sm:$0xff] }
  0x49   : > { %7904 = vmatprep.subr.bf16.mxu1 %v9281_v60  ;;  %v9353_v2 = vand.u32 %v7379_v58, %v9070_v5  ;;  %v425_v29 = vld [vmem:[%s9085_s26 + $0x99] sm:$0xff]  ;;  %v9402_v58 = vpack.c.bf16 %v4033_v48, %v4032_v47  ;;  %v4040_v47 = vld [vmem:[%s9085_s26 + $0xc4] sm:$0xff]  ;;  %v4041_v48 = vld [vmem:[%s9085_s26 + $0xcc] sm:$0xff] }
  0x4a   : > { %v9373_v26 = vpack.c.bf16 %v425_v29, %v424_v9  ;;  %v686_v9 = vld [vmem:[%s9085_s26 + $0x12] sm:$0xff]  ;;  %v687_v29 = vld [vmem:[%s9085_s26 + $0x1a] sm:$0xff] }
  0x4b   : > { %v709_v16 = vpack.c.bf16 %v687_v29, %v686_v9  ;;  %v4039_v46 = vld [vmem:[%s9085_s26 + $0xbc] sm:$0xff] }
  0x4c   : > { %v700_v29 = vld [vmem:[%s9085_s26 + $0x82] sm:$0xff] }
  0x4e   : > { %7859 = vmatmul.mubr.msk.bf16.gmra.mrb[4].mxu1 %vm209_vm2, %v9301_v11 }
  0x4f   : > { %8183 = vmatmul.mubr.msk.bf16.gmra.mrb[16].mxu0 %vm209_vm2, %v3775_v12  ;;  %7862 = vmatprep.mubr.msk.bf16.mxu1 %vm209_vm2, %v9304_v13  ;;  %v4027_v12 = vld [vmem:[%s9085_s26 + $0x5c] sm:$0xff] }
  0x50   : > { %8186 = vmatprep.mubr.msk.bf16.mxu0 %vm209_vm2, %v3776_v14  ;;  %v426_v14 = vld [vmem:[%s9085_s26 + $0xa1] sm:$0xff]  ;;  %v9375_v27 = vpack.c.bf16 %v4027_v12, %v4026_v10  ;;  %v4034_v10 = vld [vmem:[%s9085_s26 + $0x94] sm:$0xff] }
  0x51   : > { %v9377_v28 = vpack.c.bf16 %v427_v15, %v426_v14  ;;  %v4035_v12 = vld [vmem:[%s9085_s26 + $0x9c] sm:$0xff]  ;;  %v4036_v14 = vld [vmem:[%s9085_s26 + $0xa4] sm:$0xff]  ;;  %v4037_v15 = vld [vmem:[%s9085_s26 + $0xac] sm:$0xff] }
  0x56   : > { %7863 = vmatmul.mubr.msk.bf16.gmra.mrb[8].mxu1 %vm209_vm2, %v9320_v34 }
  0x57   : > { %8187 = vmatmul.mubr.msk.bf16.gmra.mrb[20].mxu0 %vm209_vm2, %v3777_v35  ;;  %7866 = vmatprep.mubr.msk.bf16.mxu1 %vm209_vm2, %v9322_v37  ;;  %v4030_v35 = vld [vmem:[%s9085_s26 + $0x74] sm:$0xff] }
  0x58   : > { %8192 = vmatprep.mubr.msk.bf16.mxu0 %vm209_vm2, %v9324_v39  ;;  %v9400_v50 = vpack.c.bf16 %v4031_v40, %v4030_v35  ;;  %v9421_v35 = vpack.c.bf16 %v4037_v15, %v4036_v14  ;;  %v9424_v40 = vand.u32 %v7223_v24, %v9070_v5  ;;  %v703_v24 = vld [vmem:[%s9085_s26 + $0x9a] sm:$0xff] }
  0x5e   : > { %7867 = vmatmul.mubr.msk.bf16.gmra.mrb[12].mxu1 %vm209_vm2, %v9341_v52 }
  0x5f   : > { %8193 = vmatmul.mubr.msk.bf16.vlgmr.msra.gmra.mrb[0].mxu0 %vm209_vm2, %v9346_v61  ;;  %7870 = vmatprep.mubr.msk.bf16.mxu1 %vm209_vm2, %v9348_v62 }
  0x60   : > { %8196 = vmatprep.mubr.msk.bf16.mxu0 %vm209_vm2, %v9350_v0  ;;  %8217 = vmatpush3.bf16.msra.mxu0 %v9208_v7  ;;  %v9388_v7 = vld [vmem:[%s9085_s26 + $0xb1] sm:$0xff] }
  0x61   : > { %8242 = vmatprep.subr.bf16.mxu0 %v9353_v2  ;;  %v441_v49 = vpack.c.bf16 %v429_v33, %v9388_v7  ;;  %v9419_v33 = vpack.c.bf16 %v4035_v12, %v4034_v10  ;;  %v701_v10 = vld [vmem:[%s9085_s26 + $0x8a] sm:$0xff]  ;;  %v7392_v12 = vld [vmem:[%s10594_s1 + $0x22] sm:$0x3] }
  0x62   : > { %v9462_v14 = vpack.c.bf16 %v701_v10, %v700_v29  ;;  %v9465_v15 = vand.u32 %v7392_v12, %v9070_v5  ;;  %v965_v29 = vld [vmem:[%s9085_s26 + $0x1b] sm:$0xff]  ;;  %v7236_v12 = vld [vmem:[%s10594_s1 + $0xa] sm:$0x3] }
  0x66   : > { %7871 = vmatmul.mubr.msk.bf16.gmra.mrb[16].mxu1 %vm209_vm2, %v9373_v26 }
  0x67   : > { %8197 = vmatmul.mubr.msk.bf16.gmra.mrb[4].mxu0 %vm209_vm2, %v9375_v27  ;;  %7874 = vmatprep.mubr.msk.bf16.mxu1 %vm209_vm2, %v9377_v28 }
  0x68   : > { %8200 = vmatprep.mubr.msk.bf16.mxu0 %vm209_vm2, %v9379_v32 }
  0x6e   : > { %7875 = vmatmul.mubr.msk.bf16.gmra.mrb[24].mxu1 %vm209_vm2, %v441_v49  ;;  %v4054_v49 = vpack.c.bf16 %v4041_v48, %v4040_v47  ;;  %v705_v47 = vld [vmem:[%s9085_s26 + $0xaa] sm:$0xff] }
  0x6f   : > { %8201 = vmatmul.mubr.msk.bf16.gmra.mrb[8].mxu0 %vm209_vm2, %v9400_v50  ;;  %7880 = vmatprep.mubr.msk.bf16.mxu1 %vm209_vm2, %v708_v51  ;;  %v4043_v51 = vld [vmem:[%s9085_s26 + $0xdc] sm:$0xf] }
  0x70   : > { %8204 = vmatprep.mubr.msk.bf16.mxu0 %vm209_vm2, %v9402_v58 }
  0x76   : > { %7881 = vmatmul.mubr.msk.bf16.vlgmr.msra.gmra.mrb[0].mxu1 %vm209_vm2, %v709_v16  ;;  %v702_v16 = vld [vmem:[%s9085_s26 + $0x92] sm:$0xff] }
  0x77   : > { %7905 = vmatpush3.bf16.msra.mxu1 %v9281_v60  ;;  %8205 = vmatmul.mubr.msk.bf16.gmra.mrb[12].mxu0 %vm209_vm2, %v9419_v33  ;;  %v4053_v60 = vpack.c.bf16 %v4039_v46, %v9435_v45  ;;  %v704_v46 = vld [vmem:[%s9085_s26 + $0xa2] sm:$0xff]  ;;  %v9481_v48 = vpack.c.bf16 %v703_v24, %v702_v16  ;;  %v1593_v16 = vand.u32 %v7236_v12, %v9070_v5 }
  0x78   : > { %7884 = vmatprep.mubr.msk.bf16.mxu1 %vm209_vm2, %v9105_v20  ;;  %8208 = vmatprep.mubr.msk.bf16.mxu0 %vm209_vm2, %v9421_v35  ;;  %v4042_v20 = vld [vmem:[%s9085_s26 + $0xd4] sm:$0xff]  ;;  %v4317_v24 = vld [vmem:[%s9085_s26 + $0xc8] sm:$0xff] }
  0x79   : > { %7930 = vmatprep.subr.bf16.mxu1 %v9424_v40  ;;  %v4055_v9 = vpack.c.bf16 %v4043_v51, %v4042_v20  ;;  %v963_v20 = vld [vmem:[%s9085_s26 + $0xb] sm:$0xff] }
  0x7e   : > { %7885 = vmatmul.mubr.msk.bf16.gmra.mrb[4].mxu1 %vm209_vm2, %v9113_v25 }
  0x7f   : > { %8209 = vmatmul.mubr.msk.bf16.gmra.mrb[16].mxu0 %vm209_vm2, %v4053_v60  ;;  %7888 = vmatprep.mubr.msk.bf16.mxu1 %vm209_vm2, %v9127_v31  ;;  %v9483_v60 = vpack.c.bf16 %v705_v47, %v704_v46  ;;  %v4319_v46 = vld [vmem:[%s9085_s26 + $0xd8] sm:$0xff] }
  0x80   : > { %8212 = vmatprep.mubr.msk.bf16.mxu0 %vm209_vm2, %v4054_v49  ;;  %v962_v49 = vld [vmem:[%s9085_s26 + $0x3] sm:$0xff] }
  0x86   : > { %7889 = vmatmul.mubr.msk.bf16.gmra.mrb[8].mxu1 %vm209_vm2, %v9150_v42 }
  0x87   : > { %8213 = vmatmul.mubr.msk.bf16.gmra.mrb[24].mxu0 %vm209_vm2, %v4055_v9  ;;  %7892 = vmatprep.mubr.msk.bf16.mxu1 %vm209_vm2, %v9154_v44  ;;  %v986_v9 = vpack.c.bf16 %v963_v20, %v962_v49 }
  0x88   : > { %8218 = vmatprep.mubr.msk.bf16.mxu0 %vm209_vm2, %v9147_v41 }
  0x8e   : > { %7893 = vmatmul.mubr.msk.bf16.gmra.mrb[12].mxu1 %vm209_vm2, %v9174_v54 }
  0x8f   : > { %8219 = vmatmul.mubr.msk.bf16.vlgmr.msra.gmra.mrb[0].mxu0 %vm209_vm2, %v9152_v43  ;;  %7896 = vmatprep.mubr.msk.bf16.mxu1 %vm209_vm2, %v9462_v14 }
  0x90   : > { %8222 = vmatprep.mubr.msk.bf16.mxu0 %vm209_vm2, %v9172_v53  ;;  %8243 = vmatpush3.bf16.msra.mxu0 %v9353_v2  ;;  %v9492_v53 = vld [vmem:[%s9085_s26 + $0xb2] sm:$0xff]  ;;  %v707_v2 = vld [vmem:[%s9085_s26 + $0xba] sm:$0xf] }
  0x91   : > { %8268 = vmatprep.subr.bf16.mxu0 %v9465_v15  ;;  %v719_v51 = vpack.c.bf16 %v707_v2, %v9492_v53 }
  0x96   : > { %7897 = vmatmul.mubr.msk.bf16.gmra.mrb[16].mxu1 %vm209_vm2, %v9481_v48 }
  0x97   : > { %8223 = vmatmul.mubr.msk.bf16.gmra.mrb[4].mxu0 %vm209_vm2, %v9176_v55  ;;  %7900 = vmatprep.mubr.msk.bf16.mxu1 %vm209_vm2, %v9483_v60  ;;  %v964_v55 = vld [vmem:[%s9085_s26 + $0x13] sm:$0xff] }
  0x98   : > { %8226 = vmatprep.mubr.msk.bf16.mxu0 %vm209_vm2, %v9196_v1  ;;  %v9509_v1 = vld [vmem:[%s9085_s26 + $0xb8] sm:$0xff]  ;;  %v987_v10 = vpack.c.bf16 %v965_v29, %v964_v55 }
  0x99   : > { %v1531_v55 = vld [vmem:[%s9085_s26 + $0x78] sm:$0xff] }
  0x9e   : > { %7901 = vmatmul.mubr.msk.bf16.gmra.mrb[28].mxu1 %vm209_vm2, %v719_v51 }
  0x9f   : > { %8227 = vmatmul.mubr.msk.bf16.gmra.mrb[8].mxu0 %vm209_vm2, %v9203_v4  ;;  %7906 = vmatprep.mubr.msk.bf16.mxu1 %vm209_vm2, %v986_v9  ;;  %v4330_v4 = vpack.c.bf16 %v9509_v1, %v9243_v23  ;;  %v4318_v23 = vld [vmem:[%s9085_s26 + $0xd0] sm:$0xff] }
  0xa0   : > { %8230 = vmatprep.mubr.msk.bf16.mxu0 %vm209_vm2, %v9228_v17  ;;  %v9525_v17 = vld [vmem:[%s9085_s26 + $0xc0] sm:$0xff]  ;;  %v4332_v2 = vpack.c.bf16 %v4319_v46, %v4318_v23  ;;  %v1530_v9 = vld [vmem:[%s9085_s26 + $0x70] sm:$0xff] }
  0xa1   : > { %v4331_v47 = vpack.c.bf16 %v4317_v24, %v9525_v17  ;;  %v9698_v23 = vpack.c.bf16 %v1531_v55, %v1530_v9  ;;  %v1800_v9 = vld [vmem:[%s9085_s26 + $0x31] sm:$0xff]  ;;  %v1801_v55 = vld [vmem:[%s9085_s26 + $0x39] sm:$0xff] }
  0xa6   : > { %7907 = vmatmul.mubr.msk.bf16.vlgmr.msra.gmra.mrb[0].mxu1 %vm209_vm2, %v987_v10  ;;  %v5132_v10 = vld [vmem:[%s9085_s26 + $0x33] sm:$0xff] }
  0xa7   : > { %7931 = vmatpush3.bf16.msra.mxu1 %v9424_v40  ;;  %8231 = vmatmul.mubr.msk.bf16.gmra.mrb[12].mxu0 %vm209_vm2, %v9232_v19  ;;  %v4321_v19 = vld [vmem:[%s9085_s26 + $0xe8] sm:$0xf] }
  0xa8   : > { %7910 = vmatprep.mubr.msk.bf16.mxu1 %vm209_vm2, %v9178_v56  ;;  %8234 = vmatprep.mubr.msk.bf16.mxu0 %vm209_vm2, %v4330_v4  ;;  %v4320_v56 = vld [vmem:[%s9085_s26 + $0xe0] sm:$0xff] }
  0xa9   : > { %7956 = vmatprep.subr.bf16.mxu1 %v1593_v16  ;;  %v4333_v40 = vpack.c.bf16 %v4321_v19, %v4320_v56  ;;  %v1533_v56 = vld [vmem:[%s9085_s26 + $0x88] sm:$0xff] }
  0xaa   : > { %v5134_v19 = vld [vmem:[%s9085_s26 + $0x43] sm:$0xff] }
  0xae   : > { %7911 = vmatmul.mubr.msk.bf16.gmra.mrb[4].mxu1 %vm209_vm2, %v9201_v3  ;;  %v7405_v3 = vld [vmem:[%s10594_s1 + $0x24] sm:$0x3] }
  0xaf   : > { %8235 = vmatmul.mubr.msk.bf16.gmra.mrb[16].mxu0 %vm209_vm2, %v4331_v47  ;;  %7914 = vmatprep.mubr.msk.bf16.mxu1 %vm209_vm2, %v9205_v6  ;;  %v5207_v6 = vand.u32 %v7405_v3, %v9070_v5  ;;  %v1534_v3 = vld [vmem:[%s9085_s26 + $0x90] sm:$0xff] }
  0xb0   : > { %8238 = vmatprep.mubr.msk.bf16.mxu0 %vm209_vm2, %v4332_v2  ;;  %v1532_v2 = vld [vmem:[%s9085_s26 + $0x80] sm:$0xff] }
  0xb6   : > { %7915 = vmatmul.mubr.msk.bf16.gmra.mrb[8].mxu1 %vm209_vm2, %v9230_v18  ;;  %v985_v18 = vld [vmem:[%s9085_s26 + $0xbb] sm:$0xf] }
  0xb7   : > { %8239 = vmatmul.mubr.msk.bf16.gmra.mrb[28].mxu0 %vm209_vm2, %v4333_v40  ;;  %7918 = vmatprep.mubr.msk.bf16.mxu1 %vm209_vm2, %v9234_v22  ;;  %v1240_v22 = vld [vmem:[%s9085_s26 + $0x4] sm:$0xff] }
  0xb8   : > { %8244 = vmatprep.mubr.msk.bf16.mxu0 %vm209_vm2, %v9301_v11  ;;  %v5135_v40 = vld [vmem:[%s9085_s26 + $0x4b] sm:$0xff] }
  0xbe   : > { %7919 = vmatmul.mubr.msk.bf16.gmra.mrb[12].mxu1 %vm209_vm2, %v9255_v36  ;;  %v1241_v36 = vld [vmem:[%s9085_s26 + $0xc] sm:$0xff] }
  0xbf   : > { %8245 = vmatmul.mubr.msk.bf16.vlgmr.msra.gmra.mrb[0].mxu0 %vm209_vm2, %v9304_v13  ;;  %7922 = vmatprep.mubr.msk.bf16.mxu1 %vm209_vm2, %v9257_v38  ;;  %v997_v38 = vpack.c.bf16 %v985_v18, %v9290_v63  ;;  %v1264_v11 = vpack.c.bf16 %v1241_v36, %v1240_v22  ;;  %v9580_v13 = vld [vmem:[%s9085_s26 + $0xb9] sm:$0xff]  ;;  %v9719_v36 = vpack.c.bf16 %v1533_v56, %v1532_v2 }
  0xc0   : > { %8248 = vmatprep.mubr.msk.bf16.mxu0 %vm209_vm2, %v9320_v34  ;;  %8269 = vmatpush3.bf16.msra.mxu0 %v9465_v15  ;;  %v7249_v34 = vld [vmem:[%s10594_s1 + $0xc] sm:$0x3]  ;;  %v4596_v15 = vld [vmem:[%s9085_s26 + $0xd1] sm:$0xff]  ;;  %v5137_v22 = vld [vmem:[%s9085_s26 + $0x5b] sm:$0xff]  ;;  %v1822_v56 = vpack.c.bf16 %v1801_v55, %v1800_v9 }
  0xc1   : > { %8294 = vmatprep.subr.bf16.mxu0 %v5207_v6  ;;  %v5136_v18 = vld [vmem:[%s9085_s26 + $0x53] sm:$0xff] }
  0xc6   : > { %7923 = vmatmul.mubr.msk.bf16.gmra.mrb[16].mxu1 %vm209_vm2, %v9276_v57  ;;  %v1242_v57 = vld [vmem:[%s9085_s26 + $0x14] sm:$0xff] }
  0xc7   : > { %8249 = vmatmul.mubr.msk.bf16.gmra.mrb[4].mxu0 %vm209_vm2, %v9322_v37  ;;  %7926 = vmatprep.mubr.msk.bf16.mxu1 %vm209_vm2, %v9278_v59  ;;  %v1243_v59 = vld [vmem:[%s9085_s26 + $0x1c] sm:$0xff]  ;;  %v4608_v37 = vpack.c.bf16 %v9580_v13, %v9388_v7 }
  0xc8   : > { %8252 = vmatprep.mubr.msk.bf16.mxu0 %vm209_vm2, %v9341_v52  ;;  %v1265_v63 = vpack.c.bf16 %v1243_v59, %v1242_v57  ;;  %v1871_v52 = vand.u32 %v7249_v34, %v9070_v5  ;;  %v4597_v7 = vld [vmem:[%s9085_s26 + $0xd9] sm:$0xff]  ;;  %v9728_v59 = vpack.c.bf16 %v5137_v22, %v5136_v18  ;;  %v9818_v18 = vld [vmem:[%s9085_s26 + $0xc3] sm:$0xff]  ;;  %v5151_v22 = vld [vmem:[%s9085_s26 + $0xcb] sm:$0xff] }
  0xc9   : > { %v4610_v20 = vpack.c.bf16 %v4597_v7, %v4596_v15  ;;  %v1536_v34 = vld [vmem:[%s9085_s26 + $0xa0] sm:$0xff]  ;;  %v9746_v15 = vld [vmem:[%s9085_s26 + $0xb0] sm:$0xff] }
  0xca   : > { %v5140_v7 = vld [vmem:[%s9085_s26 + $0x73] sm:$0xff] }
  0xce   : > { %7927 = vmatmul.mubr.msk.bf16.gmra.mrb[32].mxu1 %vm209_vm2, %v997_v38  ;;  %v7431_v38 = vld [vmem:[%s10594_s1 + $0x28] sm:$0x3] }
  0xcf   : > { %8253 = vmatmul.mubr.msk.bf16.gmra.mrb[8].mxu0 %vm209_vm2, %v9348_v62  ;;  %7932 = vmatprep.mubr.msk.bf16.mxu1 %vm209_vm2, %v1264_v11  ;;  %v9595_v62 = vld [vmem:[%s9085_s26 + $0xc1] sm:$0xff]  ;;  %v9724_v11 = vpack.c.bf16 %v5135_v40, %v5134_v19 }
  0xd0   : > { %8256 = vmatprep.mubr.msk.bf16.mxu0 %vm209_vm2, %v9373_v26  ;;  %v4595_v26 = vld [vmem:[%s9085_s26 + $0xc9] sm:$0xff] }
  0xd1   : > { %v4609_v49 = vpack.c.bf16 %v4595_v26, %v9595_v62  ;;  %v5139_v26 = vld [vmem:[%s9085_s26 + $0x6b] sm:$0xff] }
  0xd6   : > { %7933 = vmatmul.mubr.msk.bf16.vlgmr.msra.gmra.mrb[0].mxu1 %vm209_vm2, %v1265_v63  ;;  %v9731_v63 = vand.u32 %v7431_v38, %v9070_v5  ;;  %v1804_v38 = vld [vmem:[%s9085_s26 + $0x51] sm:$0xff] }
  0xd7   : > { %7957 = vmatpush3.bf16.msra.mxu1 %v1593_v16  ;;  %8257 = vmatmul.mubr.msk.bf16.gmra.mrb[12].mxu0 %vm209_vm2, %v9377_v28  ;;  %v4599_v28 = vld [vmem:[%s9085_s26 + $0xe9] sm:$0xf] }
  0xd8   : > { %7936 = vmatprep.mubr.msk.bf16.mxu1 %vm209_vm2, %v9324_v39  ;;  %8260 = vmatprep.mubr.msk.bf16.mxu0 %vm209_vm2, %v4608_v37  ;;  %v4598_v39 = vld [vmem:[%s9085_s26 + $0xe1] sm:$0xff] }
  0xd9   : > { %7982 = vmatprep.subr.bf16.mxu1 %v1871_v52  ;;  %v4611_v51 = vpack.c.bf16 %v4599_v28, %v4598_v39  ;;  %v1537_v37 = vld [vmem:[%s9085_s26 + $0xa8] sm:$0xff]  ;;  %v1552_v28 = vpack.c.bf16 %v9509_v1, %v9746_v15  ;;  %v1797_v1 = vld [vmem:[%s9085_s26 + $0x19] sm:$0xff] }
  0xde   : > { %7937 = vmatmul.mubr.msk.bf16.gmra.mrb[4].mxu1 %vm209_vm2, %v9346_v61  ;;  %v7418_v61 = vld [vmem:[%s10594_s1 + $0x26] sm:$0x3] }
  0xdf   : > { %8261 = vmatmul.mubr.msk.bf16.gmra.mrb[16].mxu0 %vm209_vm2, %v4609_v49  ;;  %7940 = vmatprep.mubr.msk.bf16.mxu1 %vm209_vm2, %v9350_v0  ;;  %v9620_v0 = vand.u32 %v7418_v61, %v9070_v5  ;;  %v5141_v49 = vld [vmem:[%s9085_s26 + $0x7b] sm:$0xff]  ;;  %v1541_v61 = vld [vmem:[%s9085_s26 + $0xc8] sm:$0xf] }
  0xe0   : > { %8264 = vmatprep.mubr.msk.bf16.mxu0 %vm209_vm2, %v4610_v20  ;;  %v9752_v20 = vpack.c.bf16 %v1537_v37, %v1536_v34  ;;  %v1805_v34 = vld [vmem:[%s9085_s26 + $0x59] sm:$0xff] }
  0xe1   : > { %v5153_v37 = vld [vmem:[%s9085_s26 + $0xdb] sm:$0xff] }
  0xe6   : > { %7941 = vmatmul.mubr.msk.bf16.gmra.mrb[8].mxu1 %vm209_vm2, %v9375_v27 }
  0xe7   : > { %8265 = vmatmul.mubr.msk.bf16.gmra.mrb[32].mxu0 %vm209_vm2, %v4611_v51  ;;  %7944 = vmatprep.mubr.msk.bf16.mxu1 %vm209_vm2, %v9379_v32  ;;  %v4873_v32 = vld [vmem:[%s9085_s26 + $0xca] sm:$0xff]  ;;  %v9758_v51 = vpack.c.bf16 %v5141_v49, %v5140_v7  ;;  %v9832_v7 = vpack.c.bf16 %v1805_v34, %v1804_v38  ;;  %v5414_v38 = vld [vmem:[%s9085_s26 + $0x54] sm:$0xff]  ;;  %v5415_v34 = vld [vmem:[%s9085_s26 + $0x5c] sm:$0xff] }
  0xe8   : > { %8270 = vmatprep.mubr.msk.bf16.mxu0 %vm209_vm2, %v9113_v25  ;;  %v1263_v25 = vld [vmem:[%s9085_s26 + $0xbc] sm:$0xf] }
  0xee   : > { %7945 = vmatmul.mubr.msk.bf16.gmra.mrb[12].mxu1 %vm209_vm2, %v9400_v50  ;;  %v1526_v50 = vld [vmem:[%s9085_s26 + $0x50] sm:$0xff] }
  0xef   : > { %8271 = vmatmul.mubr.msk.bf16.vlgmr.msra.gmra.mrb[0].mxu0 %vm209_vm2, %v9127_v31  ;;  %7948 = vmatprep.mubr.msk.bf16.mxu1 %vm209_vm2, %v9402_v58  ;;  %v1275_v31 = vpack.c.bf16 %v1263_v25, %v9435_v45  ;;  %v1527_v58 = vld [vmem:[%s9085_s26 + $0x58] sm:$0xff]  ;;  %v5143_v25 = vld [vmem:[%s9085_s26 + $0x8b] sm:$0xff] }
  0xf0   : > { %8274 = vmatprep.mubr.msk.bf16.mxu0 %vm209_vm2, %v9150_v42  ;;  %8295 = vmatpush3.bf16.msra.mxu0 %v5207_v6  ;;  %v9649_v42 = vld [vmem:[%s9085_s26 + $0xba] sm:$0xff]  ;;  %v9676_v45 = vpack.c.bf16 %v1527_v58, %v1526_v50 }
  0xf1   : > { %8320 = vmatprep.subr.bf16.mxu0 %v9620_v0  ;;  %v1535_v6 = vld [vmem:[%s9085_s26 + $0x98] sm:$0xff] }
  0xf2   : > { %v9726_v57 = vpack.c.bf16 %v1535_v6, %v1534_v3  ;;  %v1802_v3 = vld [vmem:[%s9085_s26 + $0x41] sm:$0xff]  ;;  %v1803_v6 = vld [vmem:[%s9085_s26 + $0x49] sm:$0xff] }
  0xf6   : > { %7949 = vmatmul.mubr.msk.bf16.gmra.mrb[16].mxu1 %vm209_vm2, %v9419_v33  ;;  %v4875_v33 = vld [vmem:[%s9085_s26 + $0xda] sm:$0xff] }
  0xf7   : > { %8275 = vmatmul.mubr.msk.bf16.gmra.mrb[4].mxu0 %vm209_vm2, %v9154_v44  ;;  %7952 = vmatprep.mubr.msk.bf16.mxu1 %vm209_vm2, %v9421_v35  ;;  %v7262_v44 = vld [vmem:[%s10594_s1 + $0xe] sm:$0x3] }
  0xf8   : > { %8278 = vmatprep.mubr.msk.bf16.mxu0 %vm209_vm2, %v9174_v54  ;;  %v4886_v54 = vpack.c.bf16 %v9649_v42, %v9492_v53  ;;  %v9657_v27 = vand.u32 %v7262_v44, %v9070_v5  ;;  %v4877_v53 = vld [vmem:[%s9085_s26 + $0xea] sm:$0xf]  ;;  %v5144_v44 = vld [vmem:[%s9085_s26 + $0x93] sm:$0xff] }
  0xfe   : > { %7953 = vmatmul.mubr.msk.bf16.gmra.mrb[36].mxu1 %vm209_vm2, %v1275_v31  ;;  %v1796_v31 = vld [vmem:[%s9085_s26 + $0x11] sm:$0xff] }
  0xff   : > { %8279 = vmatmul.mubr.msk.bf16.gmra.mrb[8].mxu0 %vm209_vm2, %v9462_v14  ;;  %7958 = vmatprep.mubr.msk.bf16.mxu1 %vm209_vm2, %v9107_v21  ;;  %v9664_v21 = vld [vmem:[%s9085_s26 + $0xc2] sm:$0xff] }
 0x100   : > { %8282 = vmatprep.mubr.msk.bf16.mxu0 %vm209_vm2, %v9481_v48  ;;  %v4887_v35 = vpack.c.bf16 %v4873_v32, %v9664_v21  ;;  %v1528_v14 = vld [vmem:[%s9085_s26 + $0x60] sm:$0xff]  ;;  %v1529_v48 = vld [vmem:[%s9085_s26 + $0x68] sm:$0xff]  ;;  %v1553_v32 = vpack.c.bf16 %v1541_v61, %v9525_v17 }
 0x101   : > { %v9696_v4 = vpack.c.bf16 %v1529_v48, %v1528_v14  ;;  %v1798_v17 = vld [vmem:[%s9085_s26 + $0x21] sm:$0xff]  ;;  %v1799_v48 = vld [vmem:[%s9085_s26 + $0x29] sm:$0xff] }
 0x102   : > { %v1807_v61 = vld [vmem:[%s9085_s26 + $0x69] sm:$0xff] }
 0x106   : > { %7959 = vmatmul.mubr.msk.bf16.vlgmr.msra.gmra.mrb[0].mxu1 %vm209_vm2, %v9125_v30  ;;  %v4874_v30 = vld [vmem:[%s9085_s26 + $0xd2] sm:$0xff] }
 0x107   : > { %7983 = vmatpush3.bf16.msra.mxu1 %v1871_v52  ;;  %8283 = vmatmul.mubr.msk.bf16.gmra.mrb[12].mxu0 %vm209_vm2, %v9483_v60  ;;  %v4876_v60 = vld [vmem:[%s9085_s26 + $0xe2] sm:$0xff] }
 0x108   : > { %7962 = vmatprep.mubr.msk.bf16.mxu1 %vm209_vm2, %v9147_v41  ;;  %8286 = vmatprep.mubr.msk.bf16.mxu0 %vm209_vm2, %v4886_v54  ;;  %v4888_v41 = vpack.c.bf16 %v4875_v33, %v4874_v30  ;;  %v4889_v24 = vpack.c.bf16 %v4877_v53, %v4876_v60  ;;  %v5138_v52 = vld [vmem:[%s9085_s26 + $0x63] sm:$0xff]  ;;  %v5145_v54 = vld [vmem:[%s9085_s26 + $0x9b] sm:$0xff]  ;;  %v1820_v30 = vpack.c.bf16 %v1797_v1, %v1796_v31  ;;  %v5147_v53 = vld [vmem:[%s9085_s26 + $0xab] sm:$0xff] }
 0x109   : > { %8008 = vmatprep.subr.bf16.mxu1 %v9657_v27  ;;  %v9754_v39 = vpack.c.bf16 %v5139_v26, %v5138_v52  ;;  %v5146_v60 = vld [vmem:[%s9085_s26 + $0xa3] sm:$0xff]  ;;  %v9829_v52 = vpack.c.bf16 %v1803_v6, %v1802_v3  ;;  %v5165_v26 = vpack.c.bf16 %v5151_v22, %v9818_v18  ;;  %v1808_v31 = vld [vmem:[%s9085_s26 + $0x71] sm:$0xff]  ;;  %v1809_v1 = vld [vmem:[%s9085_s26 + $0x79] sm:$0xff] }
 0x10a   : > { %v9804_v2 = vpack.c.bf16 %v5147_v53, %v5146_v60  ;;  %v5412_v3 = vld [vmem:[%s9085_s26 + $0x44] sm:$0xff]  ;;  %v5413_v6 = vld [vmem:[%s9085_s26 + $0x4c] sm:$0xff]  ;;  %v1813_v22 = vld [vmem:[%s9085_s26 + $0x99] sm:$0xff] }
 0x10e   : > { %7963 = vmatmul.mubr.msk.bf16.gmra.mrb[4].mxu1 %vm209_vm2, %v9152_v43  ;;  %v5133_v43 = vld [vmem:[%s9085_s26 + $0x3b] sm:$0xff] }
 0x10f   : > { %8287 = vmatmul.mubr.msk.bf16.gmra.mrb[16].mxu0 %vm209_vm2, %v4887_v35  ;;  %7966 = vmatprep.mubr.msk.bf16.mxu1 %vm209_vm2, %v9676_v45  ;;  %v9702_v47 = vpack.c.bf16 %v5133_v43, %v5132_v10  ;;  %v9781_v35 = vpack.c.bf16 %v5145_v54, %v5144_v44  ;;  %v5148_v10 = vld [vmem:[%s9085_s26 + $0xb3] sm:$0xff]  ;;  %v5149_v43 = vld [vmem:[%s9085_s26 + $0xbb] sm:$0xff] }
 0x110   : > { %8290 = vmatprep.mubr.msk.bf16.mxu0 %vm209_vm2, %v4888_v41  ;;  %v9806_v19 = vpack.c.bf16 %v5149_v43, %v5148_v10  ;;  %v5410_v54 = vld [vmem:[%s9085_s26 + $0x34] sm:$0xff]  ;;  %v9856_v10 = vpack.c.bf16 %v1809_v1, %v1808_v31  ;;  %v5416_v31 = vld [vmem:[%s9085_s26 + $0x64] sm:$0xff]  ;;  %v5417_v1 = vld [vmem:[%s9085_s26 + $0x6c] sm:$0xff] }
 0x111   : > { %v9690_v29 = vpop.f32.mrb[20].mxu1 }
 0x112   : > { %v9694_v12 = vpop.f32.mrb[21].mxu1 }
 0x113   : > { %v7851_v16 = vpop.f32.mrb[22].mxu1 }
 0x114   : > { %405 = vst [vmem:[#allocation2 + $0xb8] sm:$0xf] %v7851_v16  ;;  %v9700_v46 = vpop.f32.mrb[23].mxu1  ;;  %v1821_v16 = vpack.c.bf16 %v1799_v48, %v1798_v17 }
 0x116   : > { %7967 = vmatmul.mubr.msk.bf16.gmra.mrb[8].mxu1 %vm209_vm2, %v9696_v4 }
 0x117   : > { %8291 = vmatmul.mubr.msk.bf16.gmra.mrb[36].mxu0 %vm209_vm2, %v4889_v24  ;;  %7970 = vmatprep.mubr.msk.bf16.mxu1 %vm209_vm2, %v9698_v23  ;;  %v7275_v24 = vld [vmem:[%s10594_s1 + $0x10] sm:$0x3] }
 0x118   : > { %8296 = vmatprep.mubr.msk.bf16.mxu0 %vm209_vm2, %v9702_v47  ;;  %v9809_v40 = vand.u32 %v7275_v24, %v9070_v5 }
 0x11b   : > { %v635_v60 = vld [vmem:[#allocation2 + $0xb8] sm:$0xf] }
 0x11e   : > { %7971 = vmatmul.mubr.msk.bf16.gmra.mrb[12].mxu1 %vm209_vm2, %v9719_v36 }
 0x11f   : > { %8297 = vmatmul.mubr.msk.bf16.vlgmr.msra.gmra.mrb[0].mxu0 %vm209_vm2, %v9724_v11  ;;  %7974 = vmatprep.mubr.msk.bf16.mxu1 %vm209_vm2, %v9726_v57 }
 0x120   : > { %8300 = vmatprep.mubr.msk.bf16.mxu0 %vm209_vm2, %v9728_v59  ;;  %8321 = vmatpush3.bf16.msra.mxu0 %v9620_v0  ;;  %v5142_v0 = vld [vmem:[%s9085_s26 + $0x83] sm:$0xff] }
 0x121   : > { %8346 = vmatprep.subr.bf16.mxu0 %v9731_v63  ;;  %v9777_v58 = vpack.c.bf16 %v5143_v25, %v5142_v0  ;;  %v5154_v0 = vld [vmem:[%s9085_s26 + $0xe3] sm:$0xff]  ;;  %v5155_v25 = vld [vmem:[%s9085_s26 + $0xeb] sm:$0xf] }
 0x122   : > { %v5167_v55 = vpack.c.bf16 %v5155_v25, %v5154_v0  ;;  %v1814_v0 = vld [vmem:[%s9085_s26 + $0xa1] sm:$0xff]  ;;  %v1815_v25 = vld [vmem:[%s9085_s26 + $0xa9] sm:$0xff] }
 0x126   : > { %7975 = vmatmul.mubr.msk.bf16.gmra.mrb[16].mxu1 %vm209_vm2, %v9752_v20 }
 0x127   : > { %8301 = vmatmul.mubr.msk.bf16.gmra.mrb[4].mxu0 %vm209_vm2, %v9754_v39  ;;  %7978 = vmatprep.mubr.msk.bf16.mxu1 %vm209_vm2, %v1552_v28  ;;  %v1806_v28 = vld [vmem:[%s9085_s26 + $0x61] sm:$0xff] }
 0x128   : > { %8304 = vmatprep.mubr.msk.bf16.mxu0 %vm209_vm2, %v9758_v51  ;;  %v9851_v48 = vpack.c.bf16 %v1807_v61, %v1806_v28  ;;  %v9887_v28 = vpack.c.bf16 %v5415_v34, %v5414_v38 }
 0x12a   : > { %v9775_v50 = vpop.f32.mrb[20].mxu0 }
 0x12b   : > { %10601 = vst [vmem:[#allocation4_spill] sm:$0xff] %v9775_v50  ;;  %v9779_v33 = vpop.f32.mrb[21].mxu0 }
 0x12c   : > { %10602 = vst [vmem:[#allocation5_spill] sm:$0xff] %v9779_v33  ;;  %v9783_v41 = vpop.f32.mrb[22].mxu0 }
 0x12d   : > { %10603 = vst [vmem:[#allocation6_spill] sm:$0xff] %v9783_v41  ;;  %v9785_v14 = vpop.f32.mrb[23].mxu0  ;;  %v5432_v41 = vld [vmem:[%s9085_s26 + $0xe4] sm:$0xff] }
 0x12e   : > { %10604 = vst [vmem:[#allocation7_spill] sm:$0xff] %v9785_v14  ;;  %7979 = vmatmul.mubr.msk.bf16.gmra.mrb[40].mxu1 %vm209_vm2, %v1553_v32  ;;  %v5411_v32 = vld [vmem:[%s9085_s26 + $0x3c] sm:$0xff] }
 0x12f   : > { %8305 = vmatmul.mubr.msk.bf16.gmra.mrb[8].mxu0 %vm209_vm2, %v9777_v58  ;;  %7984 = vmatprep.mubr.msk.bf16.mxu1 %vm209_vm2, %v1820_v30 }
 0x130   : > { %8308 = vmatprep.mubr.msk.bf16.mxu0 %vm209_vm2, %v9781_v35 }
 0x136   : > { %7985 = vmatmul.mubr.msk.bf16.vlgmr.msra.gmra.mrb[0].mxu1 %vm209_vm2, %v1821_v16  ;;  %v9858_v16 = vpack.c.bf16 %v5411_v32, %v5410_v54  ;;  %v5418_v54 = vld [vmem:[%s9085_s26 + $0x74] sm:$0xff]  ;;  %v5419_v32 = vld [vmem:[%s9085_s26 + $0x7c] sm:$0xff] }
 0x137   : > { %8009 = vmatpush3.bf16.msra.mxu1 %v9657_v27  ;;  %8309 = vmatmul.mubr.msk.bf16.gmra.mrb[12].mxu0 %vm209_vm2, %v9804_v2  ;;  %v5152_v27 = vld [vmem:[%s9085_s26 + $0xd3] sm:$0xff] }
 0x138   : > { %7988 = vmatprep.mubr.msk.bf16.mxu1 %vm209_vm2, %v1822_v56  ;;  %8312 = vmatprep.mubr.msk.bf16.mxu0 %vm209_vm2, %v9806_v19  ;;  %v5166_v49 = vpack.c.bf16 %v5153_v37, %v5152_v27  ;;  %v1811_v56 = vld [vmem:[%s9085_s26 + $0x89] sm:$0xff] }
 0x139   : > { %8034 = vmatprep.subr.bf16.mxu1 %v9809_v40  ;;  %v7444_v37 = vld [vmem:[%s10594_s1 + $0x2a] sm:$0x3] }
 0x13a   : > { %v9890_v61 = vand.u32 %v7444_v37, %v9070_v5 }
 0x13e   : > { %7989 = vmatmul.mubr.msk.bf16.gmra.mrb[4].mxu1 %vm209_vm2, %v9829_v52 }
 0x13f   : > { %8313 = vmatmul.mubr.msk.bf16.gmra.mrb[16].mxu0 %vm209_vm2, %v5165_v26  ;;  %7992 = vmatprep.mubr.msk.bf16.mxu1 %vm209_vm2, %v9832_v7  ;;  %v9883_v26 = vpack.c.bf16 %v5413_v6, %v5412_v3  ;;  %v5423_v3 = vld [vmem:[%s9085_s26 + $0x9c] sm:$0xff] }
 0x140   : > { %8316 = vmatprep.mubr.msk.bf16.mxu0 %vm209_vm2, %v5166_v49 }
 0x141   : > { %v7876_v44 = vpop.f32.mrb[24].mxu1 }
 0x142   : > { %v9849_v30 = vadd.f32 %v7876_v44, %v9690_v29  ;;  %v597_v17 = vpop.f32.mrb[25].mxu1  ;;  %v9905_v44 = vld [vmem:[%s9085_s26 + $0xb1] sm:$0xff] }
 0x143   : > { %v9854_v53 = vadd.f32 %v597_v17, %v9694_v12  ;;  %v7877_v9 = vpop.f32.mrb[26].mxu1  ;;  %v1810_v12 = vld [vmem:[%s9085_s26 + $0x81] sm:$0xff]  ;;  %v9911_v17 = vpack.c.bf16 %v1815_v25, %v1814_v0 }
 0x144   : > { %v659_v29 = vadd.f32 %v7877_v9, %v635_v60  ;;  %v600_v43 = vpop.f32.mrb[27].mxu1  ;;  %v9878_v27 = vpack.c.bf16 %v1811_v56, %v1810_v12  ;;  %v9913_v60 = vpack.c.bf16 %v5417_v1, %v5416_v31  ;;  %v1830_v9 = vpack.c.bf16 %v9580_v13, %v9905_v44  ;;  %v2074_v12 = vld [vmem:[%s9085_s26 + $0x12] sm:$0xff]  ;;  %v2075_v13 = vld [vmem:[%s9085_s26 + $0x1a] sm:$0xff]  ;;  %v2077_v31 = vld [vmem:[%s9085_s26 + $0x2a] sm:$0xff] }
 0x145   : > { %v9861_v24 = vadd.f32 %v600_v43, %v9700_v46  ;;  %v1812_v46 = vld [vmem:[%s9085_s26 + $0x91] sm:$0xff]  ;;  %v2098_v38 = vpack.c.bf16 %v2075_v13, %v2074_v12  ;;  %v5424_v1 = vld [vmem:[%s9085_s26 + $0xa4] sm:$0xff] }
 0x146   : > { %683 = vst [vmem:[#allocation2 + $0xb8] sm:$0xf] %v659_v29  ;;  %7993 = vmatmul.mubr.msk.bf16.gmra.mrb[8].mxu1 %vm209_vm2, %v9851_v48  ;;  %v9885_v49 = vpack.c.bf16 %v1813_v22, %v1812_v46  ;;  %v5420_v29 = vld [vmem:[%s9085_s26 + $0x84] sm:$0xff]  ;;  %v5421_v43 = vld [vmem:[%s9085_s26 + $0x8c] sm:$0xff]  ;;  %v5422_v56 = vld [vmem:[%s9085_s26 + $0x94] sm:$0xff] }
 0x147   : > { %8317 = vmatmul.mubr.msk.bf16.gmra.mrb[40].mxu0 %vm209_vm2, %v5167_v55  ;;  %7996 = vmatprep.mubr.msk.bf16.mxu1 %vm209_vm2, %v9856_v10  ;;  %v9917_v55 = vpack.c.bf16 %v5419_v32, %v5418_v54  ;;  %v9936_v22 = vpack.c.bf16 %v5421_v43, %v5420_v29  ;;  %v9940_v37 = vpack.c.bf16 %v5423_v3, %v5422_v56  ;;  %v5425_v54 = vld [vmem:[%s9085_s26 + $0xac] sm:$0xff]  ;;  %v5427_v29 = vld [vmem:[%s9085_s26 + $0xbc] sm:$0xff] }
 0x148   : > { %8322 = vmatprep.mubr.msk.bf16.mxu0 %vm209_vm2, %v9858_v16  ;;  %v2078_v32 = vld [vmem:[%s9085_s26 + $0x32] sm:$0xff]  ;;  %v9963_v13 = vpack.c.bf16 %v5425_v54, %v5424_v1 }
 0x149   : > { %v7288_v12 = vld [vmem:[%s10594_s1 + $0x12] sm:$0x3] }
 0x14a   : > { %v5429_v1 = vld [vmem:[%s9085_s26 + $0xcc] sm:$0xff] }
 0x14b   : > { %v2082_v54 = vld [vmem:[%s9085_s26 + $0x52] sm:$0xff] }
 0x14d   : > { %v913_v14 = vld [vmem:[#allocation2 + $0xb8] sm:$0xf] }
 0x14e   : > { %7997 = vmatmul.mubr.msk.bf16.gmra.mrb[12].mxu1 %vm209_vm2, %v9878_v27 }
 0x14f   : > { %8323 = vmatmul.mubr.msk.bf16.vlgmr.msra.gmra.mrb[0].mxu0 %vm209_vm2, %v9883_v26  ;;  %8000 = vmatprep.mubr.msk.bf16.mxu1 %vm209_vm2, %v9885_v49 }
 0x150   : > { %8326 = vmatprep.mubr.msk.bf16.mxu0 %vm209_vm2, %v9887_v28  ;;  %8347 = vmatpush3.bf16.msra.mxu0 %v9731_v63  ;;  %v1819_v63 = vld [vmem:[%s9085_s26 + $0xc9] sm:$0xf] }
 0x151   : > { %8372 = vmatprep.subr.bf16.mxu0 %v9890_v61  ;;  %v1831_v6 = vpack.c.bf16 %v1819_v63, %v9595_v62  ;;  %v2076_v62 = vld [vmem:[%s9085_s26 + $0x22] sm:$0xff]  ;;  %v5426_v63 = vld [vmem:[%s9085_s26 + $0xb4] sm:$0xff] }
 0x152   : > { %v2099_v43 = vpack.c.bf16 %v2077_v31, %v2076_v62  ;;  %v9965_v3 = vpack.c.bf16 %v5427_v29, %v5426_v63  ;;  %v2081_v62 = vld [vmem:[%s9085_s26 + $0x4a] sm:$0xff] }
 0x153   : > { %v9977_v31 = vld [vmem:[%s9085_s26 + $0xc4] sm:$0xff] }
 0x154   : > { %10609 = vst [vmem:[#allocation12_spill] sm:$0xff] %v9977_v31  ;;  %v5443_v29 = vpack.c.bf16 %v5429_v1, %v9977_v31 }
 0x156   : > { %8001 = vmatmul.mubr.msk.bf16.gmra.mrb[16].mxu1 %vm209_vm2, %v9911_v17 }
 0x157   : > { %8327 = vmatmul.mubr.msk.bf16.gmra.mrb[4].mxu0 %vm209_vm2, %v9913_v60  ;;  %8004 = vmatprep.mubr.msk.bf16.mxu1 %vm209_vm2, %v1830_v9  ;;  %v2079_v9 = vld [vmem:[%s9085_s26 + $0x3a] sm:$0xff] }
 0x158   : > { %8330 = vmatprep.mubr.msk.bf16.mxu0 %vm209_vm2, %v9917_v55  ;;  %v2100_v56 = vpack.c.bf16 %v2079_v9, %v2078_v32  ;;  %v2083_v32 = vld [vmem:[%s9085_s26 + $0x5a] sm:$0xff] }
 0x159   : > { %v5431_v9 = vld [vmem:[%s9085_s26 + $0xdc] sm:$0xff] }
 0x15a   : > { %v9934_v46 = vpop.f32.mrb[24].mxu0 }
 0x15b   : > { %10605 = vst [vmem:[#allocation8_spill] sm:$0xff] %v9934_v46  ;;  %v9938_v34 = vpop.f32.mrb[25].mxu0 }
 0x15c   : > { %10606 = vst [vmem:[#allocation9_spill] sm:$0xff] %v9938_v34  ;;  %v9942_v0 = vpop.f32.mrb[26].mxu0 }
 0x15d   : > { %10607 = vst [vmem:[#allocation10_spill] sm:$0xff] %v9942_v0  ;;  %v9944_v25 = vpop.f32.mrb[27].mxu0  ;;  %v2085_v0 = vld [vmem:[%s9085_s26 + $0x6a] sm:$0xff] }
 0x15e   : > { %10608 = vst [vmem:[#allocation11_spill] sm:$0xff] %v9944_v25  ;;  %8005 = vmatmul.mubr.msk.bf16.gmra.mrb[44].mxu1 %vm209_vm2, %v1831_v6  ;;  %v9968_v6 = vand.u32 %v7288_v12, %v9070_v5  ;;  %v2087_v25 = vld [vmem:[%s9085_s26 + $0x7a] sm:$0xff] }
 0x15f   : > { %8331 = vmatmul.mubr.msk.bf16.gmra.mrb[8].mxu0 %vm209_vm2, %v9936_v22  ;;  %8010 = vmatprep.mubr.msk.bf16.mxu1 %vm209_vm2, %v2098_v38  ;;  %v2080_v38 = vld [vmem:[%s9085_s26 + $0x42] sm:$0xff] }
 0x160   : > { %8334 = vmatprep.mubr.msk.bf16.mxu0 %vm209_vm2, %v9940_v37  ;;  %v9988_v63 = vpack.c.bf16 %v2081_v62, %v2080_v38  ;;  %v5433_v38 = vld [vmem:[%s9085_s26 + $0xec] sm:$0xf]  ;;  %v2086_v62 = vld [vmem:[%s9085_s26 + $0x72] sm:$0xff] }
 0x161   : > { %v5445_v46 = vpack.c.bf16 %v5433_v38, %v5432_v41  ;;  %v10015_v33 = vpack.c.bf16 %v2087_v25, %v2086_v62  ;;  %v2088_v41 = vld [vmem:[%s9085_s26 + $0x82] sm:$0xff]  ;;  %v10054_v38 = vld [vmem:[%s9085_s26 + $0xb2] sm:$0xff] }
 0x162   : > { %v2092_v25 = vld [vmem:[%s9085_s26 + $0xa2] sm:$0xff] }
 0x166   : > { %8011 = vmatmul.mubr.msk.bf16.vlgmr.msra.gmra.mrb[0].mxu1 %vm209_vm2, %v2099_v43  ;;  %v9991_v43 = vpack.c.bf16 %v2083_v32, %v2082_v54  ;;  %v5688_v54 = vld [vmem:[%s9085_s26 + $0x40] sm:$0xff]  ;;  %v5689_v32 = vld [vmem:[%s9085_s26 + $0x48] sm:$0xff] }
 0x167   : > { %8035 = vmatpush3.bf16.msra.mxu1 %v9809_v40  ;;  %8335 = vmatmul.mubr.msk.bf16.gmra.mrb[12].mxu0 %vm209_vm2, %v9963_v13  ;;  %v5430_v40 = vld [vmem:[%s9085_s26 + $0xd4] sm:$0xff]  ;;  %v10017_v31 = vpack.c.bf16 %v5689_v32, %v5688_v54 }
 0x168   : > { %8014 = vmatprep.mubr.msk.bf16.mxu1 %vm209_vm2, %v2100_v56  ;;  %8338 = vmatprep.mubr.msk.bf16.mxu0 %vm209_vm2, %v9965_v3  ;;  %v5444_v12 = vpack.c.bf16 %v5431_v9, %v5430_v40  ;;  %v2084_v56 = vld [vmem:[%s9085_s26 + $0x62] sm:$0xff] }
 0x169   : > { %8060 = vmatprep.subr.bf16.mxu1 %v9968_v6 }
 0x16e   : > { %8015 = vmatmul.mubr.msk.bf16.gmra.mrb[4].mxu1 %vm209_vm2, %v9988_v63 }
 0x16f   : > { %8339 = vmatmul.mubr.msk.bf16.gmra.mrb[16].mxu0 %vm209_vm2, %v5443_v29  ;;  %8018 = vmatprep.mubr.msk.bf16.mxu1 %vm209_vm2, %v9991_v43  ;;  %v10010_v29 = vpack.c.bf16 %v2085_v0, %v2084_v56  ;;  %v2093_v56 = vld [vmem:[%s9085_s26 + $0xaa] sm:$0xff] }
 0x170   : > { %8342 = vmatprep.mubr.msk.bf16.mxu0 %vm209_vm2, %v5444_v12  ;;  %v10058_v62 = vpack.c.bf16 %v2093_v56, %v2092_v25 }
 0x171   : > { %v7902_v1 = vpop.f32.mrb[28].mxu1 }
 0x172   : > { %v10008_v40 = vadd.f32 %v7902_v1, %v9849_v30  ;;  %v875_v9 = vpop.f32.mrb[29].mxu1  ;;  %v2353_v1 = vld [vmem:[%s9085_s26 + $0x1b] sm:$0xff] }
 0x173   : > { %v10013_v34 = vadd.f32 %v875_v9, %v9854_v53  ;;  %v7903_v12 = vpop.f32.mrb[30].mxu1  ;;  %v2090_v53 = vld [vmem:[%s9085_s26 + $0x92] sm:$0xff] }
 0x174   : > { %v937_v50 = vadd.f32 %v7903_v12, %v913_v14  ;;  %v878_v8 = vpop.f32.mrb[31].mxu1  ;;  %v2089_v14 = vld [vmem:[%s9085_s26 + $0x8a] sm:$0xff] }
 0x175   : > { %v10020_v30 = vadd.f32 %v878_v8, %v9861_v24  ;;  %v2091_v8 = vld [vmem:[%s9085_s26 + $0x9a] sm:$0xff]  ;;  %v10033_v24 = vpack.c.bf16 %v2089_v14, %v2088_v41  ;;  %v2355_v41 = vld [vmem:[%s9085_s26 + $0x2b] sm:$0xff] }
 0x176   : > { %961 = vst [vmem:[#allocation2 + $0xb8] sm:$0xf] %v937_v50  ;;  %8019 = vmatmul.mubr.msk.bf16.gmra.mrb[8].mxu1 %vm209_vm2, %v10010_v29  ;;  %v7457_v50 = vld [vmem:[%s10594_s1 + $0x2c] sm:$0x3]  ;;  %v10038_v0 = vpack.c.bf16 %v2091_v8, %v2090_v53  ;;  %v5704_v14 = vld [vmem:[%s9085_s26 + $0xc0] sm:$0xff] }
 0x177   : > { %8343 = vmatmul.mubr.msk.bf16.gmra.mrb[44].mxu0 %vm209_vm2, %v5445_v46  ;;  %8022 = vmatprep.mubr.msk.bf16.mxu1 %vm209_vm2, %v10015_v33  ;;  %v10041_v46 = vand.u32 %v7457_v50, %v9070_v5  ;;  %v5705_v53 = vld [vmem:[%s9085_s26 + $0xc8] sm:$0xff] }
 0x178   : > { %8348 = vmatprep.mubr.msk.bf16.mxu0 %vm209_vm2, %v10017_v31  ;;  %v10099_v25 = vpack.c.bf16 %v5705_v53, %v5704_v14 }
 0x17e   : > { %8023 = vmatmul.mubr.msk.bf16.gmra.mrb[12].mxu1 %vm209_vm2, %v10033_v24 }
 0x17f   : > { %8349 = vmatmul.mubr.msk.bf16.vlgmr.msra.gmra.mrb[0].mxu0 %vm209_vm2, %v9676_v45  ;;  %8026 = vmatprep.mubr.msk.bf16.mxu1 %vm209_vm2, %v10038_v0  ;;  %v2108_v45 = vpack.c.bf16 %v9649_v42, %v10054_v38 }
 0x180   : > { %8352 = vmatprep.mubr.msk.bf16.mxu0 %vm209_vm2, %v9696_v4  ;;  %8373 = vmatpush3.bf16.msra.mxu0 %v9890_v61  ;;  %v2097_v4 = vld [vmem:[%s9085_s26 + $0xca] sm:$0xf]  ;;  %v2352_v61 = vld [vmem:[%s9085_s26 + $0x13] sm:$0xff] }
 0x181   : > { %8398 = vmatprep.subr.bf16.mxu0 %v10041_v46  ;;  %v2109_v42 = vpack.c.bf16 %v2097_v4, %v9664_v21  ;;  %v2376_v32 = vpack.c.bf16 %v2353_v1, %v2352_v61  ;;  %v10090_v21 = vld [vmem:[%s9085_s26 + $0xb8] sm:$0xff]  ;;  %v5709_v4 = vld [vmem:[%s9085_s26 + $0xe8] sm:$0xff] }
 0x182   : > { %v5719_v50 = vpack.c.bf16 %v10090_v21, %v9746_v15  ;;  %v10112_v15 = vld [vmem:[%s9085_s26 + $0xd0] sm:$0xff] }
 0x186   : > { %8027 = vmatmul.mubr.msk.bf16.gmra.mrb[16].mxu1 %vm209_vm2, %v10058_v62 }
 0x187   : > { %8353 = vmatmul.mubr.msk.bf16.gmra.mrb[4].mxu0 %vm209_vm2, %v9698_v23  ;;  %8030 = vmatprep.mubr.msk.bf16.mxu1 %vm209_vm2, %v2108_v45  ;;  %v5708_v45 = vld [vmem:[%s9085_s26 + $0xe0] sm:$0xff] }
 0x188   : > { %8356 = vmatprep.mubr.msk.bf16.mxu0 %vm209_vm2, %v9719_v36  ;;  %v2354_v36 = vld [vmem:[%s9085_s26 + $0x23] sm:$0xff]  ;;  %v5722_v1 = vpack.c.bf16 %v5709_v4, %v5708_v45 }
 0x189   : > { %v2377_v8 = vpack.c.bf16 %v2355_v41, %v2354_v36  ;;  %v1191_v41 = vld [vmem:[#allocation2 + $0xb8] sm:$0xf] }
 0x18a   : > { %v10073_v54 = vpop.f32.mrb[28].mxu0 }
 0x18b   : > { %v10075_v9 = vpop.f32.mrb[29].mxu0 }
 0x18c   : > { %v10077_v23 = vpop.f32.mrb[30].mxu0 }
 0x18d   : > { %v10079_v12 = vpop.f32.mrb[31].mxu0 }
 0x18e   : > { %8031 = vmatmul.mubr.msk.bf16.gmra.mrb[48].mxu1 %vm209_vm2, %v2109_v42 }
 0x18f   : > { %8357 = vmatmul.mubr.msk.bf16.gmra.mrb[8].mxu0 %vm209_vm2, %v9726_v57  ;;  %8036 = vmatprep.mubr.msk.bf16.mxu1 %vm209_vm2, %v2376_v32  ;;  %v7301_v57 = vld [vmem:[%s10594_s1 + $0x14] sm:$0x3] }
 0x190   : > { %8360 = vmatprep.mubr.msk.bf16.mxu0 %vm209_vm2, %v9752_v20  ;;  %v10102_v56 = vand.u32 %v7301_v57, %v9070_v5  ;;  %v5707_v20 = vld [vmem:[%s9085_s26 + $0xd8] sm:$0xff] }
 0x191   : > { %v5721_v61 = vpack.c.bf16 %v5707_v20, %v10112_v15 }
 0x196   : > { %8037 = vmatmul.mubr.msk.bf16.vlgmr.msra.gmra.mrb[0].mxu1 %vm209_vm2, %v2377_v8 }
 0x197   : > { %8061 = vmatpush3.bf16.msra.mxu1 %v9968_v6  ;;  %8361 = vmatmul.mubr.msk.bf16.gmra.mrb[12].mxu0 %vm209_vm2, %v5719_v50  ;;  %v5711_v6 = vld [vmem:[%s9085_s26 + $0xf8] sm:$0xf] }
 0x198   : > { %8040 = vmatprep.mubr.msk.bf16.mxu1 %vm209_vm2, %v9702_v47  ;;  %8364 = vmatprep.mubr.msk.bf16.mxu0 %vm209_vm2, %v10099_v25  ;;  %v5710_v47 = vld [vmem:[%s9085_s26 + $0xf0] sm:$0xff] }
 0x199   : > { %8086 = vmatprep.subr.bf16.mxu1 %v10102_v56 }
 0x19e   : > { %8041 = vmatmul.mubr.msk.bf16.gmra.mrb[4].mxu1 %vm209_vm2, %v9724_v11  ;;  %v5723_v11 = vpack.c.bf16 %v5711_v6, %v5710_v47 }
 0x19f   : > { %8365 = vmatmul.mubr.msk.bf16.gmra.mrb[16].mxu0 %vm209_vm2, %v5721_v61  ;;  %8044 = vmatprep.mubr.msk.bf16.mxu1 %vm209_vm2, %v9728_v59  ;;  %v7470_v59 = vld [vmem:[%s10594_s1 + $0x2e] sm:$0x3]  ;;  %v5986_v61 = vld [vmem:[%s9085_s26 + $0xe1] sm:$0xff] }
 0x1a0   : > { %8368 = vmatprep.mubr.msk.bf16.mxu0 %vm209_vm2, %v5722_v1  ;;  %v5987_v1 = vld [vmem:[%s9085_s26 + $0xe9] sm:$0xff] }
 0x1a1   : > { %v7928_v42 = vpop.f32.mrb[32].mxu1  ;;  %v6000_v6 = vpack.c.bf16 %v5987_v1, %v5986_v61  ;;  %v2919_v61 = vld [vmem:[%s9085_s26 + $0x78] sm:$0xff] }
 0x1a2   : > { %v10128_v32 = vadd.f32 %v7928_v42, %v10008_v40  ;;  %v1153_v36 = vpop.f32.mrb[33].mxu1  ;;  %v5982_v40 = vld [vmem:[%s9085_s26 + $0xc1] sm:$0xff]  ;;  %v6266_v1 = vld [vmem:[%s9085_s26 + $0xf2] sm:$0xff] }
 0x1a3   : > { %v10131_v14 = vadd.f32 %v1153_v36, %v10013_v34  ;;  %v7929_v53 = vpop.f32.mrb[34].mxu1  ;;  %v10147_v34 = vand.u32 %v7470_v59, %v9070_v5 }
 0x1a4   : > { %v1215_v8 = vadd.f32 %v7929_v53, %v1191_v41  ;;  %v1156_v57 = vpop.f32.mrb[35].mxu1 }
 0x1a5   : > { %v10134_v50 = vadd.f32 %v1156_v57, %v10020_v30  ;;  %v5983_v30 = vld [vmem:[%s9085_s26 + $0xc9] sm:$0xff] }
 0x1a6   : > { %1239 = vst [vmem:[#allocation2 + $0xb8] sm:$0xf] %v1215_v8  ;;  %8045 = vmatmul.mubr.msk.bf16.gmra.mrb[8].mxu1 %vm209_vm2, %v9754_v39  ;;  %v2375_v39 = vld [vmem:[%s9085_s26 + $0xcb] sm:$0xf]  ;;  %v10197_v45 = vpack.c.bf16 %v5983_v30, %v5982_v40  ;;  %v6264_v40 = vld [vmem:[%s9085_s26 + $0xe2] sm:$0xff] }
 0x1a7   : > { %8369 = vmatmul.mubr.msk.bf16.gmra.mrb[48].mxu0 %vm209_vm2, %v5723_v11  ;;  %8048 = vmatprep.mubr.msk.bf16.mxu1 %vm209_vm2, %v9758_v51  ;;  %v2630_v51 = vld [vmem:[%s9085_s26 + $0x14] sm:$0xff]  ;;  %v6265_v30 = vld [vmem:[%s9085_s26 + $0xea] sm:$0xff] }
 0x1a8   : > { %8374 = vmatprep.mubr.msk.bf16.mxu0 %vm209_vm2, %v9829_v52 }
 0x1ad   : > { %v1469_v53 = vld [vmem:[#allocation2 + $0xb8] sm:$0xf] }
 0x1ae   : > { %8049 = vmatmul.mubr.msk.bf16.gmra.mrb[12].mxu1 %vm209_vm2, %v9777_v58  ;;  %v2631_v58 = vld [vmem:[%s9085_s26 + $0x1c] sm:$0xff] }
 0x1af   : > { %8375 = vmatmul.mubr.msk.bf16.vlgmr.msra.gmra.mrb[0].mxu0 %vm209_vm2, %v9832_v7  ;;  %8052 = vmatprep.mubr.msk.bf16.mxu1 %vm209_vm2, %v9781_v35  ;;  %v2387_v35 = vpack.c.bf16 %v2375_v39, %v9818_v18  ;;  %v2654_v52 = vpack.c.bf16 %v2631_v58, %v2630_v51  ;;  %v10188_v18 = vld [vmem:[%s9085_s26 + $0xb9] sm:$0xff] }
 0x1b0   : > { %8378 = vmatprep.mubr.msk.bf16.mxu0 %vm209_vm2, %v9851_v48  ;;  %8399 = vmatpush3.bf16.msra.mxu0 %v10041_v46  ;;  %v5997_v20 = vpack.c.bf16 %v10188_v18, %v9905_v44  ;;  %v10210_v44 = vld [vmem:[%s9085_s26 + $0xd1] sm:$0xff] }
 0x1b1   : > { %8424 = vmatprep.subr.bf16.mxu0 %v10147_v34 }
 0x1b6   : > { %8053 = vmatmul.mubr.msk.bf16.gmra.mrb[16].mxu1 %vm209_vm2, %v9804_v2 }
 0x1b7   : > { %8379 = vmatmul.mubr.msk.bf16.gmra.mrb[4].mxu0 %vm209_vm2, %v9856_v10  ;;  %8056 = vmatprep.mubr.msk.bf16.mxu1 %vm209_vm2, %v9806_v19  ;;  %v2632_v19 = vld [vmem:[%s9085_s26 + $0x24] sm:$0xff] }
 0x1b8   : > { %8382 = vmatprep.mubr.msk.bf16.mxu0 %vm209_vm2, %v9878_v27  ;;  %v2633_v27 = vld [vmem:[%s9085_s26 + $0x2c] sm:$0xff] }
 0x1b9   : > { %v2655_v46 = vpack.c.bf16 %v2633_v27, %v2632_v19  ;;  %v2916_v19 = vld [vmem:[%s9085_s26 + $0x60] sm:$0xff]  ;;  %v2917_v27 = vld [vmem:[%s9085_s26 + $0x68] sm:$0xff] }
 0x1ba   : > { %v10171_v2 = vpop.f32.mrb[32].mxu0 }
 0x1bb   : > { %v10173_v7 = vpop.f32.mrb[33].mxu0 }
 0x1bc   : > { %v10175_v48 = vpop.f32.mrb[34].mxu0 }
 0x1bd   : > { %v10177_v10 = vpop.f32.mrb[35].mxu0 }
 0x1be   : > { %8057 = vmatmul.mubr.msk.bf16.gmra.mrb[52].mxu1 %vm209_vm2, %v2387_v35  ;;  %v2915_v35 = vld [vmem:[%s9085_s26 + $0x58] sm:$0xff] }
 0x1bf   : > { %8383 = vmatmul.mubr.msk.bf16.gmra.mrb[8].mxu0 %vm209_vm2, %v9885_v49  ;;  %8062 = vmatprep.mubr.msk.bf16.mxu1 %vm209_vm2, %v2654_v52  ;;  %v7314_v49 = vld [vmem:[%s10594_s1 + $0x16] sm:$0x3] }
 0x1c0   : > { %8386 = vmatprep.mubr.msk.bf16.mxu0 %vm209_vm2, %v9911_v17  ;;  %v10200_v4 = vand.u32 %v7314_v49, %v9070_v5  ;;  %v5985_v17 = vld [vmem:[%s9085_s26 + $0xd9] sm:$0xff] }
 0x1c1   : > { %v5999_v47 = vpack.c.bf16 %v5985_v17, %v10210_v44  ;;  %v10300_v52 = vld [vmem:[%s9085_s26 + $0xd2] sm:$0xff] }
 0x1c2   : > { %v2918_v17 = vld [vmem:[%s9085_s26 + $0x70] sm:$0xff] }
 0x1c6   : > { %8063 = vmatmul.mubr.msk.bf16.vlgmr.msra.gmra.mrb[0].mxu1 %vm209_vm2, %v2655_v46  ;;  %v10611_v46 = vld [vmem:[#allocation3_spill] sm:$0xff] }
 0x1c7   : > { %8087 = vmatpush3.bf16.msra.mxu1 %v10102_v56  ;;  %8387 = vmatmul.mubr.msk.bf16.gmra.mrb[12].mxu0 %vm209_vm2, %v5997_v20  ;;  %v5989_v56 = vld [vmem:[%s9085_s26 + $0xf9] sm:$0xf]  ;;  %v2936_v20 = vpack.c.bf16 %v2917_v27, %v2916_v19  ;;  %v2926_v19 = vld [vmem:[%s9085_s26 + $0xb0] sm:$0xff] }
 0x1c8   : > { %8066 = vmatprep.mubr.msk.bf16.mxu1 %vm209_vm2, %v9858_v16  ;;  %8390 = vmatprep.mubr.msk.bf16.mxu0 %vm209_vm2, %v10197_v45  ;;  %v5988_v16 = vld [vmem:[%s9085_s26 + $0xf1] sm:$0xff] }
 0x1c9   : > { %8112 = vmatprep.subr.bf16.mxu1 %v10200_v4  ;;  %v6528_v27 = vld [vmem:[%s9085_s26 + $0x73] sm:$0xff] }
 0x1ce   : > { %8067 = vmatmul.mubr.msk.bf16.gmra.mrb[4].mxu1 %vm209_vm2, %v9883_v26  ;;  %v6001_v26 = vpack.c.bf16 %v5989_v56, %v5988_v16  ;;  %v2921_v16 = vld [vmem:[%s9085_s26 + $0x88] sm:$0xff] }
 0x1cf   : > { %8391 = vmatmul.mubr.msk.bf16.gmra.mrb[16].mxu0 %vm209_vm2, %v5999_v47  ;;  %8070 = vmatprep.mubr.msk.bf16.mxu1 %vm209_vm2, %v9887_v28  ;;  %v7483_v28 = vld [vmem:[%s10594_s1 + $0x30] sm:$0x3]  ;;  %v6267_v47 = vld [vmem:[%s9085_s26 + $0xfa] sm:$0xf] }
 0x1d0   : > { %8394 = vmatprep.mubr.msk.bf16.mxu0 %vm209_vm2, %v6000_v6  ;;  %v2920_v6 = vld [vmem:[%s9085_s26 + $0x80] sm:$0xff] }
 0x1d1   : > { %v7954_v42 = vpop.f32.mrb[36].mxu1 }
 0x1d2   : > { %v10226_v36 = vadd.f32 %v7954_v42, %v10128_v32  ;;  %v1431_v41 = vpop.f32.mrb[37].mxu1  ;;  %v10245_v32 = vand.u32 %v7483_v28, %v9070_v5  ;;  %v2653_v5 = vld [vmem:[%s9085_s26 + $0xcc] sm:$0xf]  ;;  %v6522_v42 = vld [vmem:[%s9085_s26 + $0x43] sm:$0xff] }
 0x1d3   : > { %v10229_v11 = vadd.f32 %v1431_v41, %v10131_v14  ;;  %v7955_v8 = vpop.f32.mrb[38].mxu1  ;;  %v10286_v14 = vld [vmem:[%s9085_s26 + $0xba] sm:$0xff]  ;;  %v6523_v41 = vld [vmem:[%s9085_s26 + $0x4b] sm:$0xff] }
 0x1d4   : > { %v1493_v57 = vadd.f32 %v7955_v8, %v1469_v53  ;;  %v1434_v59 = vpop.f32.mrb[39].mxu1 }
 0x1d5   : > { %v10232_v39 = vadd.f32 %v1434_v59, %v10134_v50  ;;  %v6260_v50 = vld [vmem:[%s9085_s26 + $0xc2] sm:$0xff] }
 0x1d6   : > { %1517 = vst [vmem:[#allocation2 + $0xb8] sm:$0xf] %v1493_v57  ;;  %8071 = vmatmul.mubr.msk.bf16.gmra.mrb[8].mxu1 %vm209_vm2, %v9913_v60  ;;  %v2908_v60 = vld [vmem:[%s9085_s26 + $0x20] sm:$0xff] }
 0x1d7   : > { %8395 = vmatmul.mubr.msk.bf16.gmra.mrb[52].mxu0 %vm209_vm2, %v6001_v26  ;;  %8074 = vmatprep.mubr.msk.bf16.mxu1 %vm209_vm2, %v9917_v55  ;;  %v2909_v55 = vld [vmem:[%s9085_s26 + $0x28] sm:$0xff]  ;;  %v2937_v26 = vpack.c.bf16 %v2919_v61, %v2918_v17  ;;  %v2931_v17 = vld [vmem:[%s9085_s26 + $0xd8] sm:$0xf] }
 0x1d8   : > { %8400 = vmatprep.mubr.msk.bf16.mxu0 %vm209_vm2, %v9988_v63  ;;  %v2932_v63 = vpack.c.bf16 %v2909_v55, %v2908_v60  ;;  %v2938_v60 = vpack.c.bf16 %v2921_v16, %v2920_v6  ;;  %v6532_v61 = vld [vmem:[%s9085_s26 + $0x93] sm:$0xff]  ;;  %v6534_v6 = vld [vmem:[%s9085_s26 + $0xa3] sm:$0xff]  ;;  %v2943_v16 = vpack.c.bf16 %v2931_v17, %v10112_v15 }
 0x1d9   : > { %v3188_v15 = vld [vmem:[%s9085_s26 + $0x31] sm:$0xff]  ;;  %v3198_v17 = vld [vmem:[%s9085_s26 + $0x81] sm:$0xff] }
 0x1dd   : > { %v1747_v57 = vld [vmem:[#allocation2 + $0xb8] sm:$0xf] }
 0x1de   : > { %8075 = vmatmul.mubr.msk.bf16.gmra.mrb[12].mxu1 %vm209_vm2, %v9936_v22  ;;  %v10610_v22 = vld [vmem:[#allocation12_spill] sm:$0xff] }
 0x1df   : > { %8401 = vmatmul.mubr.msk.bf16.vlgmr.msra.gmra.mrb[0].mxu0 %vm209_vm2, %v9991_v43  ;;  %8078 = vmatprep.mubr.msk.bf16.mxu1 %vm209_vm2, %v9940_v37  ;;  %v2665_v37 = vpack.c.bf16 %v2653_v5, %v10610_v22  ;;  %v6279_v5 = vpack.c.bf16 %v6267_v47, %v6266_v1  ;;  %v6546_v22 = vpack.c.bf16 %v6523_v41, %v6522_v42  ;;  %v6533_v1 = vld [vmem:[%s9085_s26 + $0x9b] sm:$0xff]  ;;  %v3187_v47 = vld [vmem:[%s9085_s26 + $0x29] sm:$0xff] }
 0x1e0   : > { %8404 = vmatprep.mubr.msk.bf16.mxu0 %vm209_vm2, %v10010_v29  ;;  %8425 = vmatpush3.bf16.msra.mxu0 %v10147_v34  ;;  %v6261_v34 = vld [vmem:[%s9085_s26 + $0xca] sm:$0xff] }
 0x1e1   : > { %8450 = vmatprep.subr.bf16.mxu0 %v10245_v32  ;;  %v10292_v58 = vpack.c.bf16 %v6261_v34, %v6260_v50  ;;  %v2924_v50 = vld [vmem:[%s9085_s26 + $0xa0] sm:$0xff] }
 0x1e2   : > { %v6526_v34 = vld [vmem:[%s9085_s26 + $0x63] sm:$0xff] }
 0x1e6   : > { %8079 = vmatmul.mubr.msk.bf16.gmra.mrb[16].mxu1 %vm209_vm2, %v9963_v13 }
 0x1e7   : > { %8405 = vmatmul.mubr.msk.bf16.gmra.mrb[4].mxu0 %vm209_vm2, %v10015_v33  ;;  %8082 = vmatprep.mubr.msk.bf16.mxu1 %vm209_vm2, %v9965_v3  ;;  %v2910_v3 = vld [vmem:[%s9085_s26 + $0x30] sm:$0xff] }
 0x1e8   : > { %8408 = vmatprep.mubr.msk.bf16.mxu0 %vm209_vm2, %v10033_v24  ;;  %v2911_v24 = vld [vmem:[%s9085_s26 + $0x38] sm:$0xff] }
 0x1e9   : > { %v2933_v51 = vpack.c.bf16 %v2911_v24, %v2910_v3  ;;  %v6524_v3 = vld [vmem:[%s9085_s26 + $0x53] sm:$0xff]  ;;  %v6525_v24 = vld [vmem:[%s9085_s26 + $0x5b] sm:$0xff] }
 0x1ea   : > { %v10269_v13 = vpop.f32.mrb[36].mxu0 }
 0x1eb   : > { %v10271_v43 = vpop.f32.mrb[37].mxu0 }
 0x1ec   : > { %v10273_v33 = vpop.f32.mrb[38].mxu0 }
 0x1ed   : > { %v10275_v29 = vpop.f32.mrb[39].mxu0 }
 0x1ee   : > { %8083 = vmatmul.mubr.msk.bf16.gmra.mrb[56].mxu1 %vm209_vm2, %v2665_v37 }
 0x1ef   : > { %8409 = vmatmul.mubr.msk.bf16.gmra.mrb[8].mxu0 %vm209_vm2, %v10038_v0  ;;  %8088 = vmatprep.mubr.msk.bf16.mxu1 %vm209_vm2, %v2932_v63  ;;  %v6275_v0 = vpack.c.bf16 %v10286_v14, %v10054_v38  ;;  %v6263_v38 = vld [vmem:[%s9085_s26 + $0xda] sm:$0xff] }
 0x1f0   : > { %8412 = vmatprep.mubr.msk.bf16.mxu0 %vm209_vm2, %v10058_v62  ;;  %v2914_v62 = vld [vmem:[%s9085_s26 + $0x50] sm:$0xff]  ;;  %v2923_v63 = vld [vmem:[%s9085_s26 + $0x98] sm:$0xff] }
 0x1f1   : > { %v2935_v49 = vpack.c.bf16 %v2915_v35, %v2914_v62  ;;  %v6547_v62 = vpack.c.bf16 %v6525_v24, %v6524_v3 }
 0x1f6   : > { %8089 = vmatmul.mubr.msk.bf16.vlgmr.msra.gmra.mrb[0].mxu1 %vm209_vm2, %v2933_v51  ;;  %v6527_v51 = vld [vmem:[%s9085_s26 + $0x6b] sm:$0xff] }
 0x1f7   : > { %8113 = vmatpush3.bf16.msra.mxu1 %v10200_v4  ;;  %8413 = vmatmul.mubr.msk.bf16.gmra.mrb[12].mxu0 %vm209_vm2, %v6275_v0  ;;  %v6278_v4 = vpack.c.bf16 %v6265_v30, %v6264_v40  ;;  %v6529_v40 = vld [vmem:[%s9085_s26 + $0x7b] sm:$0xff]  ;;  %v6530_v30 = vld [vmem:[%s9085_s26 + $0x83] sm:$0xff] }
 0x1f8   : > { %8092 = vmatprep.mubr.msk.bf16.mxu1 %vm209_vm2, %v10017_v31  ;;  %8416 = vmatprep.mubr.msk.bf16.mxu0 %vm209_vm2, %v10292_v58  ;;  %v6277_v31 = vpack.c.bf16 %v6263_v38, %v10300_v52  ;;  %v6548_v38 = vpack.c.bf16 %v6527_v51, %v6526_v34  ;;  %v3193_v34 = vld [vmem:[%s9085_s26 + $0x59] sm:$0xff] }
 0x1f9   : > { %8476 = vmatprep.subr.bf16.mxu1 %v10611_v46  ;;  %v6540_v51 = vld [vmem:[%s9085_s26 + $0xd3] sm:$0xff] }
 0x1fe   : > { %8093 = vmatmul.mubr.msk.bf16.gmra.mrb[4].mxu1 %vm209_vm2, %v2935_v49  ;;  %v6531_v49 = vld [vmem:[%s9085_s26 + $0x8b] sm:$0xff] }
 0x1ff   : > { %8417 = vmatmul.mubr.msk.bf16.gmra.mrb[16].mxu0 %vm209_vm2, %v6277_v31  ;;  %8096 = vmatprep.mubr.msk.bf16.mxu1 %vm209_vm2, %v2936_v20  ;;  %v2941_v31 = vpack.c.bf16 %v10090_v21, %v2926_v19  ;;  %v6549_v20 = vpack.c.bf16 %v6529_v40, %v6528_v27  ;;  %v6535_v21 = vld [vmem:[%s9085_s26 + $0xab] sm:$0xff] }
 0x200   : > { %8420 = vmatprep.mubr.msk.bf16.mxu0 %vm209_vm2, %v6278_v4  ;;  %v6550_v4 = vpack.c.bf16 %v6531_v49, %v6530_v30  ;;  %v3196_v49 = vld [vmem:[%s9085_s26 + $0x71] sm:$0xff] }
 0x201   : > { %v7980_v56 = vpop.f32.mrb[40].mxu1 }
 0x202   : > { %v10326_v53 = vadd.f32 %v7980_v56, %v10226_v36  ;;  %v1709_v8 = vpop.f32.mrb[41].mxu1 }
 0x203   : > { %v10329_v59 = vadd.f32 %v1709_v8, %v10229_v11  ;;  %v7981_v28 = vpop.f32.mrb[42].mxu1  ;;  %v2922_v11 = vld [vmem:[%s9085_s26 + $0x90] sm:$0xff]  ;;  %v6552_v8 = vpack.c.bf16 %v6535_v21, %v6534_v6 }
 0x204   : > { %v1771_v55 = vadd.f32 %v7981_v28, %v1747_v57  ;;  %v1712_v36 = vpop.f32.mrb[43].mxu1  ;;  %v2939_v0 = vpack.c.bf16 %v2923_v63, %v2922_v11  ;;  %v3189_v28 = vld [vmem:[%s9085_s26 + $0x39] sm:$0xff]  ;;  %v6539_v11 = vld [vmem:[%s9085_s26 + $0xcb] sm:$0xff] }
 0x205   : > { %v10332_v37 = vadd.f32 %v1712_v36, %v10232_v39  ;;  %v2925_v39 = vld [vmem:[%s9085_s26 + $0xa8] sm:$0xff]  ;;  %v3211_v63 = vpack.c.bf16 %v3189_v28, %v3188_v15 }
 0x206   : > { %1795 = vst [vmem:[#allocation2 + $0xb8] sm:$0xf] %v1771_v55  ;;  %8097 = vmatmul.mubr.msk.bf16.gmra.mrb[8].mxu1 %vm209_vm2, %v2937_v26  ;;  %v2940_v35 = vpack.c.bf16 %v2925_v39, %v2924_v50  ;;  %v3190_v55 = vld [vmem:[%s9085_s26 + $0x41] sm:$0xff]  ;;  %v3191_v36 = vld [vmem:[%s9085_s26 + $0x49] sm:$0xff]  ;;  %v3192_v39 = vld [vmem:[%s9085_s26 + $0x51] sm:$0xff] }
 0x207   : > { %8421 = vmatmul.mubr.msk.bf16.gmra.mrb[56].mxu0 %vm209_vm2, %v6279_v5  ;;  %8100 = vmatprep.mubr.msk.bf16.mxu1 %vm209_vm2, %v2938_v60  ;;  %v6536_v5 = vld [vmem:[%s9085_s26 + $0xb3] sm:$0xff]  ;;  %v6537_v60 = vld [vmem:[%s9085_s26 + $0xbb] sm:$0xff]  ;;  %v3212_v24 = vpack.c.bf16 %v3191_v36, %v3190_v55  ;;  %v3213_v19 = vpack.c.bf16 %v3193_v34, %v3192_v39 }
 0x208   : > { %8426 = vmatprep.mubr.msk.bf16.mxu0 %vm209_vm2, %v6546_v22  ;;  %v6538_v22 = vld [vmem:[%s9085_s26 + $0xc3] sm:$0xff]  ;;  %v6553_v3 = vpack.c.bf16 %v6537_v60, %v6536_v5  ;;  %v3201_v36 = vld [vmem:[%s9085_s26 + $0x99] sm:$0xff] }
 0x209   : > { %v6554_v50 = vpack.c.bf16 %v6539_v11, %v6538_v22  ;;  %v6802_v22 = vld [vmem:[%s9085_s26 + $0x54] sm:$0xff]  ;;  %v6803_v11 = vld [vmem:[%s9085_s26 + $0x5c] sm:$0xff] }
 0x20a   : > { %v6825_v39 = vpack.c.bf16 %v6803_v11, %v6802_v22 }
 0x20e   : > { %8101 = vmatmul.mubr.msk.bf16.gmra.mrb[12].mxu1 %vm209_vm2, %v2939_v0  ;;  %v6541_v0 = vld [vmem:[%s9085_s26 + $0xdb] sm:$0xff] }
 0x20f   : > { %8427 = vmatmul.mubr.msk.bf16.vlgmr.msra.gmra.mrb[0].mxu0 %vm209_vm2, %v6547_v62  ;;  %8104 = vmatprep.mubr.msk.bf16.mxu1 %vm209_vm2, %v2940_v35  ;;  %v3194_v62 = vld [vmem:[%s9085_s26 + $0x61] sm:$0xff]  ;;  %v3195_v35 = vld [vmem:[%s9085_s26 + $0x69] sm:$0xff]  ;;  %v6555_v27 = vpack.c.bf16 %v6541_v0, %v6540_v51  ;;  %v3204_v0 = vld [vmem:[%s9085_s26 + $0xb1] sm:$0xff] }
 0x210   : > { %8430 = vmatprep.mubr.msk.bf16.mxu0 %vm209_vm2, %v6548_v38  ;;  %8451 = vmatpush3.bf16.msra.mxu0 %v10245_v32  ;;  %v3186_v32 = vld [vmem:[%s9085_s26 + $0x21] sm:$0xff]  ;;  %v3214_v40 = vpack.c.bf16 %v3195_v35, %v3194_v62  ;;  %v6806_v62 = vld [vmem:[%s9085_s26 + $0x74] sm:$0xff] }
 0x211   : > { %v3210_v42 = vpack.c.bf16 %v3187_v47, %v3186_v32  ;;  %v6542_v38 = vld [vmem:[%s9085_s26 + $0xe3] sm:$0xff]  ;;  %v6801_v47 = vld [vmem:[%s9085_s26 + $0x4c] sm:$0xff] }
 0x212   : > { %v6800_v32 = vld [vmem:[%s9085_s26 + $0x44] sm:$0xff]  ;;  %v6807_v35 = vld [vmem:[%s9085_s26 + $0x7c] sm:$0xff] }
 0x213   : > { %v6824_v60 = vpack.c.bf16 %v6801_v47, %v6800_v32 }
 0x216   : > { %8105 = vmatmul.mubr.msk.bf16.gmra.mrb[16].mxu1 %vm209_vm2, %v2941_v31  ;;  %v3197_v31 = vld [vmem:[%s9085_s26 + $0x79] sm:$0xff] }
 0x217   : > { %8431 = vmatmul.mubr.msk.bf16.gmra.mrb[4].mxu0 %vm209_vm2, %v6549_v20  ;;  %8108 = vmatprep.mubr.msk.bf16.mxu1 %vm209_vm2, %v10099_v25  ;;  %v6551_v25 = vpack.c.bf16 %v6533_v1, %v6532_v61  ;;  %v6544_v20 = vld [vmem:[%s9085_s26 + $0xf3] sm:$0xff]  ;;  %v3199_v61 = vld [vmem:[%s9085_s26 + $0x89] sm:$0xff] }
 0x218   : > { %8434 = vmatprep.mubr.msk.bf16.mxu0 %vm209_vm2, %v6550_v4  ;;  %v6545_v4 = vld [vmem:[%s9085_s26 + $0xfb] sm:$0xf]  ;;  %v3216_v28 = vpack.c.bf16 %v3199_v61, %v3198_v17  ;;  %v6813_v17 = vld [vmem:[%s9085_s26 + $0xac] sm:$0xff] }
 0x219   : > { %v6557_v15 = vpack.c.bf16 %v6545_v4, %v6544_v20  ;;  %v3476_v20 = vld [vmem:[%s9085_s26 + $0x82] sm:$0xff]  ;;  %v3477_v4 = vld [vmem:[%s9085_s26 + $0x8a] sm:$0xff] }
 0x21a   : > { %v10370_v56 = vpop.f32.mrb[40].mxu0  ;;  %v3494_v32 = vpack.c.bf16 %v3477_v4, %v3476_v20 }
 0x21b   : > { %v10372_v41 = vpop.f32.mrb[41].mxu0 }
 0x21c   : > { %v10374_v26 = vpop.f32.mrb[42].mxu0 }
 0x21d   : > { %v10376_v57 = vpop.f32.mrb[43].mxu0 }
 0x21e   : > { %8109 = vmatmul.mubr.msk.bf16.gmra.mrb[60].mxu1 %vm209_vm2, %v2943_v16  ;;  %v3215_v16 = vpack.c.bf16 %v3197_v31, %v3196_v49  ;;  %v6810_v49 = vld [vmem:[%s9085_s26 + $0x94] sm:$0xff]  ;;  %v6811_v31 = vld [vmem:[%s9085_s26 + $0x9c] sm:$0xff] }
 0x21f   : > { %8435 = vmatmul.mubr.msk.bf16.gmra.mrb[8].mxu0 %vm209_vm2, %v6551_v25  ;;  %8114 = vmatprep.mubr.msk.bf16.mxu1 %vm209_vm2, %v3210_v42  ;;  %v2025_v25 = vld [vmem:[#allocation2 + $0xb8] sm:$0xf] }
 0x220   : > { %8438 = vmatprep.mubr.msk.bf16.mxu0 %vm209_vm2, %v6552_v8 }
 0x226   : > { %8115 = vmatmul.mubr.msk.bf16.vlgmr.msra.gmra.mrb[0].mxu1 %vm209_vm2, %v3211_v63  ;;  %v3202_v63 = vld [vmem:[%s9085_s26 + $0xa1] sm:$0xff] }
 0x227   : > { %8477 = vmatpush3.bf16.msra.mxu1 %v10611_v46  ;;  %8439 = vmatmul.mubr.msk.bf16.gmra.mrb[12].mxu0 %vm209_vm2, %v6553_v3  ;;  %v6543_v46 = vld [vmem:[%s9085_s26 + $0xeb] sm:$0xff] }
 0x228   : > { %8118 = vmatprep.mubr.msk.bf16.mxu1 %vm209_vm2, %v3212_v24  ;;  %8442 = vmatprep.mubr.msk.bf16.mxu0 %vm209_vm2, %v6554_v50  ;;  %v6556_v30 = vpack.c.bf16 %v6543_v46, %v6542_v38  ;;  %v6804_v3 = vld [vmem:[%s9085_s26 + $0x64] sm:$0xff]  ;;  %v6805_v24 = vld [vmem:[%s9085_s26 + $0x6c] sm:$0xff] }
 0x229   : > { %v6826_v51 = vpack.c.bf16 %v6805_v24, %v6804_v3  ;;  %v6808_v38 = vld [vmem:[%s9085_s26 + $0x84] sm:$0xff]  ;;  %v6809_v46 = vld [vmem:[%s9085_s26 + $0x8c] sm:$0xff]  ;;  %v6818_v3 = vld [vmem:[%s9085_s26 + $0xd4] sm:$0xff] }
 0x22a   : > { %v6819_v24 = vld [vmem:[%s9085_s26 + $0xdc] sm:$0xff] }
 0x22e   : > { %8119 = vmatmul.mubr.msk.bf16.gmra.mrb[4].mxu1 %vm209_vm2, %v3213_v19  ;;  %v3219_v19 = vpack.c.bf16 %v10188_v18, %v3204_v0  ;;  %v6812_v18 = vld [vmem:[%s9085_s26 + $0xa4] sm:$0xff] }
 0x22f   : > { %8443 = vmatmul.mubr.msk.bf16.gmra.mrb[16].mxu0 %vm209_vm2, %v6555_v27  ;;  %8122 = vmatprep.mubr.msk.bf16.mxu1 %vm209_vm2, %v3214_v40  ;;  %v6827_v27 = vpack.c.bf16 %v6807_v35, %v6806_v62  ;;  %v6828_v40 = vpack.c.bf16 %v6809_v46, %v6808_v38  ;;  %v3487_v62 = vld [vmem:[%s9085_s26 + $0xda] sm:$0xf] }
 0x230   : > { %8446 = vmatprep.mubr.msk.bf16.mxu0 %vm209_vm2, %v6556_v30  ;;  %v3209_v30 = vld [vmem:[%s9085_s26 + $0xd9] sm:$0xf] }
 0x231   : > { %v8006_v1 = vpop.f32.mrb[44].mxu1  ;;  %v3221_v61 = vpack.c.bf16 %v3209_v30, %v10210_v44  ;;  %v3478_v44 = vld [vmem:[%s9085_s26 + $0x92] sm:$0xff]  ;;  %v6823_v38 = vld [vmem:[%s9085_s26 + $0xfc] sm:$0xf] }
 0x232   : > { %v10416_v6 = vadd.f32 %v8006_v1, %v10326_v53  ;;  %v1987_v21 = vpop.f32.mrb[45].mxu1  ;;  %v6822_v35 = vld [vmem:[%s9085_s26 + $0xf4] sm:$0xff] }
 0x233   : > { %v10419_v42 = vadd.f32 %v1987_v21, %v10329_v59  ;;  %v8007_v8 = vpop.f32.mrb[46].mxu1  ;;  %v3200_v59 = vld [vmem:[%s9085_s26 + $0x91] sm:$0xff]  ;;  %v6830_v21 = vpack.c.bf16 %v6813_v17, %v6812_v18 }
 0x234   : > { %v2049_v5 = vadd.f32 %v8007_v8, %v2025_v25  ;;  %v1990_v53 = vpop.f32.mrb[47].mxu1  ;;  %v3217_v50 = vpack.c.bf16 %v3201_v36, %v3200_v59  ;;  %v3479_v8 = vld [vmem:[%s9085_s26 + $0x9a] sm:$0xff]  ;;  %v6817_v59 = vld [vmem:[%s9085_s26 + $0xcc] sm:$0xff] }
 0x235   : > { %v10422_v55 = vadd.f32 %v1990_v53, %v10332_v37  ;;  %v3203_v37 = vld [vmem:[%s9085_s26 + $0xa9] sm:$0xff]  ;;  %v3495_v36 = vpack.c.bf16 %v3479_v8, %v3478_v44 }
 0x236   : > { %2073 = vst [vmem:[#allocation2 + $0xb8] sm:$0xf] %v2049_v5  ;;  %8123 = vmatmul.mubr.msk.bf16.gmra.mrb[8].mxu1 %vm209_vm2, %v3215_v16  ;;  %v3218_v34 = vpack.c.bf16 %v3203_v37, %v3202_v63  ;;  %v3480_v5 = vld [vmem:[%s9085_s26 + $0xa2] sm:$0xff]  ;;  %v3481_v53 = vld [vmem:[%s9085_s26 + $0xaa] sm:$0xff]  ;;  %v3482_v37 = vld [vmem:[%s9085_s26 + $0xb2] sm:$0xff] }
 0x237   : > { %8447 = vmatmul.mubr.msk.bf16.gmra.mrb[60].mxu0 %vm209_vm2, %v6557_v15  ;;  %8126 = vmatprep.mubr.msk.bf16.mxu1 %vm209_vm2, %v3216_v28  ;;  %v6814_v15 = vld [vmem:[%s9085_s26 + $0xb4] sm:$0xff]  ;;  %v6815_v28 = vld [vmem:[%s9085_s26 + $0xbc] sm:$0xff]  ;;  %v3496_v11 = vpack.c.bf16 %v3481_v53, %v3480_v5 }
 0x238   : > { %8452 = vmatprep.mubr.msk.bf16.mxu0 %vm209_vm2, %v6824_v60  ;;  %v6816_v60 = vld [vmem:[%s9085_s26 + $0xc4] sm:$0xff]  ;;  %v6831_v22 = vpack.c.bf16 %v6815_v28, %v6814_v15 }
 0x239   : > { %v6832_v63 = vpack.c.bf16 %v6817_v59, %v6816_v60 }
 0x23e   : > { %8127 = vmatmul.mubr.msk.bf16.gmra.mrb[12].mxu1 %vm209_vm2, %v3217_v50  ;;  %v6820_v50 = vld [vmem:[%s9085_s26 + $0xe4] sm:$0xff] }
 0x23f   : > { %8453 = vmatmul.mubr.msk.bf16.vlgmr.msra.gmra.mrb[0].mxu0 %vm209_vm2, %v6825_v39  ;;  %8130 = vmatprep.mubr.msk.bf16.mxu1 %vm209_vm2, %v3218_v34  ;;  %v6821_v39 = vld [vmem:[%s9085_s26 + $0xec] sm:$0xff]  ;;  %v3497_v34 = vpack.c.bf16 %v10286_v14, %v3482_v37  ;;  %v3499_v14 = vpack.c.bf16 %v3487_v62, %v10300_v52 }
 0x240   : > { %8456 = vmatprep.mubr.msk.bf16.mxu0 %vm209_vm2, %v6826_v51  ;;  %v6833_v51 = vpack.c.bf16 %v6819_v24, %v6818_v3  ;;  %v6834_v0 = vpack.c.bf16 %v6821_v39, %v6820_v50 }
 0x246   : > { %8131 = vmatmul.mubr.msk.bf16.gmra.mrb[16].mxu1 %vm209_vm2, %v3219_v19 }
 0x247   : > { %8457 = vmatmul.mubr.msk.bf16.gmra.mrb[4].mxu0 %vm209_vm2, %v6827_v27  ;;  %8134 = vmatprep.mubr.msk.bf16.mxu1 %vm209_vm2, %v10197_v45  ;;  %v6829_v45 = vpack.c.bf16 %v6811_v31, %v6810_v49  ;;  %v6835_v31 = vpack.c.bf16 %v6823_v38, %v6822_v35 }
 0x248   : > { %8460 = vmatprep.mubr.msk.bf16.mxu0 %vm209_vm2, %v6828_v40  ;;  %v2303_v40 = vld [vmem:[#allocation2 + $0xb8] sm:$0xf] }
 0x24a   : > { %v10459_v1 = vpop.f32.mrb[44].mxu0 }
 0x24b   : > { %v10461_v47 = vpop.f32.mrb[45].mxu0 }
 0x24c   : > { %v10463_v16 = vpop.f32.mrb[46].mxu0 }
 0x24d   : > { %v10465_v25 = vpop.f32.mrb[47].mxu0 }
 0x24e   : > { %8135 = vmatmul.mubr.msk.bf16.gmra.mrb[64].mxu1 %vm209_vm2, %v3221_v61 }
 0x24f   : > { %8461 = vmatmul.mubr.msk.bf16.gmra.mrb[8].mxu0 %vm209_vm2, %v6829_v45  ;;  %8152 = vmatprep.mubr.msk.bf16.mxu1 %vm209_vm2, %v3494_v32 }
 0x250   : > { %8464 = vmatprep.mubr.msk.bf16.mxu0 %vm209_vm2, %v6830_v21 }
 0x256   : > { %8153 = vmatmul.mubr.msk.bf16.vlgmr.msra.gmra.mrb[12].mxu1 %vm209_vm2, %v3495_v36 }
 0x257   : > { %8465 = vmatmul.mubr.msk.bf16.gmra.mrb[12].mxu0 %vm209_vm2, %v6831_v22  ;;  %8156 = vmatprep.mubr.msk.bf16.mxu1 %vm209_vm2, %v3496_v11 }
 0x258   : > { %8468 = vmatprep.mubr.msk.bf16.mxu0 %vm209_vm2, %v6832_v63 }
 0x25e   : > { %8157 = vmatmul.mubr.msk.bf16.gmra.mrb[16].mxu1 %vm209_vm2, %v3497_v34 }
 0x25f   : > { %8469 = vmatmul.mubr.msk.bf16.gmra.mrb[16].mxu0 %vm209_vm2, %v6833_v51  ;;  %8160 = vmatprep.mubr.msk.bf16.mxu1 %vm209_vm2, %v10292_v58 }
 0x260   : > { %8472 = vmatprep.mubr.msk.bf16.mxu0 %vm209_vm2, %v6834_v0 }
 0x261   : > { %v8032_v46 = vpop.f32.mrb[48].mxu1 }
 0x262   : > { %v2326_v19 = vadd.f32 %v8032_v46, %v10416_v6  ;;  %v2265_v27 = vpop.f32.mrb[49].mxu1 }
 0x263   : > { %v2324_v30 = vadd.f32 %v2265_v27, %v10419_v42  ;;  %v8033_v49 = vpop.f32.mrb[50].mxu1 }
 0x264   : > { %v2327_v20 = vadd.f32 %v8033_v49, %v2303_v40  ;;  %v2268_v4 = vpop.f32.mrb[51].mxu1 }
 0x265   : > { %v2325_v58 = vadd.f32 %v2268_v4, %v10422_v55 }
 0x266   : > { %2351 = vst [vmem:[#allocation2 + $0xb8] sm:$0xf] %v2327_v20  ;;  %8161 = vmatmul.mubr.msk.bf16.gmra.mrb[68].mxu1 %vm209_vm2, %v3499_v14 }
 0x267   : > { %8473 = vmatmul.mubr.msk.bf16.gmra.mrb[64].mxu0 %vm209_vm2, %v6835_v31 }
 0x26d   : > { %v2581_v32 = vld [vmem:[#allocation2 + $0xb8] sm:$0xf] }
 0x27a   : > { %v10503_v18 = vpop.f32.mrb[48].mxu0 }
 0x27b   : > { %v10505_v6 = vpop.f32.mrb[49].mxu0 }
 0x27c   : > { %v10507_v17 = vpop.f32.mrb[50].mxu0 }
 0x27d   : > { %v10509_v52 = vpop.f32.mrb[51].mxu0 }
 0x291   : > { %v8058_v42 = vpop.f32.mrb[52].mxu1 }
 0x292   : > { %v2604_v61 = vadd.f32 %v8058_v42, %v2326_v19  ;;  %v2543_v45 = vpop.f32.mrb[53].mxu1 }
 0x293   : > { %v2602_v21 = vadd.f32 %v2543_v45, %v2324_v30  ;;  %v8059_v44 = vpop.f32.mrb[54].mxu1 }
 0x294   : > { %v2605_v55 = vadd.f32 %v8059_v44, %v2581_v32  ;;  %v2546_v8 = vpop.f32.mrb[55].mxu1 }
 0x295   : > { %v2603_v15 = vadd.f32 %v2546_v8, %v2325_v58 }
 0x296   : > { %2629 = vst [vmem:[#allocation2 + $0xb8] sm:$0xf] %v2605_v55 }
 0x29d   : > { %v2859_v37 = vld [vmem:[#allocation2 + $0xb8] sm:$0xf] }
 0x2aa   : > { %v10511_v28 = vpop.f32.mrb[52].mxu0 }
 0x2ab   : > { %v10513_v5 = vpop.f32.mrb[53].mxu0 }
 0x2ac   : > { %v10515_v53 = vpop.f32.mrb[54].mxu0 }
 0x2ad   : > { %v10517_v60 = vpop.f32.mrb[55].mxu0 }
 0x2c1   : > { %v8084_v59 = vpop.f32.mrb[56].mxu1 }
 0x2c2   : > { %v2882_v36 = vadd.f32 %v8084_v59, %v2604_v61  ;;  %v2821_v22 = vpop.f32.mrb[57].mxu1 }
 0x2c3   : > { %v2880_v11 = vadd.f32 %v2821_v22, %v2602_v21  ;;  %v8085_v63 = vpop.f32.mrb[58].mxu1 }
 0x2c4   : > { %v2883_v3 = vadd.f32 %v8085_v63, %v2859_v37  ;;  %v2824_v24 = vpop.f32.mrb[59].mxu1 }
 0x2c5   : > { %v2881_v50 = vadd.f32 %v2824_v24, %v2603_v15 }
 0x2c6   : > { %2907 = vst [vmem:[#allocation2 + $0xb8] sm:$0xf] %v2883_v3 }
 0x2cd   : > { %v3137_v27 = vld [vmem:[#allocation2 + $0xb8] sm:$0xf] }
 0x2da   : > { %v10519_v39 = vpop.f32.mrb[56].mxu0 }
 0x2db   : > { %v10521_v34 = vpop.f32.mrb[57].mxu0 }
 0x2dc   : > { %v10523_v51 = vpop.f32.mrb[58].mxu0 }
 0x2dd   : > { %10612 = vst [vmem:[#allocation12_spill] sm:$0xff] %v10523_v51  ;;  %v10525_v0 = vpop.f32.mrb[59].mxu0 }
 0x2f1   : > { %v8110_v62 = vpop.f32.mrb[60].mxu1 }
 0x2f2   : > { %v3160_v35 = vadd.f32 %v8110_v62, %v2882_v36  ;;  %v3099_v38 = vpop.f32.mrb[61].mxu1 }
 0x2f3   : > { %v3158_v46 = vadd.f32 %v3099_v38, %v2880_v11  ;;  %v8111_v19 = vpop.f32.mrb[62].mxu1 }
 0x2f4   : > { %v3161_v14 = vadd.f32 %v8111_v19, %v3137_v27  ;;  %v3102_v40 = vpop.f32.mrb[63].mxu1 }
 0x2f5   : > { %v3159_v30 = vadd.f32 %v3102_v40, %v2881_v50 }
 0x2f6   : > { %3185 = vst [vmem:[#allocation2 + $0xb8] sm:$0xf] %v3161_v14 }
 0x2f9   : > { %v8116_v49 = vpop.f32.mrb[0].mxu1 }
 0x2fa   : > { %v3297_v31 = vpop.f32.mrb[1].mxu1 }
 0x2fb   : > { %v8117_v20 = vpop.f32.mrb[2].mxu1 }
 0x2fc   : > { %v3300_v4 = vpop.f32.mrb[3].mxu1 }
 0x301   : > { %v8120_v58 = vpop.f32.mrb[4].mxu1 }
 0x302   : > { %v3313_v42 = vpop.f32.mrb[5].mxu1 }
 0x303   : > { %v8121_v61 = vpop.f32.mrb[6].mxu1 }
 0x304   : > { %v3316_v45 = vpop.f32.mrb[7].mxu1 }
 0x309   : > { %v8124_v32 = vpop.f32.mrb[8].mxu1 }
 0x30a   : > { %v3329_v21 = vpop.f32.mrb[9].mxu1  ;;  %v10527_v44 = vpop.f32.mrb[60].mxu0 }
 0x30b   : > { %v8125_v55 = vpop.f32.mrb[10].mxu1  ;;  %v10529_v8 = vpop.f32.mrb[61].mxu0 }
 0x30c   : > { %v3332_v15 = vpop.f32.mrb[11].mxu1  ;;  %v10531_v59 = vpop.f32.mrb[62].mxu0 }
 0x30d   : > { %10613 = vst [vmem:[#allocation3_spill] sm:$0xff] %v10531_v59  ;;  %v10533_v36 = vpop.f32.mrb[63].mxu0 }
 0x312   : > { %v8454_v22 = vpop.f32.mrb[0].mxu0 }
 0x313   : > { %v8480_v11 = vadd.f32 %v8454_v22, %v8116_v49  ;;  %v6911_v63 = vpop.f32.mrb[1].mxu0 }
 0x314   : > { %v8483_v37 = vadd.f32 %v6911_v63, %v3297_v31  ;;  %v8455_v3 = vpop.f32.mrb[2].mxu0 }
 0x315   : > { %7056 = vst [vmem:[#allocation2 + $0x10] sm:$0xff] %v8480_v11  ;;  %v8486_v24 = vadd.f32 %v8455_v3, %v8117_v20  ;;  %v6914_v50 = vpop.f32.mrb[3].mxu0 }
 0x316   : > { %7054 = vst [vmem:[#allocation2] sm:$0xff] %v8483_v37  ;;  %v8489_v62 = vadd.f32 %v6914_v50, %v3300_v4 }
 0x317   : > { %7057 = vst [vmem:[#allocation2 + $0x18] sm:$0xff] %v8486_v24  ;;  %v3415_v24 = vld [vmem:[#allocation2 + $0xb8] sm:$0xf] }
 0x318   : > { %7055 = vst [vmem:[#allocation2 + $0x8] sm:$0xff] %v8489_v62 }
 0x31a   : > { %v8458_v38 = vpop.f32.mrb[4].mxu0 }
 0x31b   : > { %v8492_v19 = vadd.f32 %v8458_v38, %v8120_v58  ;;  %v6927_v27 = vpop.f32.mrb[5].mxu0 }
 0x31c   : > { %v8495_v14 = vadd.f32 %v6927_v27, %v3313_v42  ;;  %v8459_v40 = vpop.f32.mrb[6].mxu0 }
 0x31d   : > { %7060 = vst [vmem:[#allocation2 + $0x30] sm:$0xff] %v8492_v19  ;;  %v8498_v59 = vadd.f32 %v8459_v40, %v8121_v61  ;;  %v6930_v51 = vpop.f32.mrb[7].mxu0 }
 0x31e   : > { %7058 = vst [vmem:[#allocation2 + $0x20] sm:$0xff] %v8495_v14  ;;  %v8501_v49 = vadd.f32 %v6930_v51, %v3316_v45 }
 0x31f   : > { %7061 = vst [vmem:[#allocation2 + $0x38] sm:$0xff] %v8498_v59 }
 0x320   : > { %7059 = vst [vmem:[#allocation2 + $0x28] sm:$0xff] %v8501_v49 }
 0x321   : > { %v8136_v31 = vpop.f32.mrb[64].mxu1 }
 0x322   : > { %v3438_v22 = vadd.f32 %v8136_v31, %v3160_v35  ;;  %v8462_v20 = vpop.f32.mrb[8].mxu0  ;;  %v3377_v11 = vpop.f32.mrb[65].mxu1 }
 0x323   : > { %v8504_v63 = vadd.f32 %v8462_v20, %v8124_v32  ;;  %v3436_v4 = vadd.f32 %v3377_v11, %v3158_v46  ;;  %v6943_v37 = vpop.f32.mrb[9].mxu0  ;;  %v8137_v3 = vpop.f32.mrb[66].mxu1 }
 0x324   : > { %v8507_v58 = vadd.f32 %v6943_v37, %v3329_v21  ;;  %v3439_v50 = vadd.f32 %v8137_v3, %v3415_v24  ;;  %v8463_v42 = vpop.f32.mrb[10].mxu0  ;;  %v3380_v62 = vpop.f32.mrb[67].mxu1 }
 0x325   : > { %7064 = vst [vmem:[#allocation2 + $0x50] sm:$0xff] %v8504_v63  ;;  %v8510_v61 = vadd.f32 %v8463_v42, %v8125_v55  ;;  %v3437_v38 = vadd.f32 %v3380_v62, %v3159_v30  ;;  %v6946_v19 = vpop.f32.mrb[11].mxu0 }
 0x326   : > { %7062 = vst [vmem:[#allocation2 + $0x40] sm:$0xff] %v8507_v58  ;;  %3463 = vst [vmem:[#allocation2 + $0xb8] sm:$0xf] %v3439_v50  ;;  %v8513_v51 = vadd.f32 %v6946_v19, %v3332_v15 }
 0x327   : > { %7065 = vst [vmem:[#allocation2 + $0x58] sm:$0xff] %v8510_v61  ;;  %v10538_v61 = vld [vmem:[%s10595_s2] ss:$0 sm:$0xff] }
 0x328   : > { %7063 = vst [vmem:[#allocation2 + $0x48] sm:$0xff] %v8513_v51 }
 0x329   : > { %v8154_v35 = vpop.f32.mrb[12].mxu1 }
 0x32a   : > { %v8466_v45 = vpop.f32.mrb[12].mxu0  ;;  %v3623_v32 = vpop.f32.mrb[13].mxu1 }
 0x32b   : > { %v8516_v46 = vadd.f32 %v8466_v45, %v8154_v35  ;;  %v6959_v59 = vpop.f32.mrb[13].mxu0  ;;  %v8155_v27 = vpop.f32.mrb[14].mxu1 }
 0x32c   : > { %v8519_v14 = vadd.f32 %v6959_v59, %v3623_v32  ;;  %v8467_v21 = vpop.f32.mrb[14].mxu0  ;;  %v3626_v40 = vpop.f32.mrb[15].mxu1 }
 0x32d   : > { %7068 = vst [vmem:[#allocation2 + $0x70] sm:$0xff] %v8516_v46  ;;  %v8522_v49 = vadd.f32 %v8467_v21, %v8155_v27  ;;  %v6962_v31 = vpop.f32.mrb[15].mxu0  ;;  %v3693_v59 = vld [vmem:[#allocation2 + $0xb8] sm:$0xf] }
 0x32e   : > { %7066 = vst [vmem:[#allocation2 + $0x60] sm:$0xff] %v8519_v14  ;;  %v8525_v30 = vadd.f32 %v6962_v31, %v3626_v40  ;;  %v10614_v14 = vld [vmem:[#allocation4_spill] sm:$0xff] }
 0x32f   : > { %7069 = vst [vmem:[#allocation2 + $0x78] sm:$0xff] %v8522_v49 }
 0x330   : > { %7067 = vst [vmem:[#allocation2 + $0x68] sm:$0xff] %v8525_v30  ;;  %v10615_v30 = vld [vmem:[#allocation5_spill] sm:$0xff] }
 0x331   : > { %v8158_v55 = vpop.f32.mrb[16].mxu1 }
 0x332   : > { %v8470_v15 = vpop.f32.mrb[16].mxu0  ;;  %v3639_v20 = vpop.f32.mrb[17].mxu1 }
 0x333   : > { %v8528_v11 = vadd.f32 %v8470_v15, %v8158_v55  ;;  %v6975_v63 = vpop.f32.mrb[17].mxu0  ;;  %v8159_v37 = vpop.f32.mrb[18].mxu1 }
 0x334   : > { %v8531_v3 = vadd.f32 %v6975_v63, %v3639_v20  ;;  %v8471_v24 = vpop.f32.mrb[18].mxu0  ;;  %v3642_v58 = vpop.f32.mrb[19].mxu1 }
 0x335   : > { %7072 = vst [vmem:[#allocation2 + $0x90] sm:$0xff] %v8528_v11  ;;  %v8534_v50 = vadd.f32 %v8471_v24, %v8159_v37  ;;  %v6978_v42 = vpop.f32.mrb[19].mxu0  ;;  %v10616_v11 = vld [vmem:[#allocation8_spill] sm:$0xff] }
 0x336   : > { %7070 = vst [vmem:[#allocation2 + $0x80] sm:$0xff] %v8531_v3  ;;  %v8537_v62 = vadd.f32 %v6978_v42, %v3642_v58  ;;  %v10618_v3 = vld [vmem:[#allocation7_spill] sm:$0xff] }
 0x337   : > { %7073 = vst [vmem:[#allocation2 + $0x98] sm:$0xff] %v8534_v50  ;;  %v10619_v50 = vld [vmem:[#allocation11_spill] sm:$0xff] }
 0x338   : > { %7071 = vst [vmem:[#allocation2 + $0x88] sm:$0xff] %v8537_v62 }
 0x339   : > { %v8162_v19 = vpop.f32.mrb[68].mxu1 }
 0x33a   : > { %v3716_v51 = vadd.f32 %v8162_v19, %v3438_v22  ;;  %v3655_v35 = vpop.f32.mrb[69].mxu1  ;;  %v8474_v45 = vpop.f32.mrb[64].mxu0  ;;  %v10617_v22 = vld [vmem:[#allocation9_spill] sm:$0xff] }
 0x33b   : > { %v3714_v32 = vadd.f32 %v3655_v35, %v3436_v4  ;;  %v8163_v46 = vpop.f32.mrb[70].mxu1  ;;  %v6991_v27 = vpop.f32.mrb[65].mxu0 }
 0x33c   : > { %v3994_v21 = vadd.f32 %v10614_v14, %v3716_v51  ;;  %v3717_v40 = vadd.f32 %v8163_v46, %v3693_v59  ;;  %v3658_v49 = vpop.f32.mrb[71].mxu1  ;;  %v10541_v31 = vpop.f32.mrb[66].mxu0  ;;  %v10620_v59 = vld [vmem:[#allocation6_spill] sm:$0xff] }
 0x33d   : > { %v3992_v55 = vadd.f32 %v10615_v30, %v3714_v32  ;;  %v3715_v15 = vadd.f32 %v3658_v49, %v3437_v38  ;;  %v6994_v20 = vpop.f32.mrb[67].mxu0 }
 0x33e   : > { %v4272_v63 = vadd.f32 %v10616_v11, %v3994_v21  ;;  %3741 = vst [vmem:[#allocation2 + $0xb8] sm:$0xf] %v3717_v40 }
 0x33f   : > { %v4270_v37 = vadd.f32 %v10617_v22, %v3992_v55  ;;  %v3993_v4 = vadd.f32 %v10618_v3, %v3715_v15  ;;  %v10622_v22 = vld [vmem:[#allocation12_spill] sm:$0xff]  ;;  %v10623_v3 = vld [vmem:[#allocation3_spill] sm:$0xff] }
 0x340   : > { %v4550_v24 = vadd.f32 %v10073_v54, %v4272_v63 }
 0x341   : > { %v4548_v58 = vadd.f32 %v10075_v9, %v4270_v37  ;;  %v4271_v42 = vadd.f32 %v10619_v50, %v3993_v4 }
 0x342   : > { %v4828_v62 = vadd.f32 %v10171_v2, %v4550_v24 }
 0x343   : > { %v4826_v19 = vadd.f32 %v10173_v7, %v4548_v58  ;;  %v4549_v38 = vadd.f32 %v10079_v12, %v4271_v42 }
 0x344   : > { %v5106_v51 = vadd.f32 %v10269_v13, %v4828_v62 }
 0x345   : > { %v5104_v35 = vadd.f32 %v10271_v43, %v4826_v19  ;;  %v3971_v32 = vld [vmem:[#allocation2 + $0xb8] sm:$0xf]  ;;  %v4827_v46 = vadd.f32 %v10177_v10, %v4549_v38 }
 0x346   : > { %v3995_v14 = vadd.f32 %v10620_v59, %v3971_v32  ;;  %v5384_v54 = vadd.f32 %v10370_v56, %v5106_v51 }
 0x347   : > { %v5105_v9 = vadd.f32 %v10275_v29, %v4827_v46  ;;  %v5382_v21 = vadd.f32 %v10372_v41, %v5104_v35 }
 0x348   : > { %4019 = vst [vmem:[#allocation2 + $0xb8] sm:$0xf] %v3995_v14  ;;  %v5662_v2 = vadd.f32 %v10459_v1, %v5384_v54 }
 0x349   : > { %v5660_v12 = vadd.f32 %v10461_v47, %v5382_v21  ;;  %v5383_v7 = vadd.f32 %v10376_v57, %v5105_v9  ;;  %v10621_v57 = vld [vmem:[#allocation10_spill] sm:$0xff] }
 0x34a   : > { %v5940_v13 = vadd.f32 %v10503_v18, %v5662_v2 }
 0x34b   : > { %v5938_v43 = vadd.f32 %v10505_v6, %v5660_v12  ;;  %v5661_v10 = vadd.f32 %v10465_v25, %v5383_v7 }
 0x34c   : > { %v6218_v40 = vadd.f32 %v10511_v28, %v5940_v13 }
 0x34d   : > { %v6216_v56 = vadd.f32 %v10513_v5, %v5938_v43  ;;  %v5939_v29 = vadd.f32 %v10509_v52, %v5661_v10 }
 0x34e   : > { %v6496_v41 = vadd.f32 %v10519_v39, %v6218_v40 }
 0x34f   : > { %v4249_v49 = vld [vmem:[#allocation2 + $0xb8] sm:$0xf]  ;;  %v6494_v1 = vadd.f32 %v10521_v34, %v6216_v56  ;;  %v6217_v47 = vadd.f32 %v10517_v60, %v5939_v29 }
 0x350   : > { %v4273_v30 = vadd.f32 %v10621_v57, %v4249_v49  ;;  %v6774_v18 = vadd.f32 %v10527_v44, %v6496_v41 }
 0x351   : > { %v6772_v6 = vadd.f32 %v10529_v8, %v6494_v1  ;;  %v6495_v25 = vadd.f32 %v10525_v0, %v6217_v47 }
 0x352   : > { %4297 = vst [vmem:[#allocation2 + $0xb8] sm:$0xf] %v4273_v30  ;;  %v7052_v28 = vadd.f32 %v8474_v45, %v6774_v18 }
 0x353   : > { %v7050_v5 = vadd.f32 %v6991_v27, %v6772_v6  ;;  %v6773_v52 = vadd.f32 %v10533_v36, %v6495_v25 }
 0x354   : > { %7076 = vst [vmem:[#allocation2 + $0xb0] sm:$0xff] %v7052_v28 }
 0x355   : > { %7074 = vst [vmem:[#allocation2 + $0xa0] sm:$0xff] %v7050_v5  ;;  %v7051_v39 = vadd.f32 %v6994_v20, %v6773_v52 }
 0x357   : > { %7075 = vst [vmem:[#allocation2 + $0xa8] sm:$0xff] %v7051_v39 }
 0x359   : > { %v4527_v34 = vld [vmem:[#allocation2 + $0xb8] sm:$0xf] }
 0x35a   : > { %v4551_v60 = vadd.f32 %v10077_v23, %v4527_v34 }
 0x35c   : > { %4575 = vst [vmem:[#allocation2 + $0xb8] sm:$0xf] %v4551_v60 }
 0x363   : > { %v4805_v55 = vld [vmem:[#allocation2 + $0xb8] sm:$0xf] }
 0x364   : > { %v4829_v44 = vadd.f32 %v10175_v48, %v4805_v55 }
 0x366   : > { %4853 = vst [vmem:[#allocation2 + $0xb8] sm:$0xf] %v4829_v44 }
 0x36d   : > { %v5083_v8 = vld [vmem:[#allocation2 + $0xb8] sm:$0xf] }
 0x36e   : > { %v5107_v0 = vadd.f32 %v10273_v33, %v5083_v8 }
 0x370   : > { %5131 = vst [vmem:[#allocation2 + $0xb8] sm:$0xf] %v5107_v0 }
 0x377   : > { %v5361_v45 = vld [vmem:[#allocation2 + $0xb8] sm:$0xf] }
 0x378   : > { %v5385_v27 = vadd.f32 %v10374_v26, %v5361_v45 }
 0x37a   : > { %5409 = vst [vmem:[#allocation2 + $0xb8] sm:$0xf] %v5385_v27 }
 0x381   : > { %v5639_v36 = vld [vmem:[#allocation2 + $0xb8] sm:$0xf] }
 0x382   : > { %v5663_v15 = vadd.f32 %v10463_v16, %v5639_v36 }
 0x384   : > { %5687 = vst [vmem:[#allocation2 + $0xb8] sm:$0xf] %v5663_v15 }
 0x38b   : > { %v5917_v20 = vld [vmem:[#allocation2 + $0xb8] sm:$0xf] }
 0x38c   : > { %v5941_v23 = vadd.f32 %v10507_v17, %v5917_v20 }
 0x38e   : > { %5965 = vst [vmem:[#allocation2 + $0xb8] sm:$0xf] %v5941_v23 }
 0x395   : > { %v6195_v11 = vld [vmem:[#allocation2 + $0xb8] sm:$0xf] }
 0x396   : > { %v6219_v48 = vadd.f32 %v10515_v53, %v6195_v11 }
 0x398   : > { %6243 = vst [vmem:[#allocation2 + $0xb8] sm:$0xf] %v6219_v48 }
 0x39f   : > { %v6473_v63 = vld [vmem:[#allocation2 + $0xb8] sm:$0xf] }
 0x3a0   : > { %v6497_v33 = vadd.f32 %v10622_v22, %v6473_v63 }
 0x3a2   : > { %6521 = vst [vmem:[#allocation2 + $0xb8] sm:$0xf] %v6497_v33 }
 0x3a9   : > { %v6751_v37 = vld [vmem:[#allocation2 + $0xb8] sm:$0xf] }
 0x3aa   : > { %v6775_v26 = vadd.f32 %v10623_v3, %v6751_v37 }
 0x3ac   : > { %6799 = vst [vmem:[#allocation2 + $0xb8] sm:$0xf] %v6775_v26 }
 0x3b3   : > { %v7029_v4 = vld [vmem:[#allocation2 + $0xb8] sm:$0xf] }
 0x3b4   : > { %v7053_v16 = vadd.f32 %v10541_v31, %v7029_v4 }
 0x3b6   : > { %7077 = vst [vmem:[#allocation2 + $0xb8] sm:$0xf] %v7053_v16 }
 0x3b7 LB: >> { %s7496_s24 = sshll.u32 %s9030_s23, 4  ;;  %s7084_s23 = sadd.s32 1, %s9030_s23   ;;  %s9030_s23 = sphi %s9028_s23, %s7084_s23  }
 0x3b8   : >> { %s7086_s25 = scalar_lea.vmem [#allocation2], %s7496_s24  ;;  %s7097_s27 = scalar_lea.vmem %s9097_s6, %s7496_s24 }
 0x3b9   : >> { %p7081_p4 = scmp.ge.s32.totalorder %s7084_s23, 12  }
 0x3bb   : > { %7083 = sbr.rel (!%p7081_p4) target bundleno = 951 (0x3b7), region = 95 }
 0x3bd   : >> { %v7087_v17 = vld [vmem:[%s7086_s25] sm:$0xff]  ;;  %v7088_v53 = vld [vmem:[%s7086_s25 + $0x8] sm:$0xf] }
 0x3be   : >> { %v7095_v24 = vadd.f32 %v10538_v61, %v7087_v17  ;;  %v7096_v58 = vadd.f32 %v10538_v61, %v7088_v53 }
 0x3c0   : >> { %7098 = vst [vmem:[%s7097_s27] sm:$0xff] %v7095_v24  ;;  %7099 = vst [vmem:[%s7097_s27 + $0x8] sm:$0xf] %v7096_v58 }
 0x3c2 PF: > { %s13_s12 = sadd.s32 1, %s9026_s12  }
 0x3c3   : > { %p10_p5 = scmp.ge.s32.totalorder %s13_s12, 4  }
 0x3c5   :  { %12 = sbr.rel (!%p10_p5) target bundleno = 1 (0x1), region = 106 }

</bundles_post_ra>
